<compile_context>
chip_gen: v5e
topology: v5e:2x2
jax: 0.10.0
libtpu: 0.0.40
codegen_flags: <defaults>
</compile_context>

<pallas_src>
import jax
import jax.numpy as jnp
import numpy as np
from jax.experimental import pallas as pl
from jax.experimental.pallas import tpu as pltpu  # noqa: F401  (TPU backend assumed)

# ---- model hyper-parameters (dim, cross_head, cross_dim) ----
DIM = 32
HEADS = 4
DIM_HEAD = 8
INNER = HEADS * DIM_HEAD
SCALE = DIM_HEAD ** -0.5
LN_EPS = 1e-5
CROSS_DEPTH = 2
NEG_INF = -1e30


# -------------------------- fused Pallas kernel --------------------------
def _fused_cross_kernel(
    sm_cls_ref, lg_cls_ref, sm_ctx_ref, lg_ctx_ref, sm_mask_ref, lg_mask_ref,
    g_sm_ref, b_sm_ref, wq_sm_ref, wkv_sm_ref, wo_sm_ref, bo_sm_ref,
    g_lg_ref, b_lg_ref, wq_lg_ref, wkv_lg_ref, wo_lg_ref, bo_lg_ref,
    sm_out_ref, lg_out_ref,
):
    """All CROSS_DEPTH layers x both branches of CrossTransformer for the cls tokens."""
    sm_cls = sm_cls_ref[...]                       # (B, D)
    lg_cls = lg_cls_ref[...]                       # (B, D)

    # Contexts are constant across layers -> load + broadcast to head-major once.
    sm_ctx = sm_ctx_ref[...]                       # (B*Nsm, D): context of the lg branch
    lg_ctx = lg_ctx_ref[...]                       # (B*Nlg, D): context of the sm branch
    sm_ctx_h = jnp.broadcast_to(sm_ctx[None], (HEADS,) + sm_ctx.shape)   # (H, B*Nsm, D)
    lg_ctx_h = jnp.broadcast_to(lg_ctx[None], (HEADS,) + lg_ctx.shape)   # (H, B*Nlg, D)
    sm_mask = sm_mask_ref[...]                     # (B, B*Nsm) additive 0 / -1e30
    lg_mask = lg_mask_ref[...]                     # (B, B*Nlg)

    p_sm = (g_sm_ref[...], b_sm_ref[...], wq_sm_ref[...],
            wkv_sm_ref[...], wo_sm_ref[...], bo_sm_ref[...])
    p_lg = (g_lg_ref[...], b_lg_ref[...], wq_lg_ref[...],
            wkv_lg_ref[...], wo_lg_ref[...], bo_lg_ref[...])

    def attend(cls_vec, ctx_h, add_mask, g, beta, wq_h, wkv_h, wo_h, bo):
        # cls_vec (B, D); ctx_h (H, B*Nc, D); add_mask (B, B*Nc)
        # g, beta, bo (1, D); wq_h (H, D, Dh); wkv_h (H, D, 2*Dh); wo_h (H, Dh, D)
        # --- PreNorm (LayerNorm over D) on the cls token, whole batch at once ---
        mean = jnp.mean(cls_vec, axis=-1, keepdims=True)
        cen = cls_vec - mean
        var = jnp.mean(cen * cen, axis=-1, keepdims=True)
        xn = cen * jax.lax.rsqrt(var + LN_EPS) * g + beta                # (B, D)

        # --- head-batched projections (head = leading batch axis of 3-D einsums) ---
        xn_h = jnp.broadcast_to(xn[None], (HEADS,) + xn.shape)           # (H, B, D)
        q_h = jnp.einsum('hbd,hde->hbe', xn_h, wq_h,
                         preferred_element_type=jnp.float32)             # (H, B, Dh)
        kv_self = jnp.einsum('hbd,hde->hbe', xn_h, wkv_h,
                             preferred_element_type=jnp.float32)         # (H, B, 2*Dh)
        kv_ctx = jnp.einsum('hnd,hde->hne', ctx_h, wkv_h,
                            preferred_element_type=jnp.float32)          # (H, B*Nc, 2*Dh)
        k_self, v_self = kv_self[..., :DIM_HEAD], kv_self[..., DIM_HEAD:]
        k_ctx, v_ctx = kv_ctx[..., :DIM_HEAD], kv_ctx[..., DIM_HEAD:]

        # --- scores: kv_include_self handled as a separate rank-1 term (no concat) ---
        s_self = jnp.sum(q_h * k_self, axis=-1, keepdims=True) * SCALE   # (H, B, 1)
        s_ctx = jnp.einsum('hqd,hkd->hqk', q_h, k_ctx,
                           preferred_element_type=jnp.float32) * SCALE   # (H, B, B*Nc)
        s_ctx = s_ctx + add_mask[None]            # kill cross-batch score terms

        # --- one numerically-stable softmax for all heads & batch elements ---
        m = jnp.maximum(jnp.max(s_ctx, axis=-1, keepdims=True), s_self)  # (H, B, 1)
        e_self = jnp.exp(s_self - m)
        e_ctx = jnp.exp(s_ctx - m)
        denom = e_self + jnp.sum(e_ctx, axis=-1, keepdims=True)
        r = pl.reciprocal(denom, approx=True)     # EUP slot, off the VPU critical path
        o_h = (e_self * v_self +
               jnp.einsum('hqk,hkd->hqd', e_ctx, v_ctx,
                          preferred_element_type=jnp.float32)) * r       # (H, B, Dh)

        # --- output projection (summed over heads) + bias + residual ---
        y_h = jnp.einsum('hbd,hde->hbe', o_h, wo_h,
                         preferred_element_type=jnp.float32)             # (H, B, D)
        return cls_vec + jnp.sum(y_h, axis=0) + bo                       # (B, D)

    for li in range(CROSS_DEPTH):                 # static unroll over depth
        hs = slice(li * HEADS, (li + 1) * HEADS)
        ls = slice(li, li + 1)
        sm_cls = attend(sm_cls, lg_ctx_h, lg_mask,
                        p_sm[0][ls], p_sm[1][ls], p_sm[2][hs], p_sm[3][hs],
                        p_sm[4][hs], p_sm[5][ls])
        lg_cls = attend(lg_cls, sm_ctx_h, sm_mask,
                        p_lg[0][ls], p_lg[1][ls], p_lg[2][hs], p_lg[3][hs],
                        p_lg[4][hs], p_lg[5][ls])

    sm_out_ref[...] = sm_cls                      # one lane-dense (B, D) store each
    lg_out_ref[...] = lg_cls


# -------------------------- host-side packing & wrapper --------------------------
def _cross_batch_mask(batch, n_ctx):
    """Additive mask (B, B*n_ctx): 0 where the context row belongs to the query's batch."""
    q = jnp.arange(batch)[:, None]
    k = jnp.arange(batch * n_ctx)[None, :] // n_ctx
    return jnp.where(q == k, 0.0, NEG_INF).astype(jnp.float32)


def _pack_branch(ps):
    """Stack per-layer params of one branch into head-major arrays (host side)."""
    g = jnp.stack([p["gamma"].reshape(DIM) for p in ps])                          # (L, D)
    b = jnp.stack([p["beta"].reshape(DIM) for p in ps])                           # (L, D)
    bo = jnp.stack([p["bo"].reshape(DIM) for p in ps])                            # (L, D)
    wq = jnp.concatenate(
        [p["wq"].reshape(DIM, HEADS, DIM_HEAD).transpose(1, 0, 2) for p in ps], 0)  # (L*H, D, Dh)

    def _kv(wkv):
        wk = wkv[:, :INNER].reshape(DIM, HEADS, DIM_HEAD).transpose(1, 0, 2)
        wv = wkv[:, INNER:].reshape(DIM, HEADS, DIM_HEAD).transpose(1, 0, 2)
        return jnp.concatenate([wk, wv], axis=-1)                                 # (H, D, 2*Dh)

    wkv = jnp.concatenate([_kv(p["wkv"]) for p in ps], 0)                         # (L*H, D, 2*Dh)
    wo = jnp.concatenate([p["wo"].reshape(HEADS, DIM_HEAD, DIM) for p in ps], 0)  # (L*H, Dh, D)
    return g, b, wq, wkv, wo, bo


def cross_transformer(sm_tokens, lg_tokens, layers):
    """sm_tokens (B, Nsm, D), lg_tokens (B, Nlg, D) -> updated (sm_tokens, lg_tokens)."""
    B, n_sm, D = sm_tokens.shape
    n_lg = lg_tokens.shape[1]

    sm_cls0 = sm_tokens[:, 0, :]                      # (B, D)
    lg_cls0 = lg_tokens[:, 0, :]
    sm_ctx_flat = sm_tokens.reshape(B * n_sm, D)      # context of the lg branch
    lg_ctx_flat = lg_tokens.reshape(B * n_lg, D)      # context of the sm branch
    sm_mask = _cross_batch_mask(B, n_sm)
    lg_mask = _cross_batch_mask(B, n_lg)

    p_sm = _pack_branch([layer[0] for layer in layers])
    p_lg = _pack_branch([layer[1] for layer in layers])

    sm_cls_new, lg_cls_new = pl.pallas_call(
        _fused_cross_kernel,
        out_shape=(jax.ShapeDtypeStruct((B, D), jnp.float32),
                   jax.ShapeDtypeStruct((B, D), jnp.float32)),
    )(sm_cls0, lg_cls0, sm_ctx_flat, lg_ctx_flat, sm_mask, lg_mask, *p_sm, *p_lg)

    sm_out = jnp.concatenate([sm_cls_new[:, None, :], sm_tokens[:, 1:]], axis=1)
    lg_out = jnp.concatenate([lg_cls_new[:, None, :], lg_tokens[:, 1:]], axis=1)
    return sm_out, lg_out


# -------------------------- pure-JAX reference --------------------------
def _layernorm_ref(x, g, b):
    mean = x.mean(-1, keepdims=True)
    var = ((x - mean) ** 2).mean(-1, keepdims=True)
    return (x - mean) / jnp.sqrt(var + LN_EPS) * g + b


def _attn_ref(cls_tok, ctx_tok, p):
    x = _layernorm_ref(cls_tok, p["gamma"][0], p["beta"][0])
    context = jnp.concatenate([x, ctx_tok], axis=1)
    q = x @ p["wq"]
    kv = context @ p["wkv"]
    k, v = kv[..., :INNER], kv[..., INNER:]
    B = cls_tok.shape[0]
    qh = q.reshape(B, 1, HEADS, DIM_HEAD).transpose(0, 2, 1, 3)
    kh = k.reshape(B, -1, HEADS, DIM_HEAD).transpose(0, 2, 1, 3)
    vh = v.reshape(B, -1, HEADS, DIM_HEAD).transpose(0, 2, 1, 3)
    dots = jnp.einsum("bhid,bhjd->bhij", qh, kh) * SCALE
    a = jax.nn.softmax(dots, axis=-1)
    o = jnp.einsum("bhij,bhjd->bhid", a, vh)
    o = o.transpose(0, 2, 1, 3).reshape(B, 1, INNER)
    return o @ p["wo"] + p["bo"][0]


def cross_transformer_ref(sm_tokens, lg_tokens, layers):
    sm_cls, sm_patch = sm_tokens[:, :1], sm_tokens[:, 1:]
    lg_cls, lg_patch = lg_tokens[:, :1], lg_tokens[:, 1:]
    for p_sm, p_lg in layers:
        sm_cls = _attn_ref(sm_cls, lg_tokens, p_sm) + sm_cls
        lg_cls = _attn_ref(lg_cls, sm_tokens, p_lg) + lg_cls
    return (jnp.concatenate([sm_cls, sm_patch], axis=1),
            jnp.concatenate([lg_cls, lg_patch], axis=1))


# -------------------------- parameter init --------------------------
def init_attn_params(key):
    k1, k2, k3 = jax.random.split(key, 3)
    return {
        "gamma": jnp.ones((1, DIM), jnp.float32),
        "beta": jnp.zeros((1, DIM), jnp.float32),
        "wq": 0.02 * jax.random.normal(k1, (DIM, INNER), jnp.float32),
        "wkv": 0.02 * jax.random.normal(k2, (DIM, 2 * INNER), jnp.float32),
        "wo": 0.02 * jax.random.normal(k3, (INNER, DIM), jnp.float32),
        "bo": jnp.zeros((1, DIM), jnp.float32),
    }


if __name__ == "__main__":
    key = jax.random.PRNGKey(0)
    k_sm, k_lg, k_params = jax.random.split(key, 3)

    B, N_SM, N_LG = 2, 8, 10
    sm_tokens = jax.random.normal(k_sm, (B, N_SM, DIM), jnp.float32)
    lg_tokens = jax.random.normal(k_lg, (B, N_LG, DIM), jnp.float32)

    layers = []
    for d in range(CROSS_DEPTH):
        ka, kb = jax.random.split(jax.random.fold_in(k_params, d))
        layers.append((init_attn_params(ka), init_attn_params(kb)))

    fwd = jax.jit(cross_transformer)
    sm_out, lg_out = fwd(sm_tokens, lg_tokens, layers)
    sm_out = jax.block_until_ready(sm_out)
    lg_out = jax.block_until_ready(lg_out)

    sm_ref, lg_ref = cross_transformer_ref(sm_tokens, lg_tokens, layers)
    # tolerance leaves room for the approx (EUP) reciprocal in the softmax
    np.testing.assert_allclose(np.asarray(sm_out), np.asarray(sm_ref), rtol=5e-4, atol=5e-4)
    np.testing.assert_allclose(np.asarray(lg_out), np.asarray(lg_ref), rtol=5e-4, atol=5e-4)

    print("KERNEL_OK")
</pallas_src>

<mosaic_0001>
module attributes {stable_mosaic.version = 11 : i64} {
  func.func @_fused_cross_kernel(%arg0: memref<2x32xf32, #tpu.memory_space<vmem>>, %arg1: memref<2x32xf32, #tpu.memory_space<vmem>>, %arg2: memref<16x32xf32, #tpu.memory_space<vmem>>, %arg3: memref<20x32xf32, #tpu.memory_space<vmem>>, %arg4: memref<2x16xf32, #tpu.memory_space<vmem>>, %arg5: memref<2x20xf32, #tpu.memory_space<vmem>>, %arg6: memref<2x32xf32, #tpu.memory_space<vmem>>, %arg7: memref<2x32xf32, #tpu.memory_space<vmem>>, %arg8: memref<8x32x8xf32, #tpu.memory_space<vmem>>, %arg9: memref<8x32x16xf32, #tpu.memory_space<vmem>>, %arg10: memref<8x8x32xf32, #tpu.memory_space<vmem>>, %arg11: memref<2x32xf32, #tpu.memory_space<vmem>>, %arg12: memref<2x32xf32, #tpu.memory_space<vmem>>, %arg13: memref<2x32xf32, #tpu.memory_space<vmem>>, %arg14: memref<8x32x8xf32, #tpu.memory_space<vmem>>, %arg15: memref<8x32x16xf32, #tpu.memory_space<vmem>>, %arg16: memref<8x8x32xf32, #tpu.memory_space<vmem>>, %arg17: memref<2x32xf32, #tpu.memory_space<vmem>>, %arg18: memref<2x32xf32, #tpu.memory_space<vmem>>, %arg19: memref<2x32xf32, #tpu.memory_space<vmem>>) attributes {dimension_semantics = [], scalar_prefetch = 0 : i64, scratch_operands = 0 : i64, tpu.core_type = #tpu.core_type<tc>} {
    %c0 = arith.constant 0 : index
    %c0_0 = arith.constant 0 : index
    %0 = vector.load %arg0[%c0, %c0_0] : memref<2x32xf32, #tpu.memory_space<vmem>>, vector<2x32xf32>
    %c0_1 = arith.constant 0 : index
    %c0_2 = arith.constant 0 : index
    %1 = vector.load %arg1[%c0_1, %c0_2] : memref<2x32xf32, #tpu.memory_space<vmem>>, vector<2x32xf32>
    %c0_3 = arith.constant 0 : index
    %c0_4 = arith.constant 0 : index
    %2 = vector.load %arg2[%c0_3, %c0_4] : memref<16x32xf32, #tpu.memory_space<vmem>>, vector<16x32xf32>
    %c0_5 = arith.constant 0 : index
    %c0_6 = arith.constant 0 : index
    %3 = vector.load %arg3[%c0_5, %c0_6] : memref<20x32xf32, #tpu.memory_space<vmem>>, vector<20x32xf32>
    %4 = vector.shape_cast %2 : vector<16x32xf32> to vector<1x16x32xf32>
    %5 = vector.shape_cast %4 : vector<1x16x32xf32> to vector<1x16x32xf32>
    %6 = vector.broadcast %5 : vector<1x16x32xf32> to vector<4x16x32xf32>
    %7 = vector.shape_cast %3 : vector<20x32xf32> to vector<1x20x32xf32>
    %8 = vector.shape_cast %7 : vector<1x20x32xf32> to vector<1x20x32xf32>
    %9 = vector.broadcast %8 : vector<1x20x32xf32> to vector<4x20x32xf32>
    %c0_7 = arith.constant 0 : index
    %c0_8 = arith.constant 0 : index
    %10 = vector.load %arg4[%c0_7, %c0_8] : memref<2x16xf32, #tpu.memory_space<vmem>>, vector<2x16xf32>
    %c0_9 = arith.constant 0 : index
    %c0_10 = arith.constant 0 : index
    %11 = vector.load %arg5[%c0_9, %c0_10] : memref<2x20xf32, #tpu.memory_space<vmem>>, vector<2x20xf32>
    %c0_11 = arith.constant 0 : index
    %c0_12 = arith.constant 0 : index
    %12 = vector.load %arg6[%c0_11, %c0_12] : memref<2x32xf32, #tpu.memory_space<vmem>>, vector<2x32xf32>
    %c0_13 = arith.constant 0 : index
    %c0_14 = arith.constant 0 : index
    %13 = vector.load %arg7[%c0_13, %c0_14] : memref<2x32xf32, #tpu.memory_space<vmem>>, vector<2x32xf32>
    %c0_15 = arith.constant 0 : index
    %c0_16 = arith.constant 0 : index
    %c0_17 = arith.constant 0 : index
    %14 = vector.load %arg8[%c0_15, %c0_16, %c0_17] : memref<8x32x8xf32, #tpu.memory_space<vmem>>, vector<8x32x8xf32>
    %c0_18 = arith.constant 0 : index
    %c0_19 = arith.constant 0 : index
    %c0_20 = arith.constant 0 : index
    %15 = vector.load %arg9[%c0_18, %c0_19, %c0_20] : memref<8x32x16xf32, #tpu.memory_space<vmem>>, vector<8x32x16xf32>
    %c0_21 = arith.constant 0 : index
    %c0_22 = arith.constant 0 : index
    %c0_23 = arith.constant 0 : index
    %16 = vector.load %arg10[%c0_21, %c0_22, %c0_23] : memref<8x8x32xf32, #tpu.memory_space<vmem>>, vector<8x8x32xf32>
    %c0_24 = arith.constant 0 : index
    %c0_25 = arith.constant 0 : index
    %17 = vector.load %arg11[%c0_24, %c0_25] : memref<2x32xf32, #tpu.memory_space<vmem>>, vector<2x32xf32>
    %c0_26 = arith.constant 0 : index
    %c0_27 = arith.constant 0 : index
    %18 = vector.load %arg12[%c0_26, %c0_27] : memref<2x32xf32, #tpu.memory_space<vmem>>, vector<2x32xf32>
    %c0_28 = arith.constant 0 : index
    %c0_29 = arith.constant 0 : index
    %19 = vector.load %arg13[%c0_28, %c0_29] : memref<2x32xf32, #tpu.memory_space<vmem>>, vector<2x32xf32>
    %c0_30 = arith.constant 0 : index
    %c0_31 = arith.constant 0 : index
    %c0_32 = arith.constant 0 : index
    %20 = vector.load %arg14[%c0_30, %c0_31, %c0_32] : memref<8x32x8xf32, #tpu.memory_space<vmem>>, vector<8x32x8xf32>
    %c0_33 = arith.constant 0 : index
    %c0_34 = arith.constant 0 : index
    %c0_35 = arith.constant 0 : index
    %21 = vector.load %arg15[%c0_33, %c0_34, %c0_35] : memref<8x32x16xf32, #tpu.memory_space<vmem>>, vector<8x32x16xf32>
    %c0_36 = arith.constant 0 : index
    %c0_37 = arith.constant 0 : index
    %c0_38 = arith.constant 0 : index
    %22 = vector.load %arg16[%c0_36, %c0_37, %c0_38] : memref<8x8x32xf32, #tpu.memory_space<vmem>>, vector<8x8x32xf32>
    %c0_39 = arith.constant 0 : index
    %c0_40 = arith.constant 0 : index
    %23 = vector.load %arg17[%c0_39, %c0_40] : memref<2x32xf32, #tpu.memory_space<vmem>>, vector<2x32xf32>
    %24 = vector.extract_strided_slice %12 {offsets = [0, 0], sizes = [1, 32], strides = [1, 1]} : vector<2x32xf32> to vector<1x32xf32>
    %25 = vector.extract_strided_slice %13 {offsets = [0, 0], sizes = [1, 32], strides = [1, 1]} : vector<2x32xf32> to vector<1x32xf32>
    %26 = vector.extract_strided_slice %14 {offsets = [0, 0, 0], sizes = [4, 32, 8], strides = [1, 1, 1]} : vector<8x32x8xf32> to vector<4x32x8xf32>
    %27 = vector.extract_strided_slice %15 {offsets = [0, 0, 0], sizes = [4, 32, 16], strides = [1, 1, 1]} : vector<8x32x16xf32> to vector<4x32x16xf32>
    %28 = vector.extract_strided_slice %16 {offsets = [0, 0, 0], sizes = [4, 8, 32], strides = [1, 1, 1]} : vector<8x8x32xf32> to vector<4x8x32xf32>
    %29 = vector.extract_strided_slice %17 {offsets = [0, 0], sizes = [1, 32], strides = [1, 1]} : vector<2x32xf32> to vector<1x32xf32>
    %cst = arith.constant dense<0.000000e+00> : vector<2xf32>
    %30 = vector.multi_reduction <add>, %0, %cst [1] : vector<2x32xf32> to vector<2xf32>
    %31 = vector.shape_cast %30 : vector<2xf32> to vector<2x1xf32>
    %cst_41 = arith.constant 3.200000e+01 : f32
    %32 = vector.broadcast %cst_41 : f32 to vector<2x1xf32>
    %33 = arith.divf %31, %32 : vector<2x1xf32>
    %34 = vector.broadcast %33 : vector<2x1xf32> to vector<2x32xf32>
    %35 = arith.subf %0, %34 : vector<2x32xf32>
    %36 = arith.mulf %35, %35 : vector<2x32xf32>
    %cst_42 = arith.constant dense<0.000000e+00> : vector<2xf32>
    %37 = vector.multi_reduction <add>, %36, %cst_42 [1] : vector<2x32xf32> to vector<2xf32>
    %38 = vector.shape_cast %37 : vector<2xf32> to vector<2x1xf32>
    %cst_43 = arith.constant 3.200000e+01 : f32
    %39 = vector.broadcast %cst_43 : f32 to vector<2x1xf32>
    %40 = arith.divf %38, %39 : vector<2x1xf32>
    %cst_44 = arith.constant 9.99999974E-6 : f32
    %41 = vector.broadcast %cst_44 : f32 to vector<2x1xf32>
    %42 = arith.addf %40, %41 : vector<2x1xf32>
    %43 = math.rsqrt %42 : vector<2x1xf32>
    %44 = vector.broadcast %43 : vector<2x1xf32> to vector<2x32xf32>
    %45 = arith.mulf %35, %44 : vector<2x32xf32>
    %46 = vector.broadcast %24 : vector<1x32xf32> to vector<2x32xf32>
    %47 = arith.mulf %45, %46 : vector<2x32xf32>
    %48 = vector.broadcast %25 : vector<1x32xf32> to vector<2x32xf32>
    %49 = arith.addf %47, %48 : vector<2x32xf32>
    %50 = vector.shape_cast %49 : vector<2x32xf32> to vector<1x2x32xf32>
    %51 = vector.shape_cast %50 : vector<1x2x32xf32> to vector<1x2x32xf32>
    %52 = vector.broadcast %51 : vector<1x2x32xf32> to vector<4x2x32xf32>
    "tpu.trace_start"() <{level = 10 : i32, message = "hbd,hde->hbe"}> : () -> ()
    %cst_45 = arith.constant dense<0.000000e+00> : vector<4x2x8xf32>
    %53 = tpu.matmul %52, %26, %cst_45 {dimension_numbers = #tpu.dot_dimension_numbers<[2], [1], [1], [2], [0, 0, 0, 1, 1, 2], [0], [0]>} : vector<4x2x32xf32>, vector<4x32x8xf32>, vector<4x2x8xf32> -> vector<4x2x8xf32>
    %cst_46 = arith.constant dense<0.000000e+00> : vector<4x2x16xf32>
    %54 = tpu.matmul %52, %27, %cst_46 {dimension_numbers = #tpu.dot_dimension_numbers<[2], [1], [1], [2], [0, 0, 0, 1, 1, 2], [0], [0]>} : vector<4x2x32xf32>, vector<4x32x16xf32>, vector<4x2x16xf32> -> vector<4x2x16xf32>
    "tpu.trace_stop"() : () -> ()
    "tpu.trace_start"() <{level = 10 : i32, message = "hnd,hde->hne"}> : () -> ()
    %cst_47 = arith.constant dense<0.000000e+00> : vector<4x20x16xf32>
    %55 = tpu.matmul %9, %27, %cst_47 {dimension_numbers = #tpu.dot_dimension_numbers<[2], [1], [1], [2], [0, 0, 0, 1, 1, 2], [0], [0]>} : vector<4x20x32xf32>, vector<4x32x16xf32>, vector<4x20x16xf32> -> vector<4x20x16xf32>
    "tpu.trace_stop"() : () -> ()
    %56 = vector.extract_strided_slice %54 {offsets = [0, 0, 0], sizes = [4, 2, 8], strides = [1, 1, 1]} : vector<4x2x16xf32> to vector<4x2x8xf32>
    %57 = vector.extract_strided_slice %54 {offsets = [0, 0, 8], sizes = [4, 2, 8], strides = [1, 1, 1]} : vector<4x2x16xf32> to vector<4x2x8xf32>
    %58 = vector.extract_strided_slice %55 {offsets = [0, 0, 0], sizes = [4, 20, 8], strides = [1, 1, 1]} : vector<4x20x16xf32> to vector<4x20x8xf32>
    %59 = vector.extract_strided_slice %55 {offsets = [0, 0, 8], sizes = [4, 20, 8], strides = [1, 1, 1]} : vector<4x20x16xf32> to vector<4x20x8xf32>
    %60 = arith.mulf %53, %56 : vector<4x2x8xf32>
    %cst_48 = arith.constant dense<0.000000e+00> : vector<4x2xf32>
    %61 = vector.multi_reduction <add>, %60, %cst_48 [2] : vector<4x2x8xf32> to vector<4x2xf32>
    %62 = vector.shape_cast %61 : vector<4x2xf32> to vector<4x2x1xf32>
    %cst_49 = arith.constant 0.353553385 : f32
    %63 = vector.broadcast %cst_49 : f32 to vector<4x2x1xf32>
    %64 = arith.mulf %62, %63 : vector<4x2x1xf32>
    "tpu.trace_start"() <{level = 10 : i32, message = "hqd,hkd->hqk"}> : () -> ()
    %cst_50 = arith.constant dense<0.000000e+00> : vector<4x2x20xf32>
    %65 = tpu.matmul %53, %58, %cst_50 {dimension_numbers = #tpu.dot_dimension_numbers<[2], [2], [1], [1], [0, 0, 0, 1, 1, 1], [0], [0]>} : vector<4x2x8xf32>, vector<4x20x8xf32>, vector<4x2x20xf32> -> vector<4x2x20xf32>
    "tpu.trace_stop"() : () -> ()
    %cst_51 = arith.constant 0.353553385 : f32
    %66 = vector.broadcast %cst_51 : f32 to vector<4x2x20xf32>
    %67 = arith.mulf %65, %66 : vector<4x2x20xf32>
    %68 = vector.shape_cast %11 : vector<2x20xf32> to vector<1x2x20xf32>
    %69 = vector.broadcast %68 : vector<1x2x20xf32> to vector<4x2x20xf32>
    %70 = arith.addf %67, %69 : vector<4x2x20xf32>
    %cst_52 = arith.constant dense<0xFF800000> : vector<4x2xf32>
    %71 = vector.multi_reduction <maximumf>, %70, %cst_52 [2] : vector<4x2x20xf32> to vector<4x2xf32>
    %72 = vector.shape_cast %71 : vector<4x2xf32> to vector<4x2x1xf32>
    %73 = arith.maximumf %72, %64 : vector<4x2x1xf32>
    %74 = arith.subf %64, %73 : vector<4x2x1xf32>
    %75 = math.exp %74 : vector<4x2x1xf32>
    %76 = vector.broadcast %73 : vector<4x2x1xf32> to vector<4x2x20xf32>
    %77 = arith.subf %70, %76 : vector<4x2x20xf32>
    %78 = math.exp %77 : vector<4x2x20xf32>
    %cst_53 = arith.constant dense<0.000000e+00> : vector<4x2xf32>
    %79 = vector.multi_reduction <add>, %78, %cst_53 [2] : vector<4x2x20xf32> to vector<4x2xf32>
    %80 = vector.shape_cast %79 : vector<4x2xf32> to vector<4x2x1xf32>
    %81 = arith.addf %75, %80 : vector<4x2x1xf32>
    %82 = tpu.reciprocal %81 {approx = true} : vector<4x2x1xf32> -> vector<4x2x1xf32>
    %83 = vector.broadcast %75 : vector<4x2x1xf32> to vector<4x2x8xf32>
    %84 = arith.mulf %83, %57 : vector<4x2x8xf32>
    "tpu.trace_start"() <{level = 10 : i32, message = "hqk,hkd->hqd"}> : () -> ()
    %cst_54 = arith.constant dense<0.000000e+00> : vector<4x2x8xf32>
    %85 = tpu.matmul %78, %59, %cst_54 {dimension_numbers = #tpu.dot_dimension_numbers<[2], [1], [1], [2], [0, 0, 0, 1, 1, 2], [0], [0]>} : vector<4x2x20xf32>, vector<4x20x8xf32>, vector<4x2x8xf32> -> vector<4x2x8xf32>
    "tpu.trace_stop"() : () -> ()
    %86 = arith.addf %84, %85 : vector<4x2x8xf32>
    %87 = vector.broadcast %82 : vector<4x2x1xf32> to vector<4x2x8xf32>
    %88 = arith.mulf %86, %87 : vector<4x2x8xf32>
    "tpu.trace_start"() <{level = 10 : i32, message = "hbd,hde->hbe"}> : () -> ()
    %cst_55 = arith.constant dense<0.000000e+00> : vector<4x2x32xf32>
    %89 = tpu.matmul %88, %28, %cst_55 {dimension_numbers = #tpu.dot_dimension_numbers<[2], [1], [1], [2], [0, 0, 0, 1, 1, 2], [0], [0]>} : vector<4x2x8xf32>, vector<4x8x32xf32>, vector<4x2x32xf32> -> vector<4x2x32xf32>
    "tpu.trace_stop"() : () -> ()
    %cst_56 = arith.constant dense<0.000000e+00> : vector<2x32xf32>
    %90 = vector.multi_reduction <add>, %89, %cst_56 [0] : vector<4x2x32xf32> to vector<2x32xf32>
    %91 = arith.addf %0, %90 : vector<2x32xf32>
    %92 = vector.broadcast %29 : vector<1x32xf32> to vector<2x32xf32>
    %93 = arith.addf %91, %92 : vector<2x32xf32>
    %94 = vector.extract_strided_slice %18 {offsets = [0, 0], sizes = [1, 32], strides = [1, 1]} : vector<2x32xf32> to vector<1x32xf32>
    %95 = vector.extract_strided_slice %19 {offsets = [0, 0], sizes = [1, 32], strides = [1, 1]} : vector<2x32xf32> to vector<1x32xf32>
    %96 = vector.extract_strided_slice %20 {offsets = [0, 0, 0], sizes = [4, 32, 8], strides = [1, 1, 1]} : vector<8x32x8xf32> to vector<4x32x8xf32>
    %97 = vector.extract_strided_slice %21 {offsets = [0, 0, 0], sizes = [4, 32, 16], strides = [1, 1, 1]} : vector<8x32x16xf32> to vector<4x32x16xf32>
    %98 = vector.extract_strided_slice %22 {offsets = [0, 0, 0], sizes = [4, 8, 32], strides = [1, 1, 1]} : vector<8x8x32xf32> to vector<4x8x32xf32>
    %99 = vector.extract_strided_slice %23 {offsets = [0, 0], sizes = [1, 32], strides = [1, 1]} : vector<2x32xf32> to vector<1x32xf32>
    %cst_57 = arith.constant dense<0.000000e+00> : vector<2xf32>
    %100 = vector.multi_reduction <add>, %1, %cst_57 [1] : vector<2x32xf32> to vector<2xf32>
    %101 = vector.shape_cast %100 : vector<2xf32> to vector<2x1xf32>
    %cst_58 = arith.constant 3.200000e+01 : f32
    %102 = vector.broadcast %cst_58 : f32 to vector<2x1xf32>
    %103 = arith.divf %101, %102 : vector<2x1xf32>
    %104 = vector.broadcast %103 : vector<2x1xf32> to vector<2x32xf32>
    %105 = arith.subf %1, %104 : vector<2x32xf32>
    %106 = arith.mulf %105, %105 : vector<2x32xf32>
    %cst_59 = arith.constant dense<0.000000e+00> : vector<2xf32>
    %107 = vector.multi_reduction <add>, %106, %cst_59 [1] : vector<2x32xf32> to vector<2xf32>
    %108 = vector.shape_cast %107 : vector<2xf32> to vector<2x1xf32>
    %cst_60 = arith.constant 3.200000e+01 : f32
    %109 = vector.broadcast %cst_60 : f32 to vector<2x1xf32>
    %110 = arith.divf %108, %109 : vector<2x1xf32>
    %cst_61 = arith.constant 9.99999974E-6 : f32
    %111 = vector.broadcast %cst_61 : f32 to vector<2x1xf32>
    %112 = arith.addf %110, %111 : vector<2x1xf32>
    %113 = math.rsqrt %112 : vector<2x1xf32>
    %114 = vector.broadcast %113 : vector<2x1xf32> to vector<2x32xf32>
    %115 = arith.mulf %105, %114 : vector<2x32xf32>
    %116 = vector.broadcast %94 : vector<1x32xf32> to vector<2x32xf32>
    %117 = arith.mulf %115, %116 : vector<2x32xf32>
    %118 = vector.broadcast %95 : vector<1x32xf32> to vector<2x32xf32>
    %119 = arith.addf %117, %118 : vector<2x32xf32>
    %120 = vector.shape_cast %119 : vector<2x32xf32> to vector<1x2x32xf32>
    %121 = vector.shape_cast %120 : vector<1x2x32xf32> to vector<1x2x32xf32>
    %122 = vector.broadcast %121 : vector<1x2x32xf32> to vector<4x2x32xf32>
    "tpu.trace_start"() <{level = 10 : i32, message = "hbd,hde->hbe"}> : () -> ()
    %cst_62 = arith.constant dense<0.000000e+00> : vector<4x2x8xf32>
    %123 = tpu.matmul %122, %96, %cst_62 {dimension_numbers = #tpu.dot_dimension_numbers<[2], [1], [1], [2], [0, 0, 0, 1, 1, 2], [0], [0]>} : vector<4x2x32xf32>, vector<4x32x8xf32>, vector<4x2x8xf32> -> vector<4x2x8xf32>
    %cst_63 = arith.constant dense<0.000000e+00> : vector<4x2x16xf32>
    %124 = tpu.matmul %122, %97, %cst_63 {dimension_numbers = #tpu.dot_dimension_numbers<[2], [1], [1], [2], [0, 0, 0, 1, 1, 2], [0], [0]>} : vector<4x2x32xf32>, vector<4x32x16xf32>, vector<4x2x16xf32> -> vector<4x2x16xf32>
    "tpu.trace_stop"() : () -> ()
    "tpu.trace_start"() <{level = 10 : i32, message = "hnd,hde->hne"}> : () -> ()
    %cst_64 = arith.constant dense<0.000000e+00> : vector<4x16x16xf32>
    %125 = tpu.matmul %6, %97, %cst_64 {dimension_numbers = #tpu.dot_dimension_numbers<[2], [1], [1], [2], [0, 0, 0, 1, 1, 2], [0], [0]>} : vector<4x16x32xf32>, vector<4x32x16xf32>, vector<4x16x16xf32> -> vector<4x16x16xf32>
    "tpu.trace_stop"() : () -> ()
    %126 = vector.extract_strided_slice %124 {offsets = [0, 0, 0], sizes = [4, 2, 8], strides = [1, 1, 1]} : vector<4x2x16xf32> to vector<4x2x8xf32>
    %127 = vector.extract_strided_slice %124 {offsets = [0, 0, 8], sizes = [4, 2, 8], strides = [1, 1, 1]} : vector<4x2x16xf32> to vector<4x2x8xf32>
    %128 = vector.extract_strided_slice %125 {offsets = [0, 0, 0], sizes = [4, 16, 8], strides = [1, 1, 1]} : vector<4x16x16xf32> to vector<4x16x8xf32>
    %129 = vector.extract_strided_slice %125 {offsets = [0, 0, 8], sizes = [4, 16, 8], strides = [1, 1, 1]} : vector<4x16x16xf32> to vector<4x16x8xf32>
    %130 = arith.mulf %123, %126 : vector<4x2x8xf32>
    %cst_65 = arith.constant dense<0.000000e+00> : vector<4x2xf32>
    %131 = vector.multi_reduction <add>, %130, %cst_65 [2] : vector<4x2x8xf32> to vector<4x2xf32>
    %132 = vector.shape_cast %131 : vector<4x2xf32> to vector<4x2x1xf32>
    %cst_66 = arith.constant 0.353553385 : f32
    %133 = vector.broadcast %cst_66 : f32 to vector<4x2x1xf32>
    %134 = arith.mulf %132, %133 : vector<4x2x1xf32>
    "tpu.trace_start"() <{level = 10 : i32, message = "hqd,hkd->hqk"}> : () -> ()
    %cst_67 = arith.constant dense<0.000000e+00> : vector<4x2x16xf32>
    %135 = tpu.matmul %123, %128, %cst_67 {dimension_numbers = #tpu.dot_dimension_numbers<[2], [2], [1], [1], [0, 0, 0, 1, 1, 1], [0], [0]>} : vector<4x2x8xf32>, vector<4x16x8xf32>, vector<4x2x16xf32> -> vector<4x2x16xf32>
    "tpu.trace_stop"() : () -> ()
    %cst_68 = arith.constant 0.353553385 : f32
    %136 = vector.broadcast %cst_68 : f32 to vector<4x2x16xf32>
    %137 = arith.mulf %135, %136 : vector<4x2x16xf32>
    %138 = vector.shape_cast %10 : vector<2x16xf32> to vector<1x2x16xf32>
    %139 = vector.broadcast %138 : vector<1x2x16xf32> to vector<4x2x16xf32>
    %140 = arith.addf %137, %139 : vector<4x2x16xf32>
    %cst_69 = arith.constant dense<0xFF800000> : vector<4x2xf32>
    %141 = vector.multi_reduction <maximumf>, %140, %cst_69 [2] : vector<4x2x16xf32> to vector<4x2xf32>
    %142 = vector.shape_cast %141 : vector<4x2xf32> to vector<4x2x1xf32>
    %143 = arith.maximumf %142, %134 : vector<4x2x1xf32>
    %144 = arith.subf %134, %143 : vector<4x2x1xf32>
    %145 = math.exp %144 : vector<4x2x1xf32>
    %146 = vector.broadcast %143 : vector<4x2x1xf32> to vector<4x2x16xf32>
    %147 = arith.subf %140, %146 : vector<4x2x16xf32>
    %148 = math.exp %147 : vector<4x2x16xf32>
    %cst_70 = arith.constant dense<0.000000e+00> : vector<4x2xf32>
    %149 = vector.multi_reduction <add>, %148, %cst_70 [2] : vector<4x2x16xf32> to vector<4x2xf32>
    %150 = vector.shape_cast %149 : vector<4x2xf32> to vector<4x2x1xf32>
    %151 = arith.addf %145, %150 : vector<4x2x1xf32>
    %152 = tpu.reciprocal %151 {approx = true} : vector<4x2x1xf32> -> vector<4x2x1xf32>
    %153 = vector.broadcast %145 : vector<4x2x1xf32> to vector<4x2x8xf32>
    %154 = arith.mulf %153, %127 : vector<4x2x8xf32>
    "tpu.trace_start"() <{level = 10 : i32, message = "hqk,hkd->hqd"}> : () -> ()
    %cst_71 = arith.constant dense<0.000000e+00> : vector<4x2x8xf32>
    %155 = tpu.matmul %148, %129, %cst_71 {dimension_numbers = #tpu.dot_dimension_numbers<[2], [1], [1], [2], [0, 0, 0, 1, 1, 2], [0], [0]>} : vector<4x2x16xf32>, vector<4x16x8xf32>, vector<4x2x8xf32> -> vector<4x2x8xf32>
    "tpu.trace_stop"() : () -> ()
    %156 = arith.addf %154, %155 : vector<4x2x8xf32>
    %157 = vector.broadcast %152 : vector<4x2x1xf32> to vector<4x2x8xf32>
    %158 = arith.mulf %156, %157 : vector<4x2x8xf32>
    "tpu.trace_start"() <{level = 10 : i32, message = "hbd,hde->hbe"}> : () -> ()
    %cst_72 = arith.constant dense<0.000000e+00> : vector<4x2x32xf32>
    %159 = tpu.matmul %158, %98, %cst_72 {dimension_numbers = #tpu.dot_dimension_numbers<[2], [1], [1], [2], [0, 0, 0, 1, 1, 2], [0], [0]>} : vector<4x2x8xf32>, vector<4x8x32xf32>, vector<4x2x32xf32> -> vector<4x2x32xf32>
    "tpu.trace_stop"() : () -> ()
    %cst_73 = arith.constant dense<0.000000e+00> : vector<2x32xf32>
    %160 = vector.multi_reduction <add>, %159, %cst_73 [0] : vector<4x2x32xf32> to vector<2x32xf32>
    %161 = arith.addf %1, %160 : vector<2x32xf32>
    %162 = vector.broadcast %99 : vector<1x32xf32> to vector<2x32xf32>
    %163 = arith.addf %161, %162 : vector<2x32xf32>
    %164 = vector.extract_strided_slice %12 {offsets = [1, 0], sizes = [1, 32], strides = [1, 1]} : vector<2x32xf32> to vector<1x32xf32>
    %165 = vector.extract_strided_slice %13 {offsets = [1, 0], sizes = [1, 32], strides = [1, 1]} : vector<2x32xf32> to vector<1x32xf32>
    %166 = vector.extract_strided_slice %14 {offsets = [4, 0, 0], sizes = [4, 32, 8], strides = [1, 1, 1]} : vector<8x32x8xf32> to vector<4x32x8xf32>
    %167 = vector.extract_strided_slice %15 {offsets = [4, 0, 0], sizes = [4, 32, 16], strides = [1, 1, 1]} : vector<8x32x16xf32> to vector<4x32x16xf32>
    %168 = vector.extract_strided_slice %16 {offsets = [4, 0, 0], sizes = [4, 8, 32], strides = [1, 1, 1]} : vector<8x8x32xf32> to vector<4x8x32xf32>
    %169 = vector.extract_strided_slice %17 {offsets = [1, 0], sizes = [1, 32], strides = [1, 1]} : vector<2x32xf32> to vector<1x32xf32>
    %cst_74 = arith.constant dense<0.000000e+00> : vector<2xf32>
    %170 = vector.multi_reduction <add>, %93, %cst_74 [1] : vector<2x32xf32> to vector<2xf32>
    %171 = vector.shape_cast %170 : vector<2xf32> to vector<2x1xf32>
    %cst_75 = arith.constant 3.200000e+01 : f32
    %172 = vector.broadcast %cst_75 : f32 to vector<2x1xf32>
    %173 = arith.divf %171, %172 : vector<2x1xf32>
    %174 = vector.broadcast %173 : vector<2x1xf32> to vector<2x32xf32>
    %175 = arith.subf %93, %174 : vector<2x32xf32>
    %176 = arith.mulf %175, %175 : vector<2x32xf32>
    %cst_76 = arith.constant dense<0.000000e+00> : vector<2xf32>
    %177 = vector.multi_reduction <add>, %176, %cst_76 [1] : vector<2x32xf32> to vector<2xf32>
    %178 = vector.shape_cast %177 : vector<2xf32> to vector<2x1xf32>
    %cst_77 = arith.constant 3.200000e+01 : f32
    %179 = vector.broadcast %cst_77 : f32 to vector<2x1xf32>
    %180 = arith.divf %178, %179 : vector<2x1xf32>
    %cst_78 = arith.constant 9.99999974E-6 : f32
    %181 = vector.broadcast %cst_78 : f32 to vector<2x1xf32>
    %182 = arith.addf %180, %181 : vector<2x1xf32>
    %183 = math.rsqrt %182 : vector<2x1xf32>
    %184 = vector.broadcast %183 : vector<2x1xf32> to vector<2x32xf32>
    %185 = arith.mulf %175, %184 : vector<2x32xf32>
    %186 = vector.broadcast %164 : vector<1x32xf32> to vector<2x32xf32>
    %187 = arith.mulf %185, %186 : vector<2x32xf32>
    %188 = vector.broadcast %165 : vector<1x32xf32> to vector<2x32xf32>
    %189 = arith.addf %187, %188 : vector<2x32xf32>
    %190 = vector.shape_cast %189 : vector<2x32xf32> to vector<1x2x32xf32>
    %191 = vector.shape_cast %190 : vector<1x2x32xf32> to vector<1x2x32xf32>
    %192 = vector.broadcast %191 : vector<1x2x32xf32> to vector<4x2x32xf32>
    "tpu.trace_start"() <{level = 10 : i32, message = "hbd,hde->hbe"}> : () -> ()
    %cst_79 = arith.constant dense<0.000000e+00> : vector<4x2x8xf32>
    %193 = tpu.matmul %192, %166, %cst_79 {dimension_numbers = #tpu.dot_dimension_numbers<[2], [1], [1], [2], [0, 0, 0, 1, 1, 2], [0], [0]>} : vector<4x2x32xf32>, vector<4x32x8xf32>, vector<4x2x8xf32> -> vector<4x2x8xf32>
    %cst_80 = arith.constant dense<0.000000e+00> : vector<4x2x16xf32>
    %194 = tpu.matmul %192, %167, %cst_80 {dimension_numbers = #tpu.dot_dimension_numbers<[2], [1], [1], [2], [0, 0, 0, 1, 1, 2], [0], [0]>} : vector<4x2x32xf32>, vector<4x32x16xf32>, vector<4x2x16xf32> -> vector<4x2x16xf32>
    "tpu.trace_stop"() : () -> ()
    "tpu.trace_start"() <{level = 10 : i32, message = "hnd,hde->hne"}> : () -> ()
    %cst_81 = arith.constant dense<0.000000e+00> : vector<4x20x16xf32>
    %195 = tpu.matmul %9, %167, %cst_81 {dimension_numbers = #tpu.dot_dimension_numbers<[2], [1], [1], [2], [0, 0, 0, 1, 1, 2], [0], [0]>} : vector<4x20x32xf32>, vector<4x32x16xf32>, vector<4x20x16xf32> -> vector<4x20x16xf32>
    "tpu.trace_stop"() : () -> ()
    %196 = vector.extract_strided_slice %194 {offsets = [0, 0, 0], sizes = [4, 2, 8], strides = [1, 1, 1]} : vector<4x2x16xf32> to vector<4x2x8xf32>
    %197 = vector.extract_strided_slice %194 {offsets = [0, 0, 8], sizes = [4, 2, 8], strides = [1, 1, 1]} : vector<4x2x16xf32> to vector<4x2x8xf32>
    %198 = vector.extract_strided_slice %195 {offsets = [0, 0, 0], sizes = [4, 20, 8], strides = [1, 1, 1]} : vector<4x20x16xf32> to vector<4x20x8xf32>
    %199 = vector.extract_strided_slice %195 {offsets = [0, 0, 8], sizes = [4, 20, 8], strides = [1, 1, 1]} : vector<4x20x16xf32> to vector<4x20x8xf32>
    %200 = arith.mulf %193, %196 : vector<4x2x8xf32>
    %cst_82 = arith.constant dense<0.000000e+00> : vector<4x2xf32>
    %201 = vector.multi_reduction <add>, %200, %cst_82 [2] : vector<4x2x8xf32> to vector<4x2xf32>
    %202 = vector.shape_cast %201 : vector<4x2xf32> to vector<4x2x1xf32>
    %cst_83 = arith.constant 0.353553385 : f32
    %203 = vector.broadcast %cst_83 : f32 to vector<4x2x1xf32>
    %204 = arith.mulf %202, %203 : vector<4x2x1xf32>
    "tpu.trace_start"() <{level = 10 : i32, message = "hqd,hkd->hqk"}> : () -> ()
    %cst_84 = arith.constant dense<0.000000e+00> : vector<4x2x20xf32>
    %205 = tpu.matmul %193, %198, %cst_84 {dimension_numbers = #tpu.dot_dimension_numbers<[2], [2], [1], [1], [0, 0, 0, 1, 1, 1], [0], [0]>} : vector<4x2x8xf32>, vector<4x20x8xf32>, vector<4x2x20xf32> -> vector<4x2x20xf32>
    "tpu.trace_stop"() : () -> ()
    %cst_85 = arith.constant 0.353553385 : f32
    %206 = vector.broadcast %cst_85 : f32 to vector<4x2x20xf32>
    %207 = arith.mulf %205, %206 : vector<4x2x20xf32>
    %208 = vector.shape_cast %11 : vector<2x20xf32> to vector<1x2x20xf32>
    %209 = vector.broadcast %208 : vector<1x2x20xf32> to vector<4x2x20xf32>
    %210 = arith.addf %207, %209 : vector<4x2x20xf32>
    %cst_86 = arith.constant dense<0xFF800000> : vector<4x2xf32>
    %211 = vector.multi_reduction <maximumf>, %210, %cst_86 [2] : vector<4x2x20xf32> to vector<4x2xf32>
    %212 = vector.shape_cast %211 : vector<4x2xf32> to vector<4x2x1xf32>
    %213 = arith.maximumf %212, %204 : vector<4x2x1xf32>
    %214 = arith.subf %204, %213 : vector<4x2x1xf32>
    %215 = math.exp %214 : vector<4x2x1xf32>
    %216 = vector.broadcast %213 : vector<4x2x1xf32> to vector<4x2x20xf32>
    %217 = arith.subf %210, %216 : vector<4x2x20xf32>
    %218 = math.exp %217 : vector<4x2x20xf32>
    %cst_87 = arith.constant dense<0.000000e+00> : vector<4x2xf32>
    %219 = vector.multi_reduction <add>, %218, %cst_87 [2] : vector<4x2x20xf32> to vector<4x2xf32>
    %220 = vector.shape_cast %219 : vector<4x2xf32> to vector<4x2x1xf32>
    %221 = arith.addf %215, %220 : vector<4x2x1xf32>
    %222 = tpu.reciprocal %221 {approx = true} : vector<4x2x1xf32> -> vector<4x2x1xf32>
    %223 = vector.broadcast %215 : vector<4x2x1xf32> to vector<4x2x8xf32>
    %224 = arith.mulf %223, %197 : vector<4x2x8xf32>
    "tpu.trace_start"() <{level = 10 : i32, message = "hqk,hkd->hqd"}> : () -> ()
    %cst_88 = arith.constant dense<0.000000e+00> : vector<4x2x8xf32>
    %225 = tpu.matmul %218, %199, %cst_88 {dimension_numbers = #tpu.dot_dimension_numbers<[2], [1], [1], [2], [0, 0, 0, 1, 1, 2], [0], [0]>} : vector<4x2x20xf32>, vector<4x20x8xf32>, vector<4x2x8xf32> -> vector<4x2x8xf32>
    "tpu.trace_stop"() : () -> ()
    %226 = arith.addf %224, %225 : vector<4x2x8xf32>
    %227 = vector.broadcast %222 : vector<4x2x1xf32> to vector<4x2x8xf32>
    %228 = arith.mulf %226, %227 : vector<4x2x8xf32>
    "tpu.trace_start"() <{level = 10 : i32, message = "hbd,hde->hbe"}> : () -> ()
    %cst_89 = arith.constant dense<0.000000e+00> : vector<4x2x32xf32>
    %229 = tpu.matmul %228, %168, %cst_89 {dimension_numbers = #tpu.dot_dimension_numbers<[2], [1], [1], [2], [0, 0, 0, 1, 1, 2], [0], [0]>} : vector<4x2x8xf32>, vector<4x8x32xf32>, vector<4x2x32xf32> -> vector<4x2x32xf32>
    "tpu.trace_stop"() : () -> ()
    %cst_90 = arith.constant dense<0.000000e+00> : vector<2x32xf32>
    %230 = vector.multi_reduction <add>, %229, %cst_90 [0] : vector<4x2x32xf32> to vector<2x32xf32>
    %231 = arith.addf %93, %230 : vector<2x32xf32>
    %232 = vector.broadcast %169 : vector<1x32xf32> to vector<2x32xf32>
    %233 = arith.addf %231, %232 : vector<2x32xf32>
    %234 = vector.extract_strided_slice %18 {offsets = [1, 0], sizes = [1, 32], strides = [1, 1]} : vector<2x32xf32> to vector<1x32xf32>
    %235 = vector.extract_strided_slice %19 {offsets = [1, 0], sizes = [1, 32], strides = [1, 1]} : vector<2x32xf32> to vector<1x32xf32>
    %236 = vector.extract_strided_slice %20 {offsets = [4, 0, 0], sizes = [4, 32, 8], strides = [1, 1, 1]} : vector<8x32x8xf32> to vector<4x32x8xf32>
    %237 = vector.extract_strided_slice %21 {offsets = [4, 0, 0], sizes = [4, 32, 16], strides = [1, 1, 1]} : vector<8x32x16xf32> to vector<4x32x16xf32>
    %238 = vector.extract_strided_slice %22 {offsets = [4, 0, 0], sizes = [4, 8, 32], strides = [1, 1, 1]} : vector<8x8x32xf32> to vector<4x8x32xf32>
    %239 = vector.extract_strided_slice %23 {offsets = [1, 0], sizes = [1, 32], strides = [1, 1]} : vector<2x32xf32> to vector<1x32xf32>
    %cst_91 = arith.constant dense<0.000000e+00> : vector<2xf32>
    %240 = vector.multi_reduction <add>, %163, %cst_91 [1] : vector<2x32xf32> to vector<2xf32>
    %241 = vector.shape_cast %240 : vector<2xf32> to vector<2x1xf32>
    %cst_92 = arith.constant 3.200000e+01 : f32
    %242 = vector.broadcast %cst_92 : f32 to vector<2x1xf32>
    %243 = arith.divf %241, %242 : vector<2x1xf32>
    %244 = vector.broadcast %243 : vector<2x1xf32> to vector<2x32xf32>
    %245 = arith.subf %163, %244 : vector<2x32xf32>
    %246 = arith.mulf %245, %245 : vector<2x32xf32>
    %cst_93 = arith.constant dense<0.000000e+00> : vector<2xf32>
    %247 = vector.multi_reduction <add>, %246, %cst_93 [1] : vector<2x32xf32> to vector<2xf32>
    %248 = vector.shape_cast %247 : vector<2xf32> to vector<2x1xf32>
    %cst_94 = arith.constant 3.200000e+01 : f32
    %249 = vector.broadcast %cst_94 : f32 to vector<2x1xf32>
    %250 = arith.divf %248, %249 : vector<2x1xf32>
    %cst_95 = arith.constant 9.99999974E-6 : f32
    %251 = vector.broadcast %cst_95 : f32 to vector<2x1xf32>
    %252 = arith.addf %250, %251 : vector<2x1xf32>
    %253 = math.rsqrt %252 : vector<2x1xf32>
    %254 = vector.broadcast %253 : vector<2x1xf32> to vector<2x32xf32>
    %255 = arith.mulf %245, %254 : vector<2x32xf32>
    %256 = vector.broadcast %234 : vector<1x32xf32> to vector<2x32xf32>
    %257 = arith.mulf %255, %256 : vector<2x32xf32>
    %258 = vector.broadcast %235 : vector<1x32xf32> to vector<2x32xf32>
    %259 = arith.addf %257, %258 : vector<2x32xf32>
    %260 = vector.shape_cast %259 : vector<2x32xf32> to vector<1x2x32xf32>
    %261 = vector.shape_cast %260 : vector<1x2x32xf32> to vector<1x2x32xf32>
    %262 = vector.broadcast %261 : vector<1x2x32xf32> to vector<4x2x32xf32>
    "tpu.trace_start"() <{level = 10 : i32, message = "hbd,hde->hbe"}> : () -> ()
    %cst_96 = arith.constant dense<0.000000e+00> : vector<4x2x8xf32>
    %263 = tpu.matmul %262, %236, %cst_96 {dimension_numbers = #tpu.dot_dimension_numbers<[2], [1], [1], [2], [0, 0, 0, 1, 1, 2], [0], [0]>} : vector<4x2x32xf32>, vector<4x32x8xf32>, vector<4x2x8xf32> -> vector<4x2x8xf32>
    %cst_97 = arith.constant dense<0.000000e+00> : vector<4x2x16xf32>
    %264 = tpu.matmul %262, %237, %cst_97 {dimension_numbers = #tpu.dot_dimension_numbers<[2], [1], [1], [2], [0, 0, 0, 1, 1, 2], [0], [0]>} : vector<4x2x32xf32>, vector<4x32x16xf32>, vector<4x2x16xf32> -> vector<4x2x16xf32>
    "tpu.trace_stop"() : () -> ()
    "tpu.trace_start"() <{level = 10 : i32, message = "hnd,hde->hne"}> : () -> ()
    %cst_98 = arith.constant dense<0.000000e+00> : vector<4x16x16xf32>
    %265 = tpu.matmul %6, %237, %cst_98 {dimension_numbers = #tpu.dot_dimension_numbers<[2], [1], [1], [2], [0, 0, 0, 1, 1, 2], [0], [0]>} : vector<4x16x32xf32>, vector<4x32x16xf32>, vector<4x16x16xf32> -> vector<4x16x16xf32>
    "tpu.trace_stop"() : () -> ()
    %266 = vector.extract_strided_slice %264 {offsets = [0, 0, 0], sizes = [4, 2, 8], strides = [1, 1, 1]} : vector<4x2x16xf32> to vector<4x2x8xf32>
    %267 = vector.extract_strided_slice %264 {offsets = [0, 0, 8], sizes = [4, 2, 8], strides = [1, 1, 1]} : vector<4x2x16xf32> to vector<4x2x8xf32>
    %268 = vector.extract_strided_slice %265 {offsets = [0, 0, 0], sizes = [4, 16, 8], strides = [1, 1, 1]} : vector<4x16x16xf32> to vector<4x16x8xf32>
    %269 = vector.extract_strided_slice %265 {offsets = [0, 0, 8], sizes = [4, 16, 8], strides = [1, 1, 1]} : vector<4x16x16xf32> to vector<4x16x8xf32>
    %270 = arith.mulf %263, %266 : vector<4x2x8xf32>
    %cst_99 = arith.constant dense<0.000000e+00> : vector<4x2xf32>
    %271 = vector.multi_reduction <add>, %270, %cst_99 [2] : vector<4x2x8xf32> to vector<4x2xf32>
    %272 = vector.shape_cast %271 : vector<4x2xf32> to vector<4x2x1xf32>
    %cst_100 = arith.constant 0.353553385 : f32
    %273 = vector.broadcast %cst_100 : f32 to vector<4x2x1xf32>
    %274 = arith.mulf %272, %273 : vector<4x2x1xf32>
    "tpu.trace_start"() <{level = 10 : i32, message = "hqd,hkd->hqk"}> : () -> ()
    %cst_101 = arith.constant dense<0.000000e+00> : vector<4x2x16xf32>
    %275 = tpu.matmul %263, %268, %cst_101 {dimension_numbers = #tpu.dot_dimension_numbers<[2], [2], [1], [1], [0, 0, 0, 1, 1, 1], [0], [0]>} : vector<4x2x8xf32>, vector<4x16x8xf32>, vector<4x2x16xf32> -> vector<4x2x16xf32>
    "tpu.trace_stop"() : () -> ()
    %cst_102 = arith.constant 0.353553385 : f32
    %276 = vector.broadcast %cst_102 : f32 to vector<4x2x16xf32>
    %277 = arith.mulf %275, %276 : vector<4x2x16xf32>
    %278 = vector.shape_cast %10 : vector<2x16xf32> to vector<1x2x16xf32>
    %279 = vector.broadcast %278 : vector<1x2x16xf32> to vector<4x2x16xf32>
    %280 = arith.addf %277, %279 : vector<4x2x16xf32>
    %cst_103 = arith.constant dense<0xFF800000> : vector<4x2xf32>
    %281 = vector.multi_reduction <maximumf>, %280, %cst_103 [2] : vector<4x2x16xf32> to vector<4x2xf32>
    %282 = vector.shape_cast %281 : vector<4x2xf32> to vector<4x2x1xf32>
    %283 = arith.maximumf %282, %274 : vector<4x2x1xf32>
    %284 = arith.subf %274, %283 : vector<4x2x1xf32>
    %285 = math.exp %284 : vector<4x2x1xf32>
    %286 = vector.broadcast %283 : vector<4x2x1xf32> to vector<4x2x16xf32>
    %287 = arith.subf %280, %286 : vector<4x2x16xf32>
    %288 = math.exp %287 : vector<4x2x16xf32>
    %cst_104 = arith.constant dense<0.000000e+00> : vector<4x2xf32>
    %289 = vector.multi_reduction <add>, %288, %cst_104 [2] : vector<4x2x16xf32> to vector<4x2xf32>
    %290 = vector.shape_cast %289 : vector<4x2xf32> to vector<4x2x1xf32>
    %291 = arith.addf %285, %290 : vector<4x2x1xf32>
    %292 = tpu.reciprocal %291 {approx = true} : vector<4x2x1xf32> -> vector<4x2x1xf32>
    %293 = vector.broadcast %285 : vector<4x2x1xf32> to vector<4x2x8xf32>
    %294 = arith.mulf %293, %267 : vector<4x2x8xf32>
    "tpu.trace_start"() <{level = 10 : i32, message = "hqk,hkd->hqd"}> : () -> ()
    %cst_105 = arith.constant dense<0.000000e+00> : vector<4x2x8xf32>
    %295 = tpu.matmul %288, %269, %cst_105 {dimension_numbers = #tpu.dot_dimension_numbers<[2], [1], [1], [2], [0, 0, 0, 1, 1, 2], [0], [0]>} : vector<4x2x16xf32>, vector<4x16x8xf32>, vector<4x2x8xf32> -> vector<4x2x8xf32>
    "tpu.trace_stop"() : () -> ()
    %296 = arith.addf %294, %295 : vector<4x2x8xf32>
    %297 = vector.broadcast %292 : vector<4x2x1xf32> to vector<4x2x8xf32>
    %298 = arith.mulf %296, %297 : vector<4x2x8xf32>
    "tpu.trace_start"() <{level = 10 : i32, message = "hbd,hde->hbe"}> : () -> ()
    %cst_106 = arith.constant dense<0.000000e+00> : vector<4x2x32xf32>
    %299 = tpu.matmul %298, %238, %cst_106 {dimension_numbers = #tpu.dot_dimension_numbers<[2], [1], [1], [2], [0, 0, 0, 1, 1, 2], [0], [0]>} : vector<4x2x8xf32>, vector<4x8x32xf32>, vector<4x2x32xf32> -> vector<4x2x32xf32>
    "tpu.trace_stop"() : () -> ()
    %cst_107 = arith.constant dense<0.000000e+00> : vector<2x32xf32>
    %300 = vector.multi_reduction <add>, %299, %cst_107 [0] : vector<4x2x32xf32> to vector<2x32xf32>
    %301 = arith.addf %163, %300 : vector<2x32xf32>
    %302 = vector.broadcast %239 : vector<1x32xf32> to vector<2x32xf32>
    %303 = arith.addf %301, %302 : vector<2x32xf32>
    %c0_108 = arith.constant 0 : index
    %c0_109 = arith.constant 0 : index
    %304 = vector.load %arg18[%c0_108, %c0_109] : memref<2x32xf32, #tpu.memory_space<vmem>>, vector<2x32xf32>
    tpu.vector_store %arg18[%c0_108, %c0_109], %233 {strides = array<i32>} : memref<2x32xf32, #tpu.memory_space<vmem>>, vector<2x32xf32>,
    %c0_110 = arith.constant 0 : index
    %c0_111 = arith.constant 0 : index
    %305 = vector.load %arg19[%c0_110, %c0_111] : memref<2x32xf32, #tpu.memory_space<vmem>>, vector<2x32xf32>
    tpu.vector_store %arg19[%c0_110, %c0_111], %303 {strides = array<i32>} : memref<2x32xf32, #tpu.memory_space<vmem>>, vector<2x32xf32>,
    return
  }
}

</mosaic_0001>

<bundles_post_ra>
// kernel: cross_transformer.1
= control target key start
LH: loop header
LB: loop body
LE: loop exit
PB: predicated region body
PF: predicated region fallthrough
CT: control target
= control target key end

     0   :  { %vm220_vm0 = vcmask 254976   ;;  %v3668_v2 = vmov 32.0   ;;  %vm254_vm5 = vcmask 261120   ;;  %vm535_vm6 = vcmask 58368   ;;  %s5048_s26 = smov 8   ;;  %s5024_s0 = inlined_call_operand.vmem [shape: f32[2,32], index: 0, kind: input, shape index: {}]   ;;  %s5025_s8 = inlined_call_operand.vmem [shape: f32[8,32,8], index: 8, kind: input, shape index: {}]   ;;  %s5026_s9 = inlined_call_operand.vmem [shape: f32[8,32,16], index: 9, kind: input, shape index: {}]   ;;  %s5027_s6 = inlined_call_operand.vmem [shape: f32[2,32], index: 6, kind: input, shape index: {}]   ;;  %s5028_s7 = inlined_call_operand.vmem [shape: f32[2,32], index: 7, kind: input, shape index: {}]   ;;  %s5029_s3 = inlined_call_operand.vmem [shape: f32[20,32], index: 3, kind: input, shape index: {}]   ;;  %s5030_s5 = inlined_call_operand.vmem [shape: f32[2,20], index: 5, kind: input, shape index: {}]   ;;  %s5031_s1 = inlined_call_operand.vmem [shape: f32[2,32], index: 1, kind: input, shape index: {}]   ;;  %s5032_s10 = inlined_call_operand.vmem [shape: f32[8,8,32], index: 10, kind: input, shape index: {}]   ;;  %s5033_s14 = inlined_call_operand.vmem [shape: f32[8,32,8], index: 14, kind: input, shape index: {}]   ;;  %s5034_s12 = inlined_call_operand.vmem [shape: f32[2,32], index: 12, kind: input, shape index: {}]   ;;  %s5035_s15 = inlined_call_operand.vmem [shape: f32[8,32,16], index: 15, kind: input, shape index: {}]   ;;  %s5036_s13 = inlined_call_operand.vmem [shape: f32[2,32], index: 13, kind: input, shape index: {}]   ;;  %s5037_s2 = inlined_call_operand.vmem [shape: f32[16,32], index: 2, kind: input, shape index: {}]   ;;  %s5038_s4 = inlined_call_operand.vmem [shape: f32[2,16], index: 4, kind: input, shape index: {}]   ;;  %s5039_s11 = inlined_call_operand.vmem [shape: f32[2,32], index: 11, kind: input, shape index: {}]   ;;  %s5040_s16 = inlined_call_operand.vmem [shape: f32[8,8,32], index: 16, kind: input, shape index: {}]   ;;  %s5041_s17 = inlined_call_operand.vmem [shape: f32[2,32], index: 17, kind: input, shape index: {}]   ;;  %s5042_s18 = inlined_call_operand.vmem [shape: f32[2,32], index: 18, kind: output, shape index: {0}]   ;;  %s5043_s19 = inlined_call_operand.vmem [shape: f32[2,32], index: 19, kind: output, shape index: {1}]  }
   0x1   :  { %5050 = sst [smem:[#allocation2_spill]] %s5024_s0  ;;  %3548 = vrcp.f32 %v3668_v2  ;;  %v71_v55 = vld [vmem:[%s5028_s7] sm:$0x3]  ;;  %vm552_vm7 = vcmask 64512   ;;  %vm766_vm8 = vcmask 1043456   ;;  %vm689_vm9 = vcmask 156672  }
   0x2   :  { %5051 = sst [smem:[#allocation3_spill]] %s5025_s8  ;;  %v252_v59 = vperm.slane %v71_v55, 0  ;;  %v65_v63 = vld [vmem:[%s5029_s3] sm:$0xff]  ;;  %s3669_s8 = smov 120   ;;  %vm762_vm10 = vcmask 162816   ;;  %vm1453_vm14 = vcmask 123904  }
   0x3   :  { %5052 = sst [smem:[#allocation4_spill]] %s5026_s9  ;;  %vm1524_vm15 = vcmask 130048  }
   0x4   :  { %5053 = sst [smem:[#allocation5_spill]] %s5027_s6 }
   0x5   :  { %s5054_s20 = sld [smem:[#allocation2_spill]] }
   0x6   :  { %s5055_s22 = sld [smem:[#allocation3_spill]] }
   0x7   :  { %v3549_v3 = vpop.eup %3548  ;;  %s5056_s27 = sld [smem:[#allocation4_spill]] }
   0x8   :  { %v225_v4 = vmul.f32 32.0, %v3549_v3  ;;  %vm229_vm1 = vweird.f32 %v3549_v3  ;;  %s5057_s24 = sld [smem:[#allocation5_spill]] }
   0xa   :  { %v226_v5 = vsub.f32 1.0, %v225_v4 }
   0xb   :  { %v61_v0 = vld [vmem:[%s5054_s20] sm:$0x3] }
   0xc   :  { %v221_v1 = vsel %vm220_vm0, %v61_v0, 0.0  ;;  %v227_v6 = vmul.f32 %v3549_v3, %v226_v5  ;;  %v75_v14 = vld [vmem:[%s5055_s22 + $0x18] sm:$0xff]  ;;  %v74_v18 = vld [vmem:[%s5055_s22 + $0x10] sm:$0xff]  ;;  %v73_v22 = vld [vmem:[%s5055_s22 + $0x8] sm:$0xff] }
   0xd   :  { %222 = vadd.xlane.f32.xlu0 %v221_v1  ;;  %v79_v15 = vld [vmem:[%s5055_s22 + $0x38] sm:$0xff]  ;;  %270 = vmatpush.msra.mxu0 %v75_v14  ;;  %v78_v19 = vld [vmem:[%s5055_s22 + $0x30] sm:$0xff]  ;;  %v77_v23 = vld [vmem:[%s5055_s22 + $0x28] sm:$0xff] }
   0xe   :  { %v228_v7 = vadd.f32 %v3549_v3, %v227_v6  ;;  %v83_v16 = vld [vmem:[%s5055_s22 + $0x58] sm:$0xff]  ;;  %290 = vmatpush.msra.mxu1 %v79_v15  ;;  %v82_v20 = vld [vmem:[%s5055_s22 + $0x50] sm:$0xff]  ;;  %v81_v24 = vld [vmem:[%s5055_s22 + $0x48] sm:$0xff] }
   0xf   :  { %v87_v17 = vld [vmem:[%s5055_s22 + $0x78] sm:$0xff]  ;;  %310 = vmatpush.msra.mxu2 %v83_v16  ;;  %271 = vmatpush.msra.mxu0 %v74_v18  ;;  %v86_v21 = vld [vmem:[%s5055_s22 + $0x70] sm:$0xff]  ;;  %v85_v25 = vld [vmem:[%s5055_s22 + $0x68] sm:$0xff] }
  0x10   :  { %v3775_v8 = vsel %vm229_vm1, %v3549_v3, %v228_v7  ;;  %330 = vmatpush.msra.mxu3 %v87_v17  ;;  %291 = vmatpush.msra.mxu1 %v78_v19  ;;  %v72_v26 = vld [vmem:[%s5055_s22] sm:$0xff]  ;;  %v107_v30 = vld [vmem:[%s5056_s27 + $0x18] sm:$0xff]  ;;  %v106_v34 = vld [vmem:[%s5056_s27 + $0x10] sm:$0xff] }
  0x11   :  { %311 = vmatpush.msra.mxu2 %v82_v20  ;;  %272 = vmatpush.msra.mxu0 %v73_v22  ;;  %v76_v27 = vld [vmem:[%s5055_s22 + $0x20] sm:$0xff]  ;;  %v111_v31 = vld [vmem:[%s5056_s27 + $0x38] sm:$0xff]  ;;  %v110_v35 = vld [vmem:[%s5056_s27 + $0x30] sm:$0xff] }
  0x12   :  { %331 = vmatpush.msra.mxu3 %v86_v21  ;;  %292 = vmatpush.msra.mxu1 %v77_v23  ;;  %v80_v28 = vld [vmem:[%s5055_s22 + $0x40] sm:$0xff]  ;;  %v115_v32 = vld [vmem:[%s5056_s27 + $0x58] sm:$0xff]  ;;  %v114_v37 = vld [vmem:[%s5056_s27 + $0x50] sm:$0xff] }
  0x13   :  { %312 = vmatpush.msra.mxu2 %v81_v24  ;;  %273 = vmatpush.msra.mxu0 %v72_v26  ;;  %v84_v29 = vld [vmem:[%s5055_s22 + $0x60] sm:$0xff]  ;;  %v119_v33 = vld [vmem:[%s5056_s27 + $0x78] sm:$0xff]  ;;  %v118_v38 = vld [vmem:[%s5056_s27 + $0x70] sm:$0xff] }
  0x14   :  { %332 = vmatpush.msra.mxu3 %v85_v25  ;;  %293 = vmatpush.msra.mxu1 %v76_v27  ;;  %v105_v39 = vld [vmem:[%s5056_s27 + $0x8] sm:$0xff]  ;;  %v104_v44 = vld [vmem:[%s5056_s27] sm:$0xff]  ;;  %v67_v1 = vld [vmem:[%s5029_s3 + $0x10] sm:$0xf] }
  0x15   :  { %313 = vmatpush.msra.mxu2 %v80_v28  ;;  %350 = vmatpush.msrb.mxu0 %v107_v30  ;;  %v109_v41 = vld [vmem:[%s5056_s27 + $0x28] sm:$0xff]  ;;  %v108_v45 = vld [vmem:[%s5056_s27 + $0x20] sm:$0xff] }
  0x16   :  { %333 = vmatpush.msra.mxu3 %v84_v29  ;;  %370 = vmatpush.msrb.mxu1 %v111_v31  ;;  %v113_v42 = vld [vmem:[%s5056_s27 + $0x48] sm:$0xff]  ;;  %v112_v47 = vld [vmem:[%s5056_s27 + $0x40] sm:$0xff] }
  0x17   :  { %390 = vmatpush.msrb.mxu2 %v115_v32  ;;  %351 = vmatpush.msrb.mxu0 %v106_v34  ;;  %v117_v43 = vld [vmem:[%s5056_s27 + $0x68] sm:$0xff]  ;;  %v116_v48 = vld [vmem:[%s5056_s27 + $0x60] sm:$0xff] }
  0x18   :  { %410 = vmatpush.msrb.mxu3 %v119_v33  ;;  %371 = vmatpush.msrb.mxu1 %v110_v35  ;;  %v70_v53 = vld [vmem:[%s5057_s24] sm:$0x3] }
  0x19   :  { %391 = vmatpush.msrb.mxu2 %v114_v37  ;;  %352 = vmatpush.msrb.mxu0 %v105_v39  ;;  %v250_v57 = vperm.slane %v70_v53, 0 }
  0x1a   :  { %411 = vmatpush.msrb.mxu3 %v118_v38  ;;  %372 = vmatpush.msrb.mxu1 %v109_v41 }
  0x1b   :  { %392 = vmatpush.msrb.mxu2 %v113_v42  ;;  %353 = vmatpush.msrb.mxu0 %v104_v44 }
  0x1c   :  { %412 = vmatpush.msrb.mxu3 %v117_v43  ;;  %373 = vmatpush.msrb.mxu1 %v108_v45 }
  0x1d   :  { %393 = vmatpush.msrb.mxu2 %v112_v47 }
  0x1e   :  { %413 = vmatpush.msrb.mxu3 %v116_v48 }
  0x80   :  { %v223_v9 = vpop.xlane.xlu0 %222 }
  0x81   :  { %v231_v10 = vmul.f32 %v3775_v8, %v223_v9 }
  0x83   :  { %v3778_v11 = vsub.f32 %v61_v0, %v231_v10  ;;  %v66_v0 = vld [vmem:[%s5029_s3 + $0x8] sm:$0xff] }
  0x85   :  { %v233_v12 = vmul.f32 %v3778_v11, %v3778_v11 }
  0x87   :  { %v234_v13 = vsel %vm220_vm0, %v233_v12, 0.0 }
  0x88   :  { %235 = vadd.xlane.f32.xlu0 %v234_v13 }
  0xfb   :  { %v236_v36 = vpop.xlane.xlu0 %235 }
  0xfc   :  { %v237_v40 = vmul.f32 %v236_v36, %v3775_v8 }
  0xfe   :  { %v238_v46 = vadd.f32 1e-05, %v237_v40 }
 0x100   :  { %3550 = vrsqrt.f32 %v238_v46  ;;  %vm245_vm3 = vweird.f32 %v238_v46 }
 0x106   :  { %v3551_v49 = vpop.eup %3550 }
 0x107   :  { %v240_v50 = vmul.f32 %v3551_v49, %v238_v46  ;;  %vm246_vm2 = vweird.f32 %v3551_v49 }
 0x108   :  { %vm247_vm4 = vmor %vm245_vm3, %vm246_vm2 }
 0x109   :  { %v241_v51 = vmul.f32 %v3551_v49, %v240_v50 }
 0x10b   :  { %v242_v52 = vmul.f32 0.5, %v241_v51 }
 0x10d   :  { %v243_v54 = vsub.f32 1.5, %v242_v52 }
 0x10f   :  { %v244_v56 = vmul.f32 %v3551_v49, %v243_v54 }
 0x111   :  { %v248_v58 = vsel %vm247_vm4, %v3551_v49, %v244_v56 }
 0x112   :  { %v249_v60 = vmul.f32 %v248_v58, %v3778_v11 }
 0x114   :  { %v251_v61 = vmul.f32 %v250_v57, %v249_v60  ;;  %v62_v57 = vld [vmem:[%s5031_s1] sm:$0x3] }
 0x115   :  { %v1022_v58 = vsel %vm220_vm0, %v62_v57, 0.0 }
 0x116   :  { %v253_v62 = vadd.f32 %v252_v59, %v251_v61 }
 0x118   :  { %3297 = vmatmul.msk.f32.vlgmr.msra.gmra.mxu0 %vm254_vm5, %v253_v62  ;;  %3298 = vmatmul.msk.f32.vlgmr.msra.gmra.mxu1 %vm254_vm5, %v253_v62 }
 0x119   :  { %3299 = vmatmul.msk.f32.vlgmr.msra.gmra.mxu2 %vm254_vm5, %v253_v62  ;;  %3300 = vmatmul.msk.f32.vlgmr.msra.gmra.mxu3 %vm254_vm5, %v253_v62 }
 0x11a   :  { %439 = vmatpush.msra.mxu0 %v107_v30  ;;  %465 = vmatpush.msra.mxu1 %v111_v31 }
 0x11b   :  { %491 = vmatpush.msra.mxu2 %v115_v32  ;;  %517 = vmatpush.msra.mxu3 %v119_v33 }
 0x11c   :  { %440 = vmatpush.msra.mxu0 %v106_v34  ;;  %466 = vmatpush.msra.mxu1 %v110_v35 }
 0x11d   :  { %492 = vmatpush.msra.mxu2 %v114_v37  ;;  %518 = vmatpush.msra.mxu3 %v118_v38  ;;  %v69_v38 = vld [vmem:[%s5030_s5] sm:$0x3] }
 0x11e   :  { %441 = vmatpush.msra.mxu0 %v105_v39  ;;  %467 = vmatpush.msra.mxu1 %v109_v41 }
 0x11f   :  { %493 = vmatpush.msra.mxu2 %v113_v42  ;;  %519 = vmatpush.msra.mxu3 %v117_v43 }
 0x120   :  { %3301 = vmatmul.msk.f32.vlgmr.msrb.gmra.mxu0 %vm254_vm5, %v253_v62  ;;  %3302 = vmatmul.msk.f32.vlgmr.msrb.gmra.mxu1 %vm254_vm5, %v253_v62 }
 0x121   :  { %3303 = vmatmul.msk.f32.vlgmr.msrb.gmra.mxu2 %vm254_vm5, %v253_v62  ;;  %3304 = vmatmul.msk.f32.vlgmr.msrb.gmra.mxu3 %vm254_vm5, %v253_v62 }
 0x122   :  { %442 = vmatpush.msra.mxu0 %v104_v44  ;;  %468 = vmatpush.msra.mxu1 %v108_v45 }
 0x123   :  { %494 = vmatpush.msra.mxu2 %v112_v47  ;;  %520 = vmatpush.msra.mxu3 %v116_v48 }
 0x128   :  { %3305 = vmatmul.msk.f32.vlgmr.msra.gmra.mxu0 %vm254_vm5, %v65_v63  ;;  %3308 = vmatmul.msk.f32.vlgmr.msra.gmra.mxu1 %vm254_vm5, %v65_v63 }
 0x129   :  { %3311 = vmatmul.msk.f32.vlgmr.msra.gmra.mxu2 %vm254_vm5, %v65_v63  ;;  %3314 = vmatmul.msk.f32.vlgmr.msra.gmra.mxu3 %vm254_vm5, %v65_v63 }
 0x130   :  { %3306 = vmatmul.msk.f32.gmra.mxu0 %vm254_vm5, %v66_v0  ;;  %3309 = vmatmul.msk.f32.gmra.mxu1 %vm254_vm5, %v66_v0 }
 0x131   :  { %3312 = vmatmul.msk.f32.gmra.mxu2 %vm254_vm5, %v66_v0  ;;  %3315 = vmatmul.msk.f32.gmra.mxu3 %vm254_vm5, %v66_v0 }
 0x138   :  { %3307 = vmatmul.msk.f32.gmra.mxu0 %vm254_vm5, %v67_v1  ;;  %3310 = vmatmul.msk.f32.gmra.mxu1 %vm254_vm5, %v67_v1 }
 0x139   :  { %3313 = vmatmul.msk.f32.gmra.mxu2 %vm254_vm5, %v67_v1  ;;  %3316 = vmatmul.msk.f32.gmra.mxu3 %vm254_vm5, %v67_v1 }
 0x195   :  { %v3916_v2 = vpop.f32.mrf.mxu0  ;;  %v295_v3 = vpop.f32.mrf.mxu1 }
 0x19c   :  { %v315_v4 = vpop.f32.mrf.mxu2  ;;  %v335_v5 = vpop.f32.mrf.mxu3 }
 0x19d   :  { %v3918_v6 = vpop.f32.mrf.mxu0  ;;  %v3920_v7 = vpop.f32.mrf.mxu1 }
 0x19e   :  { %v532_v29 = vmul.f32 %v3920_v7, %v295_v3  ;;  %v531_v52 = vmul.f32 %v3918_v6, %v3916_v2 }
 0x1a0   :  { %v539_v30 = vsel %vm535_vm6, %v532_v29, 0.0  ;;  %v536_v55 = vsel %vm535_vm6, %v531_v52, 0.0 }
 0x1a4   :  { %v3922_v9 = vpop.f32.mrf.mxu2  ;;  %v3924_v10 = vpop.f32.mrf.mxu3 }
 0x1a5   :  { %v3926_v11 = vpop.f32.mrf.mxu0  ;;  %v3928_v12 = vpop.f32.mrf.mxu1  ;;  %v533_v13 = vmul.f32 %v3922_v9, %v315_v4  ;;  %v534_v15 = vmul.f32 %v3924_v10, %v335_v5 }
 0x1a6   :  { %v3483_v50 = vpack.i.bf16 %v3928_v12, %v3926_v11 }
 0x1a7   :  { %v542_v14 = vsel %vm535_vm6, %v533_v13, 0.0  ;;  %v545_v20 = vsel %vm535_vm6, %v534_v15, 0.0 }
 0x1a8   :  { %543 = vadd.xlane.f32.xlu1 %v542_v14 }
 0x1ac   :  { %v496_v16 = vpop.f32.mrf.mxu2  ;;  %v522_v17 = vpop.f32.mrf.mxu3 }
 0x1ad   :  { %v3933_v18 = vpop.f32.mrf.mxu0  ;;  %v3935_v19 = vpop.f32.mrf.mxu1 }
 0x1ae   :  { %v3478_v61 = vpack.i.bf16 %v3935_v19, %v3933_v18 }
 0x1b0   :  { %546 = vadd.xlane.f32.xlu1 %v545_v20 }
 0x1b4   :  { %v499_v21 = vpop.f32.mrf.mxu2  ;;  %v525_v22 = vpop.f32.mrf.mxu3 }
 0x1b5   :  { %v450_v23 = vpop.f32.mrf.mxu0  ;;  %v476_v24 = vpop.f32.mrf.mxu1  ;;  %v3473_v27 = vpack.i.bf16 %v522_v17, %v525_v22  ;;  %v3468_v28 = vpack.i.bf16 %v496_v16, %v499_v21 }
 0x1b6   :  { %3317 = vmatpush.xpose.msk.msrb.mxu0 %vm552_vm7, %v450_v23  ;;  %3321 = vmatpush.xpose.msk.msrb.mxu1 %vm552_vm7, %v476_v24 }
 0x1ba   :  { %3318 = vmatpush.xpose.msk.msrb.mxu0 %vm552_vm7, %v3933_v18  ;;  %3322 = vmatpush.xpose.msk.msrb.mxu1 %vm552_vm7, %v3935_v19 }
 0x1bc   :  { %v502_v25 = vpop.f32.mrf.mxu2  ;;  %v528_v26 = vpop.f32.mrf.mxu3 }
 0x1bd   :  { %3329 = vmatpush.xpose.msk.msrb.mxu3 %vm552_vm7, %v528_v26  ;;  %826 = vrot.lane.b32.xlu0 %v502_v25, %s3669_s8 }
 0x1be   :  { %3325 = vmatpush.xpose.msk.msrb.mxu2 %vm552_vm7, %v502_v25  ;;  %3319 = vmatpush.xpose.msk.msrb.mxu0 %vm552_vm7, %v3926_v11 }
 0x1bf   :  { %3323 = vmatpush.xpose.msk.msrb.mxu1 %vm552_vm7, %v3928_v12 }
 0x1c1   :  { %3330 = vmatpush.xpose.msk.msrb.mxu3 %vm552_vm7, %v525_v22  ;;  %3320 = vmatmul.msk.f32.vlgmr.msrb.gmra.mxu0 %vm552_vm7, %v3916_v2 }
 0x1c2   :  { %3326 = vmatpush.xpose.msk.msrb.mxu2 %vm552_vm7, %v499_v21  ;;  %3324 = vmatmul.msk.f32.vlgmr.msrb.gmra.mxu1 %vm552_vm7, %v295_v3 }
 0x1c5   :  { %3331 = vmatpush.xpose.msk.msrb.mxu3 %vm552_vm7, %v522_v17  ;;  %3474 = vrot.lane.b32.xlu0 %v3473_v27, %s3669_s8 }
 0x1c6   :  { %3327 = vmatpush.xpose.msk.msrb.mxu2 %vm552_vm7, %v496_v16 }
 0x1c8   :  { %3332 = vmatmul.msk.f32.vlgmr.msrb.gmra.mxu3 %vm552_vm7, %v335_v5 }
 0x1c9   :  { %3328 = vmatmul.msk.f32.vlgmr.msrb.gmra.mxu2 %vm552_vm7, %v315_v4  ;;  %3469 = vrot.lane.b32.xlu1 %v3468_v28, %s3669_s8 }
 0x1f3   :  { %540 = vadd.xlane.f32.xlu1 %v539_v30 }
 0x20c   :  { %758 = vrot.lane.b32.xlu1 %v450_v23, %s3669_s8 }
 0x21b   :  { %v544_v31 = vpop.xlane.xlu1 %543 }
 0x21c   :  { %v3992_v0 = vmul.f32 0.35355338, %v544_v31 }
 0x223   :  { %v547_v33 = vpop.xlane.xlu1 %546 }
 0x224   :  { %v4001_v12 = vmul.f32 0.35355338, %v547_v33 }
 0x22f   :  { %v827_v32 = vpop.permute.xlu0 %826 }
 0x230   :  { %3337 = vmatpush.msk.msra.mxu2 %vm766_vm8, %v827_v32 }
 0x236   :  { %1023 = vadd.xlane.f32.xlu1 %v1022_v58 }
 0x237   :  { %v3475_v62 = vpop.permute.xlu0 %3474 }
 0x238   :  { %v3476_v20 = vunpack.i.l.bf16 %v3475_v62  ;;  %v3477_v21 = vunpack.i.h.bf16 %v3475_v62 }
 0x23b   :  { %v3470_v34 = vpop.permute.xlu1 %3469 }
 0x23c   :  { %v3471_v35 = vunpack.i.l.bf16 %v3470_v34  ;;  %v3472_v36 = vunpack.i.h.bf16 %v3470_v34 }
 0x23e   :  { %849 = vmatpush.msra.mxu2 %v3471_v35  ;;  %v582_v37 = vpop.f32.mrf.mxu0 }
 0x23f   :  { %v681_v39 = vmul.f32 0.35355338, %v582_v37  ;;  %v614_v53 = vpop.f32.mrf.mxu1 }
 0x240   :  { %850 = vmatpush.msra.mxu2 %v3472_v36  ;;  %v682_v54 = vmul.f32 0.35355338, %v614_v53 }
 0x241   :  { %v3969_v40 = vadd.f32 %v681_v39, %v69_v38 }
 0x242   :  { %v686_v59 = vadd.f32 %v682_v54, %v69_v38 }
 0x243   :  { %v690_v41 = vsel %vm689_vm9, %v3969_v40, -inf }
 0x244   :  { %691 = vmax.xlane.f32.xlu0 %v690_v41  ;;  %v693_v60 = vsel %vm689_vm9, %v686_v59, -inf }
 0x24b   :  { %v678_v44 = vpop.f32.mrf.mxu3 }
 0x24c   :  { %v646_v42 = vpop.f32.mrf.mxu2  ;;  %v684_v46 = vmul.f32 0.35355338, %v678_v44 }
 0x24d   :  { %v683_v43 = vmul.f32 0.35355338, %v646_v42 }
 0x24e   :  { %v688_v48 = vadd.f32 %v684_v46, %v69_v38 }
 0x24f   :  { %v687_v45 = vadd.f32 %v683_v43, %v69_v38 }
 0x250   :  { %v699_v49 = vsel %vm689_vm9, %v688_v48, -inf }
 0x251   :  { %v696_v47 = vsel %vm689_vm9, %v687_v45, -inf }
 0x252   :  { %697 = vmax.xlane.f32.xlu2 %v696_v47 }
 0x258   :  { %793 = vrot.lane.b32.xlu0 %v476_v24, %s3669_s8 }
 0x25a   :  { %700 = vmax.xlane.f32.xlu2 %v699_v49 }
 0x260   :  { %3484 = vrot.lane.b32.xlu0 %v3483_v50, %s3669_s8 }
 0x266   :  { %v541_v51 = vpop.xlane.xlu1 %540 }
 0x267   :  { %v4020_v32 = vmul.f32 0.35355338, %v541_v51 }
 0x272   :  { %859 = vrot.lane.b32.xlu2 %v528_v26, %s3669_s8 }
 0x27e   :  { %v759_v56 = vpop.permute.xlu1 %758 }
 0x27f   :  { %3333 = vmatpush.msk.msra.mxu0 %vm766_vm8, %v759_v56 }
 0x29b   :  { %537 = vadd.xlane.f32.xlu2 %v536_v55 }
 0x2a3   :  { %694 = vmax.xlane.f32.xlu2 %v693_v60 }
 0x2a9   :  { %v1024_v27 = vpop.xlane.xlu1 %1023 }
 0x2aa   :  { %v1025_v29 = vmul.f32 %v1024_v27, %v3775_v8  ;;  %v158_v27 = vld [vmem:[%s5033_s14 + $0x58] sm:$0xff] }
 0x2ac   :  { %v4018_v31 = vsub.f32 %v62_v57, %v1025_v29  ;;  %v157_v29 = vld [vmem:[%s5033_s14 + $0x50] sm:$0xff] }
 0x2ae   :  { %v1027_v34 = vmul.f32 %v4018_v31, %v4018_v31 }
 0x2b0   :  { %v1028_v37 = vsel %vm220_vm0, %v1027_v34, 0.0 }
 0x2b7   :  { %v692_v63 = vpop.xlane.xlu0 %691 }
 0x2bb   :  { %3479 = vrot.lane.b32.xlu2 %v3478_v61, %s3669_s8 }
 0x2c5   :  { %v698_v1 = vpop.xlane.xlu2 %697 }
 0x2c6   :  { %v3995_v2 = vmax.f32 %v698_v1, %v3992_v0 }
 0x2c8   :  { %v708_v3 = vsub.f32 %v3992_v0, %v3995_v2  ;;  %v720_v4 = vsub.f32 %v687_v45, %v3995_v2  ;;  %v139_v2 = vld [vmem:[%s5032_s10 + $0x18] sm:$0xff] }
 0x2ca   :  { %v726_v5 = vmul.f32 1.442695, %v720_v4  ;;  %v794_v11 = vpop.permute.xlu0 %793  ;;  %v714_v58 = vmul.f32 1.442695, %v708_v3 }
 0x2cb   :  { %3335 = vmatpush.msk.msra.mxu1 %vm766_vm8, %v794_v11 }
 0x2cc   :  { %3552 = vpow2.f32 %v726_v5 }
 0x2cd   :  { %v701_v13 = vpop.xlane.xlu2 %700 }
 0x2ce   :  { %v705_v14 = vmax.f32 %v701_v13, %v4001_v12 }
 0x2d0   :  { %v709_v15 = vsub.f32 %v4001_v12, %v705_v14  ;;  %v721_v16 = vsub.f32 %v688_v48, %v705_v14 }
 0x2d2   :  { %v728_v17 = vmul.f32 1.442695, %v721_v16  ;;  %v3553_v18 = vpop.eup %3552  ;;  %v3485_v43 = vpop.permute.xlu0 %3484  ;;  %v716_v53 = vmul.f32 1.442695, %v709_v15 }
 0x2d3   :  { %3338 = vmatmul.msk.f32.vlgmr.msra.gmra.mxu2 %vm762_vm10, %v3553_v18  ;;  %v736_v24 = vsel %vm689_vm9, %v3553_v18, 0.0  ;;  %v3487_v46 = vunpack.i.h.bf16 %v3485_v43  ;;  %v3486_v47 = vunpack.i.l.bf16 %v3485_v43  ;;  %v161_v18 = vld [vmem:[%s5033_s14 + $0x70] sm:$0xff] }
 0x2d4   :  { %3554 = vpow2.f32 %v728_v17  ;;  %v162_v17 = vld [vmem:[%s5033_s14 + $0x78] sm:$0xff] }
 0x2d5   :  { %v860_v19 = vpop.permute.xlu2 %859 }
 0x2d6   :  { %3339 = vmatpush.msk.msra.mxu3 %vm766_vm8, %v860_v19  ;;  %v160_v19 = vld [vmem:[%s5033_s14 + $0x68] sm:$0xff] }
 0x2d8   :  { %882 = vmatpush.msra.mxu3 %v3476_v20 }
 0x2da   :  { %883 = vmatpush.msra.mxu3 %v3477_v21  ;;  %v3555_v22 = vpop.eup %3554  ;;  %v159_v21 = vld [vmem:[%s5033_s14 + $0x60] sm:$0xff] }
 0x2db   :  { %3340 = vmatmul.msk.f32.vlgmr.msra.gmra.mxu3 %vm762_vm10, %v3555_v22  ;;  %v739_v23 = vsel %vm689_vm9, %v3555_v22, 0.0 }
 0x2dc   :  { %740 = vadd.xlane.f32.xlu0 %v739_v23  ;;  %1007 = vmatpush.msrb.mxu3 %v139_v2  ;;  %v138_v23 = vld [vmem:[%s5032_s10 + $0x10] sm:$0xff] }
 0x2dd   :  { %982 = vmatpush.msrb.mxu2 %v138_v23 }
 0x2de   :  { %1123 = vmatpush.msra.mxu3 %v162_v17  ;;  %v152_v17 = vld [vmem:[%s5033_s14 + $0x28] sm:$0xff] }
 0x2df   :  { %1103 = vmatpush.msra.mxu2 %v158_v27 }
 0x2e0   :  { %1124 = vmatpush.msra.mxu3 %v161_v18  ;;  %v182_v18 = vld [vmem:[%s5035_s15 + $0x18] sm:$0xff] }
 0x2e1   :  { %1104 = vmatpush.msra.mxu2 %v157_v29 }
 0x2e2   :  { %1125 = vmatpush.msra.mxu3 %v160_v19 }
 0x2e4   :  { %737 = vadd.xlane.f32.xlu2 %v736_v24  ;;  %1029 = vadd.xlane.f32.xlu0 %v1028_v37 }
 0x2e5   :  { %1126 = vmatpush.msra.mxu3 %v159_v21  ;;  %v151_v21 = vld [vmem:[%s5033_s14 + $0x20] sm:$0xff] }
 0x30e   :  { %v538_v25 = vpop.xlane.xlu2 %537 }
 0x30f   :  { %v4010_v26 = vmul.f32 0.35355338, %v538_v25 }
 0x311   :  { %v4013_v28 = vmax.f32 %v692_v63, %v4010_v26 }
 0x313   :  { %v706_v30 = vsub.f32 %v4010_v26, %v4013_v28  ;;  %v718_v33 = vsub.f32 %v3969_v40, %v4013_v28  ;;  %v190_v26 = vld [vmem:[%s5035_s15 + $0x58] sm:$0xff] }
 0x315   :  { %v722_v38 = vmul.f32 1.442695, %v718_v33  ;;  %v156_v33 = vld [vmem:[%s5033_s14 + $0x48] sm:$0xff] }
 0x316   :  { %v695_v35 = vpop.xlane.xlu2 %694  ;;  %1105 = vmatpush.msra.mxu2 %v156_v33 }
 0x317   :  { %v4027_v36 = vmax.f32 %v695_v35, %v4020_v32  ;;  %3556 = vpow2.f32 %v722_v38  ;;  %v155_v35 = vld [vmem:[%s5033_s14 + $0x40] sm:$0xff] }
 0x318   :  { %1106 = vmatpush.msra.mxu2 %v155_v35  ;;  %v145_v38 = vld [vmem:[%s5034_s12] sm:$0x3] }
 0x319   :  { %v707_v39 = vsub.f32 %v4020_v32, %v4027_v36  ;;  %v719_v41 = vsub.f32 %v686_v59, %v4027_v36 }
 0x31b   :  { %v724_v42 = vmul.f32 1.442695, %v719_v41 }
 0x31d   :  { %3558 = vpow2.f32 %v724_v42  ;;  %v3557_v48 = vpop.eup %3556  ;;  %v1044_v42 = vperm.slane %v145_v38, 0 }
 0x31e   :  { %v3480_v40 = vpop.permute.xlu2 %3479  ;;  %v730_v52 = vsel %vm689_vm9, %v3557_v48, 0.0  ;;  %3560 = vpow2.f32 %v716_v53 }
 0x31f   :  { %v3482_v44 = vunpack.i.h.bf16 %v3480_v40  ;;  %v3481_v45 = vunpack.i.l.bf16 %v3480_v40  ;;  %v194_v40 = vld [vmem:[%s5035_s15 + $0x78] sm:$0xff] }
 0x321   :  { %783 = vmatpush.msra.mxu0 %v3481_v45  ;;  %816 = vmatpush.msra.mxu1 %v3482_v44  ;;  %v146_v44 = vld [vmem:[%s5036_s13] sm:$0x3] }
 0x323   :  { %784 = vmatpush.msra.mxu0 %v3486_v47  ;;  %817 = vmatpush.msra.mxu1 %v3487_v46  ;;  %v3559_v49 = vpop.eup %3558  ;;  %v193_v46 = vld [vmem:[%s5035_s15 + $0x70] sm:$0xff]  ;;  %v1046_v47 = vperm.slane %v146_v44, 0 }
 0x324   :  { %3334 = vmatmul.msk.f32.vlgmr.msra.gmra.mxu0 %vm762_vm10, %v3557_v48  ;;  %3336 = vmatmul.msk.f32.vlgmr.msra.gmra.mxu1 %vm762_vm10, %v3559_v49  ;;  %v3561_v55 = vpop.eup %3560  ;;  %v733_v3 = vsel %vm689_vm9, %v3559_v49, 0.0  ;;  %v710_v49 = vmul.f32 1.442695, %v706_v30 }
 0x325   :  { %v753_v59 = vmul.f32 %v3561_v55, %v3924_v10 }
 0x34f   :  { %v741_v54 = vpop.xlane.xlu0 %740 }
 0x350   :  { %v745_v56 = vadd.f32 %v3561_v55, %v741_v54  ;;  %v189_v54 = vld [vmem:[%s5035_s15 + $0x50] sm:$0xff]  ;;  %v188_v55 = vld [vmem:[%s5035_s15 + $0x48] sm:$0xff] }
 0x352   :  { %3562 = vrcp.f32 %v745_v56  ;;  %v187_v56 = vld [vmem:[%s5035_s15 + $0x40] sm:$0xff] }
 0x353   :  { %3564 = vpow2.f32 %v714_v58 }
 0x356   :  { %v852_v50 = vpop.f32.mrf.mxu2 }
 0x357   :  { %896 = vrot.lane.b32.xlu1 %v852_v50, %s5048_s26  ;;  %v738_v57 = vpop.xlane.xlu2 %737  ;;  %v191_v50 = vld [vmem:[%s5035_s15 + $0x60] sm:$0xff] }
 0x358   :  { %v3563_v62 = vpop.eup %3562 }
 0x359   :  { %v3565_v1 = vpop.eup %3564 }
 0x35a   :  { %v744_v4 = vadd.f32 %v3565_v1, %v738_v57  ;;  %v752_v5 = vmul.f32 %v3565_v1, %v3922_v9  ;;  %v1030_v9 = vpop.xlane.xlu0 %1029  ;;  %v4124_v57 = vld [vmem:[%s5037_s2] sm:$0xff] }
 0x35b   :  { %v1031_v15 = vmul.f32 %v1030_v9, %v3775_v8  ;;  %v154_v9 = vld [vmem:[%s5033_s14 + $0x38] sm:$0xff] }
 0x35c   :  { %3566 = vrcp.f32 %v744_v4 }
 0x35d   :  { %v1032_v16 = vadd.f32 1e-05, %v1031_v15 }
 0x35e   :  { %v885_v51 = vpop.f32.mrf.mxu3 }
 0x35f   :  { %898 = vrot.lane.b32.xlu2 %v885_v51, %s5048_s26  ;;  %3568 = vrsqrt.f32 %v1032_v16  ;;  %vm1039_vm11 = vweird.f32 %v1032_v16 }
 0x360   :  { %3570 = vpow2.f32 %v710_v49 }
 0x362   :  { %v3567_v13 = vpop.eup %3566 }
 0x365   :  { %v3569_v20 = vpop.eup %3568 }
 0x366   :  { %v1034_v22 = vmul.f32 %v3569_v20, %v1032_v16  ;;  %vm1040_vm12 = vweird.f32 %v3569_v20  ;;  %v3571_v53 = vpop.eup %3570  ;;  %v153_v16 = vld [vmem:[%s5033_s14 + $0x30] sm:$0xff] }
 0x367   :  { %vm1041_vm13 = vmor %vm1039_vm11, %vm1040_vm12  ;;  %v750_v58 = vmul.f32 %v3571_v53, %v3918_v6  ;;  %v712_v6 = vmul.f32 1.442695, %v707_v39 }
 0x368   :  { %v1035_v24 = vmul.f32 %v3569_v20, %v1034_v22  ;;  %v180_v22 = vld [vmem:[%s5035_s15 + $0x8] sm:$0xff] }
 0x36a   :  { %v1036_v25 = vmul.f32 0.5, %v1035_v24 }
 0x36c   :  { %v1037_v34 = vsub.f32 1.5, %v1036_v25  ;;  %v179_v25 = vld [vmem:[%s5035_s15] sm:$0xff] }
 0x36e   :  { %v1038_v37 = vmul.f32 %v3569_v20, %v1037_v34 }
 0x370   :  { %v1042_v41 = vsel %vm1041_vm13, %v3569_v20, %v1038_v37  ;;  %v181_v20 = vld [vmem:[%s5035_s15 + $0x10] sm:$0xff] }
 0x371   :  { %v1043_v43 = vmul.f32 %v1042_v41, %v4018_v31  ;;  %v192_v31 = vld [vmem:[%s5035_s15 + $0x68] sm:$0xff] }
 0x373   :  { %v1045_v48 = vmul.f32 %v1044_v42, %v1043_v43  ;;  %v186_v42 = vld [vmem:[%s5035_s15 + $0x38] sm:$0xff] }
 0x375   :  { %v4102_v51 = vadd.f32 %v1046_v47, %v1045_v48 }
 0x388   :  { %731 = vadd.xlane.f32.xlu2 %v730_v52 }
 0x3a1   :  { %v786_v0 = vpop.f32.mrf.mxu0  ;;  %v819_v10 = vpop.f32.mrf.mxu1 }
 0x3b9   :  { %v899_v60 = vpop.permute.xlu2 %898 }
 0x3ba   :  { %v907_v61 = vadd.f32 %v899_v60, %v753_v59 }
 0x3bc   :  { %v911_v63 = vmul.f32 %v3563_v62, %v907_v61 }
 0x3be   :  { %988 = vrot.lane.b32.xlu1 %v911_v63, %s3669_s8  ;;  %v4135_v63 = vld [vmem:[%s5037_s2 + $0x8] sm:$0xff] }
 0x3c9   :  { %v897_v11 = vpop.permute.xlu1 %896 }
 0x3ca   :  { %v906_v12 = vadd.f32 %v897_v11, %v752_v5 }
 0x3cc   :  { %v910_v14 = vmul.f32 %v3567_v13, %v906_v12  ;;  %v136_v13 = vld [vmem:[%s5032_s10] sm:$0xff] }
 0x3cd   :  { %932 = vmatpush.msrb.mxu0 %v136_v13 }
 0x3ce   :  { %963 = vrot.lane.b32.xlu0 %v910_v14, %s3669_s8  ;;  %v150_v14 = vld [vmem:[%s5033_s14 + $0x18] sm:$0xff] }
 0x3cf   :  { %1063 = vmatpush.msra.mxu0 %v150_v14 }
 0x3d6   :  { %892 = vrot.lane.b32.xlu0 %v786_v0, %s5048_s26  ;;  %v148_v0 = vld [vmem:[%s5033_s14 + $0x8] sm:$0xff] }
 0x3de   :  { %894 = vrot.lane.b32.xlu0 %v819_v10, %s5048_s26  ;;  %v147_v10 = vld [vmem:[%s5033_s14] sm:$0xff] }
 0x3e8   :  { %734 = vadd.xlane.f32.xlu1 %v733_v3  ;;  %v137_v3 = vld [vmem:[%s5032_s10 + $0x8] sm:$0xff] }
 0x3e9   :  { %957 = vmatpush.msrb.mxu1 %v137_v3 }
 0x3eb   :  { %1083 = vmatpush.msra.mxu1 %v154_v9 }
 0x3ed   :  { %1084 = vmatpush.msra.mxu1 %v153_v16 }
 0x3ef   :  { %1085 = vmatpush.msra.mxu1 %v152_v17 }
 0x3f1   :  { %1086 = vmatpush.msra.mxu1 %v151_v21 }
 0x3fb   :  { %v732_v52 = vpop.xlane.xlu2 %731 }
 0x3fc   :  { %v742_v28 = vadd.f32 %v3571_v53, %v732_v52 }
 0x3fe   :  { %3572 = vrcp.f32 %v742_v28 }
 0x3ff   :  { %3574 = vpow2.f32 %v712_v6 }
 0x404   :  { %v3573_v61 = vpop.eup %3572 }
 0x405   :  { %v3575_v1 = vpop.eup %3574 }
 0x406   :  { %v751_v12 = vmul.f32 %v3575_v1, %v3920_v7  ;;  %v149_v7 = vld [vmem:[%s5033_s14 + $0x10] sm:$0xff] }
 0x407   :  { %1064 = vmatpush.msra.mxu0 %v149_v7 }
 0x409   :  { %1065 = vmatpush.msra.mxu0 %v148_v0  ;;  %v144_v0 = vld [vmem:[%s5039_s11] sm:$0x3] }
 0x40a   :  { %v1020_v9 = vperm.slane %v144_v0, 0 }
 0x40b   :  { %1066 = vmatpush.msra.mxu0 %v147_v10 }
 0x430   :  { %v989_v45 = vpop.permute.xlu1 %988 }
 0x431   :  { %3344 = vmatmul.msk.f32.vlgmr.msrb.gmra.mxu3 %vm552_vm7, %v989_v45  ;;  %v184_v45 = vld [vmem:[%s5035_s15 + $0x28] sm:$0xff] }
 0x432   :  { %1203 = vmatpush.msrb.mxu3 %v194_v40 }
 0x434   :  { %1204 = vmatpush.msrb.mxu3 %v193_v46 }
 0x436   :  { %1205 = vmatpush.msrb.mxu3 %v192_v31 }
 0x438   :  { %1206 = vmatpush.msrb.mxu3 %v191_v50 }
 0x439   :  { %3348 = vmatmul.msk.f32.vlgmr.msra.gmra.mxu3 %vm254_vm5, %v4102_v51 }
 0x43a   :  { %1298 = vmatpush.msra.mxu3 %v194_v40  ;;  %v185_v40 = vld [vmem:[%s5035_s15 + $0x30] sm:$0xff] }
 0x43c   :  { %1299 = vmatpush.msra.mxu3 %v193_v46  ;;  %v183_v46 = vld [vmem:[%s5035_s15 + $0x20] sm:$0xff] }
 0x43e   :  { %1300 = vmatpush.msra.mxu3 %v192_v31 }
 0x440   :  { %v964_v30 = vpop.permute.xlu0 %963  ;;  %1301 = vmatpush.msra.mxu3 %v191_v50 }
 0x441   :  { %3343 = vmatmul.msk.f32.vlgmr.msrb.gmra.mxu2 %vm552_vm7, %v964_v30  ;;  %3352 = vmatmul.msk.f32.vlgmr.msrb.gmra.mxu3 %vm254_vm5, %v4102_v51 }
 0x442   :  { %1183 = vmatpush.msrb.mxu2 %v190_v26 }
 0x444   :  { %1184 = vmatpush.msrb.mxu2 %v189_v54 }
 0x446   :  { %1185 = vmatpush.msrb.mxu2 %v188_v55 }
 0x448   :  { %v893_v59 = vpop.permute.xlu0 %892  ;;  %1186 = vmatpush.msrb.mxu2 %v187_v56 }
 0x449   :  { %v904_v60 = vadd.f32 %v893_v59, %v750_v58  ;;  %3347 = vmatmul.msk.f32.vlgmr.msra.gmra.mxu2 %vm254_vm5, %v4102_v51  ;;  %3359 = vmatmul.msk.f32.vlgmr.msra.gmra.mxu3 %vm254_vm5, %v4124_v57 }
 0x44a   :  { %1275 = vmatpush.msra.mxu2 %v190_v26 }
 0x44b   :  { %v908_v62 = vmul.f32 %v3573_v61, %v904_v60  ;;  %v4265_v61 = vld [vmem:[%s5038_s4] sm:$0x3] }
 0x44c   :  { %1276 = vmatpush.msra.mxu2 %v189_v54 }
 0x44d   :  { %913 = vrot.lane.b32.xlu0 %v908_v62, %s3669_s8 }
 0x44e   :  { %1277 = vmatpush.msra.mxu2 %v188_v55 }
 0x450   :  { %1278 = vmatpush.msra.mxu2 %v187_v56  ;;  %v895_v11 = vpop.permute.xlu0 %894 }
 0x451   :  { %3351 = vmatmul.msk.f32.vlgmr.msrb.gmra.mxu2 %vm254_vm5, %v4102_v51  ;;  %3360 = vmatmul.msk.f32.gmra.mxu3 %vm254_vm5, %v4135_v63  ;;  %v905_v32 = vadd.f32 %v895_v11, %v751_v12 }
 0x459   :  { %3357 = vmatmul.msk.f32.vlgmr.msra.gmra.mxu2 %vm254_vm5, %v4124_v57 }
 0x45b   :  { %v735_v4 = vpop.xlane.xlu1 %734 }
 0x45c   :  { %v743_v5 = vadd.f32 %v3575_v1, %v735_v4 }
 0x45e   :  { %3576 = vrcp.f32 %v743_v5 }
 0x461   :  { %3358 = vmatmul.msk.f32.gmra.mxu2 %vm254_vm5, %v4135_v63 }
 0x464   :  { %v3577_v36 = vpop.eup %3576 }
 0x465   :  { %v909_v39 = vmul.f32 %v3577_v36, %v905_v32 }
 0x467   :  { %938 = vrot.lane.b32.xlu0 %v909_v39, %s3669_s8 }
 0x4b4   :  { %v4165_v2 = vpop.f32.mrf.mxu3 }
 0x4b5   :  { %v1017_v56 = vsel %vm220_vm0, %v4165_v2, 0.0  ;;  %v3654_v2 = vld [vmem:[%s5054_s20] sm:$0x3]  ;;  %s5058_s20 = smov 8  }
 0x4bc   :  { %v1128_v15 = vpop.f32.mrf.mxu3 }
 0x4bf   :  { %v914_v19 = vpop.permute.xlu0 %913 }
 0x4c0   :  { %3341 = vmatmul.msk.f32.vlgmr.msrb.gmra.mxu0 %vm552_vm7, %v914_v19 }
 0x4c1   :  { %1143 = vmatpush.msrb.mxu0 %v182_v18 }
 0x4c3   :  { %1144 = vmatpush.msrb.mxu0 %v181_v20 }
 0x4c4   :  { %v984_v23 = vpop.f32.mrf.mxu2  ;;  %v4192_v24 = vpop.f32.mrf.mxu3 }
 0x4c5   :  { %v1312_v27 = vmul.f32 %v4192_v24, %v1128_v15  ;;  %1145 = vmatpush.msrb.mxu0 %v180_v22  ;;  %v1015_v54 = vsel %vm220_vm0, %v984_v23, 0.0 }
 0x4c7   :  { %v1322_v29 = vsel %vm535_vm6, %v1312_v27, 0.0  ;;  %1146 = vmatpush.msrb.mxu0 %v179_v25 }
 0x4c8   :  { %1323 = vadd.xlane.f32.xlu2 %v1322_v29  ;;  %3345 = vmatmul.msk.f32.vlgmr.msra.gmra.mxu0 %vm254_vm5, %v4102_v51 }
 0x4c9   :  { %1229 = vmatpush.msra.mxu0 %v182_v18 }
 0x4cb   :  { %1230 = vmatpush.msra.mxu0 %v181_v20 }
 0x4cc   :  { %v1108_v33 = vpop.f32.mrf.mxu2  ;;  %v4201_v34 = vpop.f32.mrf.mxu3 }
 0x4cd   :  { %1231 = vmatpush.msra.mxu0 %v180_v22 }
 0x4cf   :  { %1232 = vmatpush.msra.mxu0 %v179_v25 }
 0x4d0   :  { %3349 = vmatmul.msk.f32.vlgmr.msrb.gmra.mxu0 %vm254_vm5, %v4102_v51 }
 0x4d4   :  { %v4205_v35 = vpop.f32.mrf.mxu2  ;;  %v4207_v37 = vpop.f32.mrf.mxu3 }
 0x4d5   :  { %v1311_v38 = vmul.f32 %v4205_v35, %v1108_v33  ;;  %3370 = vmatpush.xpose.msk.msrb.mxu3 %vm552_vm7, %v4207_v37  ;;  %v3493_v13 = vpack.i.bf16 %v4201_v34, %v4207_v37 }
 0x4d7   :  { %v1319_v41 = vsel %vm535_vm6, %v1311_v38, 0.0 }
 0x4d8   :  { %1320 = vadd.xlane.f32.xlu0 %v1319_v41  ;;  %3353 = vmatmul.msk.f32.vlgmr.msra.gmra.mxu0 %vm254_vm5, %v4124_v57 }
 0x4d9   :  { %3371 = vmatpush.xpose.msk.msrb.mxu3 %vm552_vm7, %v4201_v34  ;;  %v939_v43 = vpop.permute.xlu0 %938 }
 0x4da   :  { %3342 = vmatmul.msk.f32.vlgmr.msrb.gmra.mxu1 %vm552_vm7, %v939_v43 }
 0x4db   :  { %1163 = vmatpush.msrb.mxu1 %v186_v42 }
 0x4dc   :  { %v4224_v44 = vpop.f32.mrf.mxu2  ;;  %3372 = vmatmul.msk.f32.vlgmr.msrb.gmra.mxu3 %vm552_vm7, %v1128_v15 }
 0x4dd   :  { %1164 = vmatpush.msrb.mxu1 %v185_v40 }
 0x4df   :  { %1165 = vmatpush.msrb.mxu1 %v184_v45 }
 0x4e0   :  { %3354 = vmatmul.msk.f32.gmra.mxu0 %vm254_vm5, %v4135_v63 }
 0x4e1   :  { %1166 = vmatpush.msrb.mxu1 %v183_v46 }
 0x4e2   :  { %3346 = vmatmul.msk.f32.vlgmr.msra.gmra.mxu1 %vm254_vm5, %v4102_v51 }
 0x4e3   :  { %1252 = vmatpush.msra.mxu1 %v186_v42 }
 0x4e4   :  { %v1283_v47 = vpop.f32.mrf.mxu2 }
 0x4e5   :  { %3367 = vmatpush.xpose.msk.msrb.mxu2 %vm552_vm7, %v1283_v47  ;;  %1253 = vmatpush.msra.mxu1 %v185_v40  ;;  %v3488_v14 = vpack.i.bf16 %v4224_v44, %v1283_v47 }
 0x4e7   :  { %1254 = vmatpush.msra.mxu1 %v184_v45 }
 0x4e9   :  { %3368 = vmatpush.xpose.msk.msrb.mxu2 %vm552_vm7, %v4224_v44  ;;  %1255 = vmatpush.msra.mxu1 %v183_v46 }
 0x4ea   :  { %3350 = vmatmul.msk.f32.vlgmr.msrb.gmra.mxu1 %vm254_vm5, %v4102_v51 }
 0x4ec   :  { %3369 = vmatmul.msk.f32.vlgmr.msrb.gmra.mxu2 %vm552_vm7, %v1108_v33 }
 0x4f2   :  { %3355 = vmatmul.msk.f32.vlgmr.msra.gmra.mxu1 %vm254_vm5, %v4124_v57 }
 0x4fa   :  { %3356 = vmatmul.msk.f32.gmra.mxu1 %vm254_vm5, %v4135_v63 }
 0x53b   :  { %v1324_v17 = vpop.xlane.xlu2 %1323 }
 0x53c   :  { %v4304_v18 = vmul.f32 0.35355338, %v1324_v17 }
 0x53d   :  { %v934_v48 = vpop.f32.mrf.mxu0 }
 0x53e   :  { %v1012_v26 = vsel %vm220_vm0, %v934_v48, 0.0 }
 0x545   :  { %v1068_v31 = vpop.f32.mrf.mxu0 }
 0x54b   :  { %v1321_v37 = vpop.xlane.xlu0 %1320 }
 0x54c   :  { %v4313_v42 = vmul.f32 0.35355338, %v1321_v37 }
 0x54d   :  { %v4247_v49 = vpop.f32.mrf.mxu0 }
 0x54e   :  { %v1309_v50 = vmul.f32 %v4247_v49, %v1068_v31 }
 0x550   :  { %v1313_v52 = vsel %vm535_vm6, %v1309_v50, 0.0 }
 0x551   :  { %1314 = vadd.xlane.f32.xlu0 %v1313_v52 }
 0x555   :  { %v4251_v53 = vpop.f32.mrf.mxu0 }
 0x557   :  { %v959_v51 = vpop.f32.mrf.mxu1 }
 0x558   :  { %v1013_v28 = vsel %vm220_vm0, %v959_v51, 0.0 }
 0x559   :  { %v1014_v30 = vadd.f32 %v1013_v28, %v1012_v26 }
 0x55b   :  { %v1016_v55 = vadd.f32 %v1015_v54, %v1014_v30 }
 0x55d   :  { %v1018_v57 = vadd.f32 %v1017_v56, %v1016_v55  ;;  %v4258_v58 = vpop.f32.mrf.mxu0 }
 0x55e   :  { %3361 = vmatpush.xpose.msk.msrb.mxu0 %vm552_vm7, %v4258_v58 }
 0x55f   :  { %v1088_v59 = vpop.f32.mrf.mxu1  ;;  %v1442_v60 = vpop.f32.mrf.mxu3  ;;  %v1019_v3 = vadd.f32 %v3654_v2, %v1018_v57 }
 0x560   :  { %v1448_v62 = vmul.f32 0.35355338, %v1442_v60 }
 0x561   :  { %v4300_v15 = vadd.f32 %v1020_v9, %v1019_v3 }
 0x562   :  { %3362 = vmatpush.xpose.msk.msrb.mxu0 %vm552_vm7, %v4251_v53  ;;  %v1452_v63 = vadd.f32 %v1448_v62, %v4265_v61 }
 0x563   :  { %v1769_v16 = vsel %vm220_vm0, %v4300_v15, 0.0 }
 0x564   :  { %v1463_v6 = vsel %vm1453_vm14, %v1452_v63, -inf }
 0x565   :  { %1464 = vmax.xlane.f32.xlu2 %v1463_v6  ;;  %3363 = vmatmul.msk.f32.vlgmr.msrb.gmra.mxu0 %vm552_vm7, %v1068_v31 }
 0x567   :  { %v4272_v1 = vpop.f32.mrf.mxu1 }
 0x568   :  { %v1310_v7 = vmul.f32 %v4272_v1, %v1088_v59 }
 0x56a   :  { %v1316_v10 = vsel %vm535_vm6, %v1310_v7, 0.0 }
 0x56f   :  { %v4274_v4 = vpop.f32.mrf.mxu1  ;;  %v1413_v5 = vpop.f32.mrf.mxu2 }
 0x570   :  { %v3503_v11 = vpack.i.bf16 %v4274_v4, %v4251_v53  ;;  %v1447_v12 = vmul.f32 0.35355338, %v1413_v5 }
 0x572   :  { %v1451_v32 = vadd.f32 %v1447_v12, %v4265_v61 }
 0x574   :  { %v1460_v36 = vsel %vm1453_vm14, %v1451_v32, -inf }
 0x575   :  { %1461 = vmax.xlane.f32.xlu1 %v1460_v36 }
 0x577   :  { %v4280_v39 = vpop.f32.mrf.mxu1 }
 0x578   :  { %3364 = vmatpush.xpose.msk.msrb.mxu1 %vm552_vm7, %v4280_v39  ;;  %v3498_v55 = vpack.i.bf16 %v4280_v39, %v4258_v58 }
 0x57c   :  { %3365 = vmatpush.xpose.msk.msrb.mxu1 %vm552_vm7, %v4274_v4 }
 0x57d   :  { %3494 = vrot.lane.b32.xlu2 %v3493_v13, %s3669_s8 }
 0x57f   :  { %3366 = vmatmul.msk.f32.vlgmr.msrb.gmra.mxu1 %vm552_vm7, %v1088_v59 }
 0x58e   :  { %3489 = vrot.lane.b32.xlu1 %v3488_v14, %s3669_s8 }
 0x5b8   :  { %1317 = vadd.xlane.f32.xlu1 %v1316_v10 }
 0x5c0   :  { %1770 = vadd.xlane.f32.xlu1 %v1769_v16 }
 0x5c4   :  { %v1315_v57 = vpop.xlane.xlu0 %1314 }
 0x5c5   :  { %v4335_v59 = vmul.f32 0.35355338, %v1315_v57  ;;  %v100_v57 = vld [vmem:[%s5055_s22 + $0xe0] sm:$0xff] }
 0x5d8   :  { %v1465_v19 = vpop.xlane.xlu2 %1464 }
 0x5d9   :  { %v4307_v20 = vmax.f32 %v1465_v19, %v4304_v18 }
 0x5db   :  { %v1473_v21 = vsub.f32 %v4304_v18, %v4307_v20  ;;  %v1485_v22 = vsub.f32 %v1452_v63, %v4307_v20 }
 0x5dd   :  { %v1492_v23 = vmul.f32 1.442695, %v1485_v22 }
 0x5df   :  { %3578 = vpow2.f32 %v1492_v23 }
 0x5e0   :  { %v3495_v25 = vpop.permute.xlu2 %3494 }
 0x5e1   :  { %v3496_v27 = vunpack.i.l.bf16 %v3495_v25  ;;  %v3497_v33 = vunpack.i.h.bf16 %v3495_v25 }
 0x5e2   :  { %v1355_v29 = vpop.f32.mrf.mxu0 }
 0x5e3   :  { %v1445_v34 = vmul.f32 0.35355338, %v1355_v29  ;;  %1629 = vmatpush.msra.mxu3 %v3496_v27  ;;  %v1480_v29 = vmul.f32 1.442695, %v1473_v21 }
 0x5e5   :  { %1630 = vmatpush.msra.mxu3 %v3497_v33  ;;  %v1449_v38 = vadd.f32 %v1445_v34, %v4265_v61  ;;  %v3579_v41 = vpop.eup %3578 }
 0x5e6   :  { %3376 = vmatmul.msk.f32.vlgmr.msra.gmra.mxu3 %vm1524_vm15, %v3579_v41  ;;  %v1503_v56 = vsel %vm1453_vm14, %v3579_v41, 0.0 }
 0x5e7   :  { %v1454_v43 = vsel %vm1453_vm14, %v1449_v38, -inf }
 0x5e8   :  { %v1462_v40 = vpop.xlane.xlu1 %1461  ;;  %1455 = vmax.xlane.f32.xlu2 %v1454_v43 }
 0x5e9   :  { %v4318_v44 = vmax.f32 %v1462_v40, %v4313_v42 }
 0x5eb   :  { %v1472_v45 = vsub.f32 %v4313_v42, %v4318_v44  ;;  %v1484_v46 = vsub.f32 %v1451_v32, %v4318_v44 }
 0x5ed   :  { %v1490_v47 = vmul.f32 1.442695, %v1484_v46 }
 0x5ef   :  { %3580 = vpow2.f32 %v1490_v47 }
 0x5f5   :  { %v3581_v48 = vpop.eup %3580 }
 0x5f6   :  { %v1500_v31 = vsel %vm1453_vm14, %v3581_v48, 0.0 }
 0x5f7   :  { %1501 = vadd.xlane.f32.xlu2 %v1500_v31 }
 0x5fc   :  { %v1384_v50 = vpop.f32.mrf.mxu1 }
 0x5fd   :  { %v1446_v52 = vmul.f32 0.35355338, %v1384_v50 }
 0x5ff   :  { %v1450_v51 = vadd.f32 %v1446_v52, %v4265_v61 }
 0x600   :  { %v3490_v26 = vpop.permute.xlu1 %3489 }
 0x601   :  { %v3491_v28 = vunpack.i.l.bf16 %v3490_v26  ;;  %v1457_v30 = vsel %vm1453_vm14, %v1450_v51, -inf  ;;  %v3492_v54 = vunpack.i.h.bf16 %v3490_v26 }
 0x602   :  { %1458 = vmax.xlane.f32.xlu0 %v1457_v30  ;;  %v103_v30 = vld [vmem:[%s5055_s22 + $0xf8] sm:$0xff] }
 0x603   :  { %1600 = vmatpush.msra.mxu2 %v3491_v28 }
 0x605   :  { %1601 = vmatpush.msra.mxu2 %v3492_v54  ;;  %v102_v54 = vld [vmem:[%s5055_s22 + $0xf0] sm:$0xff] }
 0x606   :  { %3375 = vmatmul.msk.f32.vlgmr.msra.gmra.mxu2 %vm1524_vm15, %v3581_v48  ;;  %v1478_v48 = vmul.f32 1.442695, %v1472_v45 }
 0x616   :  { %3499 = vrot.lane.b32.xlu0 %v3498_v55, %s3669_s8  ;;  %v101_v55 = vld [vmem:[%s5055_s22 + $0xe8] sm:$0xff] }
 0x61e   :  { %3504 = vrot.lane.b32.xlu0 %v3503_v11, %s3669_s8 }
 0x62b   :  { %v1318_v63 = vpop.xlane.xlu1 %1317 }
 0x62c   :  { %v4343_v6 = vmul.f32 0.35355338, %v1318_v63 }
 0x633   :  { %v1771_v36 = vpop.xlane.xlu1 %1770 }
 0x634   :  { %v1772_v14 = vmul.f32 %v1771_v36, %v3775_v8  ;;  %v99_v36 = vld [vmem:[%s5055_s22 + $0xd8] sm:$0xff] }
 0x636   :  { %v4356_v9 = vsub.f32 %v4300_v15, %v1772_v14 }
 0x638   :  { %v1774_v16 = vmul.f32 %v4356_v9, %v4356_v9 }
 0x63a   :  { %v1775_v25 = vsel %vm220_vm0, %v1774_v16, 0.0  ;;  %v3656_v16 = vld [vmem:[%s5028_s7] sm:$0x3] }
 0x648   :  { %1504 = vadd.xlane.f32.xlu0 %v1503_v56 }
 0x65b   :  { %v1456_v60 = vpop.xlane.xlu2 %1455 }
 0x65c   :  { %v4338_v61 = vmax.f32 %v1456_v60, %v4335_v59 }
 0x65e   :  { %v1470_v58 = vsub.f32 %v4335_v59, %v4338_v61  ;;  %v1482_v13 = vsub.f32 %v1449_v38, %v4338_v61 }
 0x660   :  { %v1486_v0 = vmul.f32 1.442695, %v1482_v13  ;;  %v3655_v13 = vld [vmem:[%s5057_s24] sm:$0x3] }
 0x661   :  { %v1791_v14 = vperm.slane %v3655_v13, 1  ;;  %v121_v13 = vld [vmem:[%s5056_s27 + $0x88] sm:$0xff] }
 0x669   :  { %v1632_v62 = vpop.f32.mrf.mxu3 }
 0x66a   :  { %1645 = vrot.lane.b32.xlu2 %v1632_v62, %s5058_s20  ;;  %v1502_v33 = vpop.xlane.xlu2 %1501 }
 0x675   :  { %v1459_v53 = vpop.xlane.xlu0 %1458 }
 0x676   :  { %v4346_v4 = vmax.f32 %v1459_v53, %v4343_v6 }
 0x678   :  { %v1471_v5 = vsub.f32 %v4343_v6, %v4346_v4  ;;  %v1483_v11 = vsub.f32 %v1450_v51, %v4346_v4  ;;  %v214_v51 = vld [vmem:[%s5040_s16 + $0x18] sm:$0xff] }
 0x679   :  { %1754 = vmatpush.msrb.mxu3 %v214_v51 }
 0x67a   :  { %v1488_v12 = vmul.f32 1.442695, %v1483_v11 }
 0x67b   :  { %1870 = vmatpush.msra.mxu3 %v103_v30 }
 0x67c   :  { %3582 = vpow2.f32 %v1488_v12  ;;  %v213_v12 = vld [vmem:[%s5040_s16 + $0x10] sm:$0xff] }
 0x67d   :  { %3584 = vpow2.f32 %v1486_v0  ;;  %1871 = vmatpush.msra.mxu3 %v102_v54  ;;  %1729 = vmatpush.msrb.mxu2 %v213_v12  ;;  %v135_v0 = vld [vmem:[%s5056_s27 + $0xf8] sm:$0xff]  ;;  %v89_v54 = vld [vmem:[%s5055_s22 + $0x88] sm:$0xff] }
 0x67e   :  { %3586 = vpow2.f32 %v1480_v29  ;;  %v131_v29 = vld [vmem:[%s5056_s27 + $0xd8] sm:$0xff] }
 0x67f   :  { %1872 = vmatpush.msra.mxu3 %v101_v55  ;;  %1850 = vmatpush.msra.mxu2 %v99_v36  ;;  %v212_v55 = vld [vmem:[%s5040_s16 + $0x8] sm:$0xff] }
 0x681   :  { %1873 = vmatpush.msra.mxu3 %v100_v57 }
 0x682   :  { %v3583_v32 = vpop.eup %3582 }
 0x683   :  { %v1497_v39 = vsel %vm1453_vm14, %v3583_v32, 0.0  ;;  %v3585_v23 = vpop.eup %3584 }
 0x684   :  { %1498 = vadd.xlane.f32.xlu0 %v1497_v39  ;;  %v1494_v27 = vsel %vm1453_vm14, %v3585_v23, 0.0  ;;  %v3587_v37 = vpop.eup %3586  ;;  %v98_v39 = vld [vmem:[%s5055_s22 + $0xd0] sm:$0xff] }
 0x685   :  { %v1517_v41 = vmul.f32 %v3587_v37, %v4192_v24  ;;  %1851 = vmatpush.msra.mxu2 %v98_v39  ;;  %v122_v39 = vld [vmem:[%s5056_s27 + $0x90] sm:$0xff] }
 0x688   :  { %v3500_v7 = vpop.permute.xlu0 %3499 }
 0x689   :  { %v3502_v10 = vunpack.i.h.bf16 %v3500_v7  ;;  %v3501_v2 = vunpack.i.l.bf16 %v3500_v7  ;;  %v1603_v3 = vpop.f32.mrf.mxu2 }
 0x68a   :  { %1643 = vrot.lane.b32.xlu1 %v1603_v3, %s5058_s20  ;;  %v97_v3 = vld [vmem:[%s5055_s22 + $0xc8] sm:$0xff] }
 0x68b   :  { %1542 = vmatpush.msra.mxu0 %v3501_v2  ;;  %1571 = vmatpush.msra.mxu1 %v3502_v10  ;;  %v134_v2 = vld [vmem:[%s5056_s27 + $0xf0] sm:$0xff] }
 0x68c   :  { %1852 = vmatpush.msra.mxu2 %v97_v3  ;;  %v126_v3 = vld [vmem:[%s5056_s27 + $0xb0] sm:$0xff] }
 0x690   :  { %v3505_v17 = vpop.permute.xlu0 %3504 }
 0x691   :  { %v3507_v19 = vunpack.i.h.bf16 %v3505_v17  ;;  %v3506_v22 = vunpack.i.l.bf16 %v3505_v17  ;;  %v1793_v17 = vperm.slane %v3656_v16, 1 }
 0x693   :  { %1543 = vmatpush.msra.mxu0 %v3506_v22  ;;  %1572 = vmatpush.msra.mxu1 %v3507_v19  ;;  %v133_v22 = vld [vmem:[%s5056_s27 + $0xe8] sm:$0xff] }
 0x694   :  { %1776 = vadd.xlane.f32.xlu2 %v1775_v25  ;;  %3373 = vmatmul.msk.f32.vlgmr.msra.gmra.mxu0 %vm1524_vm15, %v3585_v23  ;;  %v132_v23 = vld [vmem:[%s5056_s27 + $0xe0] sm:$0xff] }
 0x695   :  { %3374 = vmatmul.msk.f32.vlgmr.msra.gmra.mxu1 %vm1524_vm15, %v3583_v32 }
 0x696   :  { %1704 = vmatpush.msrb.mxu1 %v212_v55 }
 0x6b4   :  { %1495 = vadd.xlane.f32.xlu1 %v1494_v27  ;;  %v4444_v27 = vld [vmem:[%s5029_s3] sm:$0xff] }
 0x6bb   :  { %v1505_v34 = vpop.xlane.xlu0 %1504 }
 0x6bc   :  { %v1509_v38 = vadd.f32 %v3587_v37, %v1505_v34  ;;  %v130_v34 = vld [vmem:[%s5056_s27 + $0xd0] sm:$0xff]  ;;  %v129_v37 = vld [vmem:[%s5056_s27 + $0xc8] sm:$0xff] }
 0x6be   :  { %3588 = vrcp.f32 %v1509_v38  ;;  %v4461_v38 = vld [vmem:[%s5029_s3 + $0x8] sm:$0xff] }
 0x6bf   :  { %3590 = vpow2.f32 %v1478_v48 }
 0x6c4   :  { %v1646_v43 = vpop.permute.xlu2 %1645  ;;  %v3589_v46 = vpop.eup %3588 }
 0x6c5   :  { %v1654_v40 = vadd.f32 %v1646_v43, %v1517_v41  ;;  %v3591_v18 = vpop.eup %3590  ;;  %v128_v41 = vld [vmem:[%s5056_s27 + $0xc0] sm:$0xff]  ;;  %v4473_v43 = vld [vmem:[%s5029_s3 + $0x10] sm:$0xf] }
 0x6c6   :  { %v1508_v20 = vadd.f32 %v3591_v18, %v1502_v33  ;;  %v1516_v21 = vmul.f32 %v3591_v18, %v4205_v35  ;;  %v1474_v35 = vmul.f32 1.442695, %v1470_v58 }
 0x6c7   :  { %v1658_v47 = vmul.f32 %v3589_v46, %v1654_v40  ;;  %v1476_v40 = vmul.f32 1.442695, %v1471_v5 }
 0x6c8   :  { %3592 = vrcp.f32 %v1508_v20 }
 0x6cd   :  { %1735 = vrot.lane.b32.xlu1 %v1658_v47, %s3669_s8 }
 0x6ce   :  { %v3593_v52 = vpop.eup %3592 }
 0x6f7   :  { %v1499_v46 = vpop.xlane.xlu0 %1498 }
 0x6fc   :  { %v1644_v31 = vpop.permute.xlu1 %1643 }
 0x6fd   :  { %v1653_v50 = vadd.f32 %v1644_v31, %v1516_v21 }
 0x6ff   :  { %v1657_v24 = vmul.f32 %v3593_v52, %v1653_v50 }
 0x701   :  { %1710 = vrot.lane.b32.xlu2 %v1657_v24, %s3669_s8 }
 0x707   :  { %v1777_v42 = vpop.xlane.xlu2 %1776 }
 0x708   :  { %v1778_v44 = vmul.f32 %v1777_v42, %v3775_v8 }
 0x70a   :  { %v1779_v28 = vadd.f32 1e-05, %v1778_v44 }
 0x70c   :  { %3594 = vrsqrt.f32 %v1779_v28  ;;  %vm1786_vm2 = vweird.f32 %v1779_v28 }
 0x70d   :  { %3596 = vpow2.f32 %v1474_v35  ;;  %v90_v35 = vld [vmem:[%s5055_s22 + $0x90] sm:$0xff] }
 0x70e   :  { %3598 = vpow2.f32 %v1476_v40 }
 0x711   :  { %v1545_v26 = vpop.f32.mrf.mxu0 }
 0x712   :  { %1639 = vrot.lane.b32.xlu0 %v1545_v26, %s5058_s20  ;;  %v1574_v45 = vpop.f32.mrf.mxu1  ;;  %v3595_v56 = vpop.eup %3594 }
 0x713   :  { %v4395_v59 = vpop.eup %3596  ;;  %v1781_v60 = vmul.f32 %v3595_v56, %v1779_v28  ;;  %vm1787_vm1 = vweird.f32 %v3595_v56  ;;  %v91_v28 = vld [vmem:[%s5055_s22 + $0x98] sm:$0xff] }
 0x714   :  { %vm1788_vm3 = vmor %vm1786_vm2, %vm1787_vm1  ;;  %v3599_v47 = vpop.eup %3598  ;;  %v1514_v48 = vmul.f32 %v4395_v59, %v4247_v49 }
 0x715   :  { %v1782_v62 = vmul.f32 %v3595_v56, %v1781_v60  ;;  %v1507_v18 = vadd.f32 %v3599_v47, %v1499_v46  ;;  %v1515_v4 = vmul.f32 %v3599_v47, %v4272_v1  ;;  %v211_v1 = vld [vmem:[%s5040_s16] sm:$0xff]  ;;  %v94_v60 = vld [vmem:[%s5055_s22 + $0xb0] sm:$0xff] }
 0x716   :  { %1679 = vmatpush.msrb.mxu0 %v211_v1 }
 0x717   :  { %v1783_v63 = vmul.f32 0.5, %v1782_v62  ;;  %v92_v62 = vld [vmem:[%s5055_s22 + $0xa0] sm:$0xff] }
 0x718   :  { %1810 = vmatpush.msra.mxu0 %v91_v28 }
 0x719   :  { %v1784_v53 = vsub.f32 1.5, %v1783_v63 }
 0x71a   :  { %1641 = vrot.lane.b32.xlu0 %v1574_v45, %s5058_s20  ;;  %1811 = vmatpush.msra.mxu0 %v90_v35 }
 0x71b   :  { %v1785_v11 = vmul.f32 %v3595_v56, %v1784_v53 }
 0x71c   :  { %1812 = vmatpush.msra.mxu0 %v89_v54 }
 0x71d   :  { %v1789_v32 = vsel %vm1788_vm3, %v3595_v56, %v1785_v11  ;;  %v88_v56 = vld [vmem:[%s5055_s22 + $0x80] sm:$0xff] }
 0x71e   :  { %v1790_v7 = vmul.f32 %v1789_v32, %v4356_v9  ;;  %v96_v9 = vld [vmem:[%s5055_s22 + $0xc0] sm:$0xff]  ;;  %1813 = vmatpush.msra.mxu0 %v88_v56  ;;  %v123_v32 = vld [vmem:[%s5056_s27 + $0x98] sm:$0xff] }
 0x71f   :  { %1853 = vmatpush.msra.mxu2 %v96_v9  ;;  %v125_v9 = vld [vmem:[%s5056_s27 + $0xa8] sm:$0xff] }
 0x720   :  { %v1792_v19 = vmul.f32 %v1791_v14, %v1790_v7 }
 0x722   :  { %v4435_v25 = vadd.f32 %v1793_v17, %v1792_v19  ;;  %v124_v17 = vld [vmem:[%s5056_s27 + $0xa0] sm:$0xff] }
 0x727   :  { %v1496_v61 = vpop.xlane.xlu1 %1495 }
 0x728   :  { %v4398_v58 = vadd.f32 %v4395_v59, %v1496_v61  ;;  %v95_v59 = vld [vmem:[%s5055_s22 + $0xb8] sm:$0xff] }
 0x729   :  { %1830 = vmatpush.msra.mxu1 %v95_v59 }
 0x72a   :  { %3600 = vrcp.f32 %v4398_v58  ;;  %v93_v58 = vld [vmem:[%s5055_s22 + $0xa8] sm:$0xff] }
 0x72b   :  { %3602 = vrcp.f32 %v1507_v18  ;;  %1831 = vmatpush.msra.mxu1 %v94_v60 }
 0x72d   :  { %1832 = vmatpush.msra.mxu1 %v93_v58 }
 0x72f   :  { %1833 = vmatpush.msra.mxu1 %v92_v62 }
 0x730   :  { %v3601_v31 = vpop.eup %3600 }
 0x731   :  { %v3603_v52 = vpop.eup %3602 }
 0x73f   :  { %v1736_v10 = vpop.permute.xlu1 %1735 }
 0x740   :  { %3380 = vmatmul.msk.f32.vlgmr.msrb.gmra.mxu3 %vm552_vm7, %v1736_v10  ;;  %v127_v10 = vld [vmem:[%s5056_s27 + $0xb8] sm:$0xff] }
 0x741   :  { %1950 = vmatpush.msrb.mxu3 %v135_v0 }
 0x743   :  { %1951 = vmatpush.msrb.mxu3 %v134_v2 }
 0x745   :  { %1952 = vmatpush.msrb.mxu3 %v133_v22 }
 0x747   :  { %1953 = vmatpush.msrb.mxu3 %v132_v23 }
 0x748   :  { %3384 = vmatmul.msk.f32.vlgmr.msra.gmra.mxu3 %vm254_vm5, %v4435_v25 }
 0x749   :  { %2048 = vmatpush.msra.mxu3 %v135_v0  ;;  %v120_v0 = vld [vmem:[%s5056_s27 + $0x80] sm:$0xff] }
 0x74b   :  { %2049 = vmatpush.msra.mxu3 %v134_v2 }
 0x74d   :  { %2050 = vmatpush.msra.mxu3 %v133_v22 }
 0x74f   :  { %2051 = vmatpush.msra.mxu3 %v132_v23 }
 0x750   :  { %3388 = vmatmul.msk.f32.vlgmr.msrb.gmra.mxu3 %vm254_vm5, %v4435_v25 }
 0x758   :  { %3398 = vmatmul.msk.f32.vlgmr.msra.gmra.mxu3 %vm254_vm5, %v4444_v27 }
 0x75b   :  { %v1711_v33 = vpop.permute.xlu2 %1710 }
 0x75c   :  { %3379 = vmatmul.msk.f32.vlgmr.msrb.gmra.mxu2 %vm552_vm7, %v1711_v33 }
 0x75d   :  { %1930 = vmatpush.msrb.mxu2 %v131_v29 }
 0x75f   :  { %1931 = vmatpush.msrb.mxu2 %v130_v34 }
 0x760   :  { %3399 = vmatmul.msk.f32.gmra.mxu3 %vm254_vm5, %v4461_v38 }
 0x761   :  { %1932 = vmatpush.msrb.mxu2 %v129_v37 }
 0x763   :  { %1933 = vmatpush.msrb.mxu2 %v128_v41 }
 0x764   :  { %3383 = vmatmul.msk.f32.vlgmr.msra.gmra.mxu2 %vm254_vm5, %v4435_v25 }
 0x765   :  { %2022 = vmatpush.msra.mxu2 %v131_v29 }
 0x767   :  { %2023 = vmatpush.msra.mxu2 %v130_v34 }
 0x768   :  { %3400 = vmatmul.msk.f32.gmra.mxu3 %vm254_vm5, %v4473_v43 }
 0x769   :  { %2024 = vmatpush.msra.mxu2 %v129_v37 }
 0x76b   :  { %2025 = vmatpush.msra.mxu2 %v128_v41 }
 0x76c   :  { %3387 = vmatmul.msk.f32.vlgmr.msrb.gmra.mxu2 %vm254_vm5, %v4435_v25 }
 0x774   :  { %3395 = vmatmul.msk.f32.vlgmr.msra.gmra.mxu2 %vm254_vm5, %v4444_v27 }
 0x77c   :  { %3396 = vmatmul.msk.f32.gmra.mxu2 %vm254_vm5, %v4461_v38 }
 0x784   :  { %3397 = vmatmul.msk.f32.gmra.mxu2 %vm254_vm5, %v4473_v43  ;;  %v1640_v20 = vpop.permute.xlu0 %1639 }
 0x785   :  { %v1651_v21 = vadd.f32 %v1640_v20, %v1514_v48 }
 0x787   :  { %v1655_v6 = vmul.f32 %v3601_v31, %v1651_v21 }
 0x789   :  { %1660 = vrot.lane.b32.xlu0 %v1655_v6, %s3669_s8 }
 0x78c   :  { %v1642_v5 = vpop.permute.xlu0 %1641 }
 0x78d   :  { %v1652_v50 = vadd.f32 %v1642_v5, %v1515_v4 }
 0x78f   :  { %v1656_v24 = vmul.f32 %v3603_v52, %v1652_v50 }
 0x791   :  { %1685 = vrot.lane.b32.xlu0 %v1656_v24, %s3669_s8 }
 0x7c3   :  { %v4494_v49 = vpop.f32.mrf.mxu3 }
 0x7c4   :  { %v1764_v37 = vsel %vm220_vm0, %v4494_v49, 0.0 }
 0x7cb   :  { %v1875_v51 = vpop.f32.mrf.mxu3 }
 0x7d3   :  { %v4496_v26 = vpop.f32.mrf.mxu3 }
 0x7d4   :  { %v2065_v42 = vmul.f32 %v4496_v26, %v1875_v51 }
 0x7d6   :  { %v2075_v44 = vsel %vm535_vm6, %v2065_v42, 0.0 }
 0x7d7   :  { %2076 = vadd.xlane.f32.xlu2 %v2075_v44 }
 0x7db   :  { %v2053_v45 = vpop.f32.mrf.mxu3 }
 0x7df   :  { %v4509_v30 = vpop.f32.mrf.mxu2 }
 0x7e0   :  { %v1762_v33 = vsel %vm220_vm0, %v4509_v30, 0.0 }
 0x7e3   :  { %v2056_v57 = vpop.f32.mrf.mxu3 }
 0x7e4   :  { %v3513_v63 = vpack.i.bf16 %v2053_v45, %v2056_v57 }
 0x7e7   :  { %v4526_v61 = vpop.f32.mrf.mxu2 }
 0x7eb   :  { %v4534_v53 = vpop.f32.mrf.mxu3 }
 0x7ec   :  { %3413 = vmatpush.xpose.msk.msrb.mxu3 %vm552_vm7, %v4534_v53 }
 0x7ef   :  { %v4538_v11 = vpop.f32.mrf.mxu2  ;;  %3514 = vrot.lane.b32.xlu2 %v3513_v63, %s3669_s8 }
 0x7f0   :  { %3414 = vmatpush.xpose.msk.msrb.mxu3 %vm552_vm7, %v2056_v57  ;;  %v2064_v47 = vmul.f32 %v4538_v11, %v4526_v61 }
 0x7f2   :  { %v2072_v21 = vsel %vm535_vm6, %v2064_v47, 0.0 }
 0x7f4   :  { %3415 = vmatpush.xpose.msk.msrb.mxu3 %vm552_vm7, %v2053_v45  ;;  %v3660_v45 = vld [vmem:[%s5030_s5] sm:$0x3] }
 0x7f7   :  { %v4543_v12 = vpop.f32.mrf.mxu2  ;;  %3416 = vmatmul.msk.f32.vlgmr.msrb.gmra.mxu3 %vm552_vm7, %v1875_v51 }
 0x7fb   :  { %v1661_v36 = vpop.permute.xlu0 %1660 }
 0x7fc   :  { %3377 = vmatmul.msk.f32.vlgmr.msrb.gmra.mxu0 %vm552_vm7, %v1661_v36 }
 0x7fd   :  { %1890 = vmatpush.msrb.mxu0 %v123_v32 }
 0x7ff   :  { %v4556_v14 = vpop.f32.mrf.mxu2  ;;  %1891 = vmatpush.msrb.mxu0 %v122_v39 }
 0x800   :  { %v3508_v7 = vpack.i.bf16 %v4543_v12, %v4556_v14 }
 0x801   :  { %1892 = vmatpush.msrb.mxu0 %v121_v13 }
 0x803   :  { %v1686_v2 = vpop.permute.xlu0 %1685  ;;  %1893 = vmatpush.msrb.mxu0 %v120_v0 }
 0x804   :  { %3378 = vmatmul.msk.f32.vlgmr.msrb.gmra.mxu1 %vm552_vm7, %v1686_v2  ;;  %3381 = vmatmul.msk.f32.vlgmr.msra.gmra.mxu0 %vm254_vm5, %v4435_v25 }
 0x805   :  { %1910 = vmatpush.msrb.mxu1 %v127_v10  ;;  %1970 = vmatpush.msra.mxu0 %v123_v32 }
 0x807   :  { %v2033_v16 = vpop.f32.mrf.mxu2  ;;  %1911 = vmatpush.msrb.mxu1 %v126_v3  ;;  %1971 = vmatpush.msra.mxu0 %v122_v39 }
 0x808   :  { %3409 = vmatpush.xpose.msk.msrb.mxu2 %vm552_vm7, %v2033_v16  ;;  %2352 = vrot.lane.b32.xlu2 %v2033_v16, %s3669_s8 }
 0x809   :  { %1912 = vmatpush.msrb.mxu1 %v125_v9  ;;  %1972 = vmatpush.msra.mxu0 %v121_v13 }
 0x80b   :  { %1913 = vmatpush.msrb.mxu1 %v124_v17  ;;  %1973 = vmatpush.msra.mxu0 %v120_v0 }
 0x80c   :  { %3382 = vmatmul.msk.f32.vlgmr.msra.gmra.mxu1 %vm254_vm5, %v4435_v25  ;;  %3385 = vmatmul.msk.f32.vlgmr.msrb.gmra.mxu0 %vm254_vm5, %v4435_v25 }
 0x80d   :  { %3410 = vmatpush.xpose.msk.msrb.mxu2 %vm552_vm7, %v4556_v14  ;;  %1996 = vmatpush.msra.mxu1 %v127_v10 }
 0x80f   :  { %1997 = vmatpush.msra.mxu1 %v126_v3 }
 0x811   :  { %3411 = vmatpush.xpose.msk.msrb.mxu2 %vm552_vm7, %v4543_v12  ;;  %1998 = vmatpush.msra.mxu1 %v125_v9 }
 0x813   :  { %1999 = vmatpush.msra.mxu1 %v124_v17 }
 0x814   :  { %3412 = vmatmul.msk.f32.vlgmr.msrb.gmra.mxu2 %vm552_vm7, %v4526_v61  ;;  %3386 = vmatmul.msk.f32.vlgmr.msrb.gmra.mxu1 %vm254_vm5, %v4435_v25 }
 0x815   :  { %3389 = vmatmul.msk.f32.vlgmr.msra.gmra.mxu0 %vm254_vm5, %v4444_v27 }
 0x81c   :  { %3392 = vmatmul.msk.f32.vlgmr.msra.gmra.mxu1 %vm254_vm5, %v4444_v27 }
 0x81d   :  { %3390 = vmatmul.msk.f32.gmra.mxu0 %vm254_vm5, %v4461_v38 }
 0x824   :  { %3393 = vmatmul.msk.f32.gmra.mxu1 %vm254_vm5, %v4461_v38 }
 0x825   :  { %3391 = vmatmul.msk.f32.gmra.mxu0 %vm254_vm5, %v4473_v43 }
 0x82c   :  { %3394 = vmatmul.msk.f32.gmra.mxu1 %vm254_vm5, %v4473_v43 }
 0x84a   :  { %v4642_v51 = vpop.xlane.xlu2 %2076 }
 0x852   :  { %v3515_v1 = vpop.permute.xlu2 %3514 }
 0x853   :  { %v3516_v59 = vunpack.i.l.bf16 %v3515_v1  ;;  %v3517_v60 = vunpack.i.h.bf16 %v3515_v1 }
 0x862   :  { %v2353_v30 = vpop.permute.xlu2 %2352 }
 0x863   :  { %3421 = vmatpush.msk.msra.mxu2 %vm766_vm8, %v2353_v30 }
 0x879   :  { %v1681_v19 = vpop.f32.mrf.mxu0 }
 0x87a   :  { %v1759_v25 = vsel %vm220_vm0, %v1681_v19, 0.0  ;;  %v2207_v14 = vpop.f32.mrf.mxu3 }
 0x87b   :  { %v2213_v0 = vmul.f32 0.35355338, %v2207_v14 }
 0x87d   :  { %v2217_v2 = vadd.f32 %v3660_v45, %v2213_v0 }
 0x87f   :  { %v2227_v3 = vsel %vm689_vm9, %v2217_v2, -inf }
 0x881   :  { %v1706_v22 = vpop.f32.mrf.mxu1  ;;  %v1815_v23 = vpop.f32.mrf.mxu0 }
 0x882   :  { %v1760_v29 = vsel %vm220_vm0, %v1706_v22, 0.0 }
 0x883   :  { %v1761_v27 = vadd.f32 %v1760_v29, %v1759_v25  ;;  %v4669_v29 = vld [vmem:[%s5041_s17] sm:$0x3] }
 0x885   :  { %v1763_v34 = vadd.f32 %v1762_v33, %v1761_v27  ;;  %v3661_v27 = vld [vmem:[%s5031_s1] sm:$0x3] }
 0x887   :  { %v4610_v38 = vadd.f32 %v1764_v37, %v1763_v34  ;;  %v1767_v34 = vperm.slane %v4669_v29, 0 }
 0x889   :  { %v1835_v41 = vpop.f32.mrf.mxu1  ;;  %v4612_v40 = vpop.f32.mrf.mxu0  ;;  %v1766_v33 = vadd.f32 %v3661_v27, %v4610_v38 }
 0x88a   :  { %v2062_v43 = vmul.f32 %v4612_v40, %v1815_v23 }
 0x88b   :  { %v4676_v37 = vadd.f32 %v1767_v34, %v1766_v33 }
 0x88c   :  { %v2066_v46 = vsel %vm535_vm6, %v2062_v43, 0.0 }
 0x88d   :  { %2067 = vadd.xlane.f32.xlu0 %v2066_v46 }
 0x891   :  { %v4618_v48 = vpop.f32.mrf.mxu1 }
 0x892   :  { %v2063_v18 = vmul.f32 %v4618_v48, %v1835_v41  ;;  %v1975_v20 = vpop.f32.mrf.mxu0 }
 0x894   :  { %v2069_v31 = vsel %vm535_vm6, %v2063_v18, 0.0 }
 0x895   :  { %2073 = vadd.xlane.f32.xlu0 %v2072_v21  ;;  %2070 = vadd.xlane.f32.xlu1 %v2069_v31 }
 0x897   :  { %v2175_v42 = vpop.f32.mrf.mxu2 }
 0x898   :  { %v2212_v44 = vmul.f32 0.35355338, %v2175_v42 }
 0x899   :  { %v2001_v6 = vpop.f32.mrf.mxu1 }
 0x89a   :  { %v4623_v4 = vpop.f32.mrf.mxu0  ;;  %v3523_v5 = vpack.i.bf16 %v2001_v6, %v1975_v20  ;;  %v2216_v28 = vadd.f32 %v3660_v45, %v2212_v44 }
 0x89c   :  { %v2224_v35 = vsel %vm689_vm9, %v2216_v28, -inf }
 0x8a1   :  { %v2004_v50 = vpop.f32.mrf.mxu1 }
 0x8a2   :  { %v1981_v52 = vpop.f32.mrf.mxu0  ;;  %v3518_v24 = vpack.i.bf16 %v2004_v50, %v4623_v4 }
 0x8a3   :  { %3401 = vmatpush.xpose.msk.msrb.mxu0 %vm552_vm7, %v1981_v52 }
 0x8a7   :  { %3402 = vmatpush.xpose.msk.msrb.mxu0 %vm552_vm7, %v4623_v4 }
 0x8a9   :  { %2385 = vrot.lane.b32.xlu0 %v4534_v53, %s3669_s8  ;;  %v2007_v49 = vpop.f32.mrf.mxu1 }
 0x8aa   :  { %3405 = vmatpush.xpose.msk.msrb.mxu1 %vm552_vm7, %v2007_v49 }
 0x8ab   :  { %3403 = vmatpush.xpose.msk.msrb.mxu0 %vm552_vm7, %v1975_v20 }
 0x8ae   :  { %3404 = vmatmul.msk.f32.vlgmr.msrb.gmra.mxu0 %vm552_vm7, %v1815_v23  ;;  %2286 = vrot.lane.b32.xlu1 %v1981_v52, %s3669_s8 }
 0x8af   :  { %3406 = vmatpush.xpose.msk.msrb.mxu1 %vm552_vm7, %v2004_v50 }
 0x8b3   :  { %3407 = vmatpush.xpose.msk.msrb.mxu1 %vm552_vm7, %v2001_v6 }
 0x8b6   :  { %3408 = vmatmul.msk.f32.vlgmr.msrb.gmra.mxu1 %vm552_vm7, %v1835_v41  ;;  %3509 = vrot.lane.b32.xlu1 %v3508_v7, %s3669_s8  ;;  %v2548_v41 = vsel %vm220_vm0, %v4676_v37, 0.0 }
 0x8e0   :  { %2225 = vmax.xlane.f32.xlu1 %v2224_v35 }
 0x8f9   :  { %3524 = vrot.lane.b32.xlu1 %v3523_v5, %s3669_s8  ;;  %v4697_v5 = vmul.f32 0.35355338, %v4642_v51 }
 0x900   :  { %v2068_v54 = vpop.xlane.xlu0 %2067 }
 0x901   :  { %v4681_v46 = vmul.f32 0.35355338, %v2068_v54 }
 0x908   :  { %v2074_v55 = vpop.xlane.xlu0 %2073  ;;  %v2071_v56 = vpop.xlane.xlu1 %2070 }
 0x909   :  { %v4656_v9 = vmul.f32 0.35355338, %v2074_v55  ;;  %v4688_v20 = vmul.f32 0.35355338, %v2071_v56 }
 0x91b   :  { %v2386_v57 = vpop.permute.xlu0 %2385 }
 0x91c   :  { %3423 = vmatpush.msk.msra.mxu3 %vm766_vm8, %v2386_v57 }
 0x91e   :  { %2408 = vmatpush.msra.mxu3 %v3516_v59 }
 0x920   :  { %v2287_v61 = vpop.permute.xlu1 %2286  ;;  %2409 = vmatpush.msra.mxu3 %v3517_v60 }
 0x921   :  { %3417 = vmatpush.msk.msra.mxu0 %vm766_vm8, %v2287_v61 }
 0x928   :  { %v3510_v58 = vpop.permute.xlu1 %3509 }
 0x929   :  { %v3511_v62 = vunpack.i.l.bf16 %v3510_v58  ;;  %v3512_v63 = vunpack.i.h.bf16 %v3510_v58 }
 0x92b   :  { %v2111_v53 = vpop.f32.mrf.mxu0  ;;  %2375 = vmatpush.msra.mxu2 %v3511_v62 }
 0x92c   :  { %v2210_v12 = vmul.f32 0.35355338, %v2111_v53 }
 0x92d   :  { %2376 = vmatpush.msra.mxu2 %v3512_v63 }
 0x92e   :  { %v2214_v32 = vadd.f32 %v3660_v45, %v2210_v12 }
 0x930   :  { %v2218_v36 = vsel %vm689_vm9, %v2214_v32, -inf }
 0x931   :  { %2219 = vmax.xlane.f32.xlu2 %v2218_v36 }
 0x933   :  { %v2143_v39 = vpop.f32.mrf.mxu1 }
 0x934   :  { %v2211_v13 = vmul.f32 0.35355338, %v2143_v39 }
 0x936   :  { %v2215_v7 = vadd.f32 %v3660_v45, %v2211_v13 }
 0x938   :  { %v2221_v10 = vsel %vm689_vm9, %v2215_v7, -inf }
 0x939   :  { %2222 = vmax.xlane.f32.xlu0 %v2221_v10 }
 0x941   :  { %2228 = vmax.xlane.f32.xlu0 %v2227_v3 }
 0x949   :  { %2319 = vrot.lane.b32.xlu2 %v2007_v49, %s3669_s8 }
 0x953   :  { %v2226_v16 = vpop.xlane.xlu1 %2225 }
 0x954   :  { %v4659_v17 = vmax.f32 %v2226_v16, %v4656_v9 }
 0x955   :  { %3519 = vrot.lane.b32.xlu0 %v3518_v24, %s3669_s8 }
 0x956   :  { %v2236_v19 = vsub.f32 %v4656_v9, %v4659_v17  ;;  %v2248_v22 = vsub.f32 %v2216_v28, %v4659_v17 }
 0x958   :  { %v2254_v23 = vmul.f32 1.442695, %v2248_v22  ;;  %v2242_v13 = vmul.f32 1.442695, %v2236_v19 }
 0x95a   :  { %3604 = vpow2.f32 %v2254_v23 }
 0x960   :  { %v3605_v25 = vpop.eup %3604 }
 0x961   :  { %3422 = vmatmul.msk.f32.vlgmr.msra.gmra.mxu2 %vm762_vm10, %v3605_v25  ;;  %v2264_v43 = vsel %vm689_vm9, %v3605_v25, 0.0 }
 0x96b   :  { %v3525_v30 = vpop.permute.xlu1 %3524 }
 0x96c   :  { %v3526_v59 = vunpack.i.l.bf16 %v3525_v30  ;;  %v3527_v60 = vunpack.i.h.bf16 %v3525_v30 }
 0x972   :  { %2549 = vadd.xlane.f32.xlu2 %v2548_v41  ;;  %v142_v41 = vld [vmem:[%s5032_s10 + $0x30] sm:$0xff] }
 0x973   :  { %2508 = vmatpush.msrb.mxu2 %v142_v41  ;;  %v168_v41 = vld [vmem:[%s5033_s14 + $0xa8] sm:$0xff] }
 0x97f   :  { %2265 = vadd.xlane.f32.xlu0 %v2264_v43  ;;  %v174_v43 = vld [vmem:[%s5033_s14 + $0xd8] sm:$0xff] }
 0x980   :  { %2629 = vmatpush.msra.mxu2 %v174_v43  ;;  %v167_v43 = vld [vmem:[%s5033_s14 + $0xa0] sm:$0xff] }
 0x9a4   :  { %v2220_v47 = vpop.xlane.xlu2 %2219 }
 0x9a5   :  { %v4684_v18 = vmax.f32 %v2220_v47, %v4681_v46  ;;  %v173_v47 = vld [vmem:[%s5033_s14 + $0xd0] sm:$0xff] }
 0x9a6   :  { %2630 = vmatpush.msra.mxu2 %v173_v47  ;;  %v164_v47 = vld [vmem:[%s5033_s14 + $0x88] sm:$0xff] }
 0x9a7   :  { %v2234_v38 = vsub.f32 %v4681_v46, %v4684_v18  ;;  %v2246_v44 = vsub.f32 %v2214_v32, %v4684_v18 }
 0x9a9   :  { %v2250_v1 = vmul.f32 1.442695, %v2246_v44 }
 0x9ac   :  { %v2320_v21 = vpop.permute.xlu2 %2319  ;;  %v2223_v31 = vpop.xlane.xlu0 %2222 }
 0x9ad   :  { %v4691_v6 = vmax.f32 %v2223_v31, %v4688_v20  ;;  %3419 = vmatpush.msk.msra.mxu1 %vm766_vm8, %v2320_v21  ;;  %v172_v21 = vld [vmem:[%s5033_s14 + $0xc8] sm:$0xff] }
 0x9ae   :  { %2631 = vmatpush.msra.mxu2 %v172_v21  ;;  %v210_v21 = vld [vmem:[%s5035_s15 + $0xf8] sm:$0xff] }
 0x9af   :  { %v2235_v4 = vsub.f32 %v4688_v20, %v4691_v6  ;;  %v2247_v45 = vsub.f32 %v2215_v7, %v4691_v6 }
 0x9b1   :  { %v2252_v51 = vmul.f32 1.442695, %v2247_v45 }
 0x9b4   :  { %v2229_v50 = vpop.xlane.xlu0 %2228 }
 0x9b5   :  { %v4700_v52 = vmax.f32 %v2229_v50, %v4697_v5  ;;  %v171_v50 = vld [vmem:[%s5033_s14 + $0xc0] sm:$0xff] }
 0x9b6   :  { %2632 = vmatpush.msra.mxu2 %v171_v50  ;;  %v208_v50 = vld [vmem:[%s5035_s15 + $0xe8] sm:$0xff] }
 0x9b7   :  { %v2237_v24 = vsub.f32 %v4697_v5, %v4700_v52  ;;  %v2249_v49 = vsub.f32 %v2217_v2, %v4700_v52  ;;  %v2238_v5 = vmul.f32 1.442695, %v2234_v38 }
 0x9b9   :  { %v2256_v42 = vmul.f32 1.442695, %v2249_v49  ;;  %v2244_v34 = vmul.f32 1.442695, %v2237_v24 }
 0x9bb   :  { %3606 = vpow2.f32 %v2256_v42 }
 0x9bc   :  { %3608 = vpow2.f32 %v2250_v1 }
 0x9bd   :  { %3610 = vpow2.f32 %v2252_v51 }
 0x9be   :  { %3612 = vpow2.f32 %v2242_v13  ;;  %v143_v13 = vld [vmem:[%s5032_s10 + $0x38] sm:$0xff] }
 0x9bf   :  { %2533 = vmatpush.msrb.mxu3 %v143_v13 }
 0x9c1   :  { %v3607_v28 = vpop.eup %3606 }
 0x9c2   :  { %3424 = vmatmul.msk.f32.vlgmr.msra.gmra.mxu3 %vm762_vm10, %v3607_v28  ;;  %v2267_v35 = vsel %vm689_vm9, %v3607_v28, 0.0  ;;  %v3609_v55 = vpop.eup %3608 }
 0x9c3   :  { %2268 = vadd.xlane.f32.xlu1 %v2267_v35  ;;  %v2258_v61 = vsel %vm689_vm9, %v3609_v55, 0.0  ;;  %v3611_v58 = vpop.eup %3610 }
 0x9c4   :  { %v2261_v62 = vsel %vm689_vm9, %v3611_v58, 0.0  ;;  %v3613_v0 = vpop.eup %3612 }
 0x9c5   :  { %v2280_v22 = vmul.f32 %v3613_v0, %v4538_v11 }
 0x9c7   :  { %v3520_v54 = vpop.permute.xlu0 %3519 }
 0x9c8   :  { %v3522_v56 = vunpack.i.h.bf16 %v3520_v54  ;;  %v3521_v57 = vunpack.i.l.bf16 %v3520_v54 }
 0x9ca   :  { %2309 = vmatpush.msra.mxu0 %v3521_v57  ;;  %2342 = vmatpush.msra.mxu1 %v3522_v56 }
 0x9cb   :  { %2259 = vadd.xlane.f32.xlu1 %v2258_v61 }
 0x9cc   :  { %2310 = vmatpush.msra.mxu0 %v3526_v59  ;;  %2343 = vmatpush.msra.mxu1 %v3527_v60 }
 0x9cd   :  { %3418 = vmatmul.msk.f32.vlgmr.msra.gmra.mxu0 %vm762_vm10, %v3609_v55  ;;  %3420 = vmatmul.msk.f32.vlgmr.msra.gmra.mxu1 %vm762_vm10, %v3611_v58 }
 0x9d3   :  { %2262 = vadd.xlane.f32.xlu1 %v2261_v62 }
 0x9e4   :  { %v2378_v63 = vpop.f32.mrf.mxu2 }
 0x9e5   :  { %2422 = vrot.lane.b32.xlu2 %v2378_v63, %s5058_s20  ;;  %v2550_v53 = vpop.xlane.xlu2 %2549 }
 0x9e6   :  { %v2551_v12 = vmul.f32 %v2550_v53, %v3775_v8 }
 0x9e8   :  { %v4716_v32 = vsub.f32 %v4676_v37, %v2551_v12  ;;  %v206_v12 = vld [vmem:[%s5035_s15 + $0xd8] sm:$0xff] }
 0x9ea   :  { %v2553_v36 = vmul.f32 %v4716_v32, %v4716_v32 }
 0x9ec   :  { %v2554_v39 = vsel %vm220_vm0, %v2553_v36, 0.0 }
 0x9f2   :  { %v2266_v7 = vpop.xlane.xlu0 %2265 }
 0x9f3   :  { %v2272_v10 = vadd.f32 %v3613_v0, %v2266_v7  ;;  %v204_v0 = vld [vmem:[%s5035_s15 + $0xc8] sm:$0xff] }
 0x9f5   :  { %3614 = vrcp.f32 %v2272_v10  ;;  %v203_v10 = vld [vmem:[%s5035_s15 + $0xc0] sm:$0xff] }
 0x9fb   :  { %v3615_v9 = vpop.eup %3614 }
 0xa0e   :  { %2555 = vadd.xlane.f32.xlu2 %v2554_v39  ;;  %v205_v39 = vld [vmem:[%s5035_s15 + $0xd0] sm:$0xff] }
 0xa36   :  { %v2269_v25 = vpop.xlane.xlu1 %2268 }
 0xa3e   :  { %v2260_v11 = vpop.xlane.xlu1 %2259 }
 0xa3f   :  { %v2423_v3 = vpop.permute.xlu2 %2422 }
 0xa40   :  { %v2432_v23 = vadd.f32 %v2423_v3, %v2280_v22  ;;  %v4789_v3 = vld [vmem:[%s5037_s2] sm:$0xff]  ;;  %v178_v22 = vld [vmem:[%s5033_s14 + $0xf8] sm:$0xff] }
 0xa41   :  { %2649 = vmatpush.msra.mxu3 %v178_v22 }
 0xa42   :  { %v2436_v17 = vmul.f32 %v3615_v9, %v2432_v23  ;;  %v177_v23 = vld [vmem:[%s5033_s14 + $0xf0] sm:$0xff]  ;;  %v141_v9 = vld [vmem:[%s5032_s10 + $0x28] sm:$0xff] }
 0xa43   :  { %2483 = vmatpush.msrb.mxu1 %v141_v9  ;;  %2650 = vmatpush.msra.mxu3 %v177_v23 }
 0xa45   :  { %v2411_v14 = vpop.f32.mrf.mxu3 }
 0xa46   :  { %2424 = vrot.lane.b32.xlu0 %v2411_v14, %s5058_s20 }
 0xa4a   :  { %v2345_v2 = vpop.f32.mrf.mxu1  ;;  %v2312_v16 = vpop.f32.mrf.mxu0 }
 0xa4b   :  { %2420 = vrot.lane.b32.xlu1 %v2345_v2, %s5058_s20 }
 0xa4e   :  { %2418 = vrot.lane.b32.xlu0 %v2312_v16, %s5058_s20  ;;  %v4796_v16 = vld [vmem:[%s5037_s2 + $0x8] sm:$0xff] }
 0xa56   :  { %2489 = vrot.lane.b32.xlu0 %v2436_v17, %s3669_s8  ;;  %v176_v17 = vld [vmem:[%s5033_s14 + $0xe8] sm:$0xff] }
 0xa57   :  { %2651 = vmatpush.msra.mxu3 %v176_v17 }
 0xa81   :  { %v2556_v19 = vpop.xlane.xlu2 %2555 }
 0xa82   :  { %v2557_v27 = vmul.f32 %v2556_v19, %v3775_v8  ;;  %v2240_v8 = vmul.f32 1.442695, %v2235_v4  ;;  %v2263_v4 = vpop.xlane.xlu1 %2262  ;;  %v170_v19 = vld [vmem:[%s5033_s14 + $0xb8] sm:$0xff] }
 0xa83   :  { %2609 = vmatpush.msra.mxu1 %v170_v19 }
 0xa84   :  { %v2558_v33 = vadd.f32 1e-05, %v2557_v27  ;;  %v175_v27 = vld [vmem:[%s5033_s14 + $0xe0] sm:$0xff] }
 0xa85   :  { %2652 = vmatpush.msra.mxu3 %v175_v27 }
 0xa86   :  { %3616 = vrsqrt.f32 %v2558_v33  ;;  %vm2565_vm8 = vweird.f32 %v2558_v33 }
 0xa87   :  { %3618 = vpow2.f32 %v2244_v34  ;;  %v166_v34 = vld [vmem:[%s5033_s14 + $0x98] sm:$0xff] }
 0xa88   :  { %3620 = vpow2.f32 %v2240_v8  ;;  %v163_v8 = vld [vmem:[%s5033_s14 + $0x80] sm:$0xff] }
 0xa89   :  { %3622 = vpow2.f32 %v2238_v5  ;;  %v209_v5 = vld [vmem:[%s5035_s15 + $0xf0] sm:$0xff] }
 0xa8c   :  { %v3617_v31 = vpop.eup %3616 }
 0xa8d   :  { %v3619_v52 = vpop.eup %3618  ;;  %v2560_v6 = vmul.f32 %v3617_v31, %v2558_v33  ;;  %vm2566_vm4 = vweird.f32 %v3617_v31  ;;  %v169_v33 = vld [vmem:[%s5033_s14 + $0xb0] sm:$0xff] }
 0xa8e   :  { %v2273_v20 = vadd.f32 %v3619_v52, %v2269_v25  ;;  %v3621_v24 = vpop.eup %3620  ;;  %v2281_v46 = vmul.f32 %v3619_v52, %v4496_v26  ;;  %vm2567_vm9 = vmor %vm2565_vm8, %vm2566_vm4  ;;  %v140_v25 = vld [vmem:[%s5032_s10 + $0x20] sm:$0xff]  ;;  %2610 = vmatpush.msra.mxu1 %v169_v33  ;;  %v202_v52 = vld [vmem:[%s5035_s15 + $0xb8] sm:$0xff] }
 0xa8f   :  { %v2561_v49 = vmul.f32 %v3617_v31, %v2560_v6  ;;  %v2271_v42 = vadd.f32 %v3621_v24, %v2263_v4  ;;  %v3623_v44 = vpop.eup %3622  ;;  %v2279_v30 = vmul.f32 %v3621_v24, %v4618_v48  ;;  %v3662_v48 = vld [vmem:[%s5034_s12] sm:$0x3]  ;;  %2458 = vmatpush.msrb.mxu0 %v140_v25  ;;  %v201_v4 = vld [vmem:[%s5035_s15 + $0xb0] sm:$0xff]  ;;  %v198_v24 = vld [vmem:[%s5035_s15 + $0x98] sm:$0xff] }
 0xa90   :  { %3624 = vrcp.f32 %v2273_v20  ;;  %v2270_v18 = vadd.f32 %v3623_v44, %v2260_v11  ;;  %v2278_v57 = vmul.f32 %v3623_v44, %v4612_v40  ;;  %v2570_v53 = vperm.slane %v3662_v48, 1  ;;  %v165_v11 = vld [vmem:[%s5033_s14 + $0x90] sm:$0xff]  ;;  %2611 = vmatpush.msra.mxu1 %v168_v41  ;;  %v207_v6 = vld [vmem:[%s5035_s15 + $0xe0] sm:$0xff] }
 0xa91   :  { %v2562_v38 = vmul.f32 0.5, %v2561_v49  ;;  %3626 = vrcp.f32 %v2271_v42  ;;  %2589 = vmatpush.msra.mxu0 %v166_v34  ;;  %v200_v42 = vld [vmem:[%s5035_s15 + $0xa8] sm:$0xff]  ;;  %v197_v44 = vld [vmem:[%s5035_s15 + $0x90] sm:$0xff]  ;;  %v3666_v48 = vld [vmem:[%s5039_s11] sm:$0x3] }
 0xa92   :  { %3628 = vrcp.f32 %v2270_v18  ;;  %2612 = vmatpush.msra.mxu1 %v167_v43  ;;  %v199_v18 = vld [vmem:[%s5035_s15 + $0xa0] sm:$0xff] }
 0xa93   :  { %v2563_v35 = vsub.f32 1.5, %v2562_v38  ;;  %2590 = vmatpush.msra.mxu0 %v165_v11  ;;  %v195_v38 = vld [vmem:[%s5035_s15 + $0x80] sm:$0xff] }
 0xa95   :  { %v2564_v59 = vmul.f32 %v3617_v31, %v2563_v35  ;;  %2591 = vmatpush.msra.mxu0 %v164_v47 }
 0xa96   :  { %v3625_v28 = vpop.eup %3624 }
 0xa97   :  { %v3627_v56 = vpop.eup %3626  ;;  %v2568_v63 = vsel %vm2567_vm9, %v3617_v31, %v2564_v59  ;;  %2592 = vmatpush.msra.mxu0 %v163_v8 }
 0xa98   :  { %v3629_v58 = vpop.eup %3628  ;;  %v2569_v40 = vmul.f32 %v2568_v63, %v4716_v32  ;;  %v3663_v32 = vld [vmem:[%s5036_s13] sm:$0x3] }
 0xa99   :  { %v2572_v14 = vperm.slane %v3663_v32, 1 }
 0xa9a   :  { %v2571_v7 = vmul.f32 %v2570_v53, %v2569_v40  ;;  %v2546_v53 = vperm.slane %v3666_v48, 1 }
 0xa9c   :  { %v4780_v2 = vadd.f32 %v2572_v14, %v2571_v7 }
 0xab8   :  { %v2425_v1 = vpop.permute.xlu0 %2424 }
 0xab9   :  { %v2433_v45 = vadd.f32 %v2425_v1, %v2281_v46  ;;  %v196_v46 = vld [vmem:[%s5035_s15 + $0x88] sm:$0xff] }
 0xabb   :  { %v2437_v51 = vmul.f32 %v3625_v28, %v2433_v45 }
 0xabd   :  { %v2421_v54 = vpop.permute.xlu1 %2420  ;;  %2514 = vrot.lane.b32.xlu0 %v2437_v51, %s3669_s8 }
 0xabe   :  { %v2431_v55 = vadd.f32 %v2421_v54, %v2279_v30 }
 0xac0   :  { %v2435_v26 = vmul.f32 %v3627_v56, %v2431_v55  ;;  %v2419_v60 = vpop.permute.xlu0 %2418 }
 0xac1   :  { %v2430_v61 = vadd.f32 %v2419_v60, %v2278_v57 }
 0xac2   :  { %2464 = vrot.lane.b32.xlu1 %v2435_v26, %s3669_s8 }
 0xac3   :  { %v2434_v62 = vmul.f32 %v3629_v58, %v2430_v61 }
 0xac5   :  { %2439 = vrot.lane.b32.xlu0 %v2434_v62, %s3669_s8 }
 0xac8   :  { %v2490_v36 = vpop.permute.xlu0 %2489 }
 0xac9   :  { %3427 = vmatmul.msk.f32.vlgmr.msrb.gmra.mxu2 %vm552_vm7, %v2490_v36 }
 0xaca   :  { %2709 = vmatpush.msrb.mxu2 %v206_v12 }
 0xacc   :  { %2710 = vmatpush.msrb.mxu2 %v205_v39 }
 0xace   :  { %2711 = vmatpush.msrb.mxu2 %v204_v0 }
 0xad0   :  { %2712 = vmatpush.msrb.mxu2 %v203_v10 }
 0xad1   :  { %3431 = vmatmul.msk.f32.vlgmr.msra.gmra.mxu2 %vm254_vm5, %v4780_v2 }
 0xad2   :  { %2795 = vmatpush.msra.mxu2 %v206_v12 }
 0xad4   :  { %2796 = vmatpush.msra.mxu2 %v205_v39 }
 0xad6   :  { %2797 = vmatpush.msra.mxu2 %v204_v0 }
 0xad8   :  { %2798 = vmatpush.msra.mxu2 %v203_v10 }
 0xad9   :  { %3435 = vmatmul.msk.f32.vlgmr.msrb.gmra.mxu2 %vm254_vm5, %v4780_v2 }
 0xae1   :  { %3441 = vmatmul.msk.f32.vlgmr.msra.gmra.mxu2 %vm254_vm5, %v4789_v3 }
 0xae9   :  { %3442 = vmatmul.msk.f32.gmra.mxu2 %vm254_vm5, %v4796_v16 }
 0xb2f   :  { %v2515_v31 = vpop.permute.xlu0 %2514 }
 0xb30   :  { %3428 = vmatmul.msk.f32.vlgmr.msrb.gmra.mxu3 %vm552_vm7, %v2515_v31 }
 0xb31   :  { %2729 = vmatpush.msrb.mxu3 %v210_v21 }
 0xb33   :  { %2730 = vmatpush.msrb.mxu3 %v209_v5 }
 0xb34   :  { %v2465_v20 = vpop.permute.xlu1 %2464 }
 0xb35   :  { %3426 = vmatmul.msk.f32.vlgmr.msrb.gmra.mxu1 %vm552_vm7, %v2465_v20  ;;  %2731 = vmatpush.msrb.mxu3 %v208_v50 }
 0xb36   :  { %2689 = vmatpush.msrb.mxu1 %v202_v52 }
 0xb37   :  { %v2440_v49 = vpop.permute.xlu0 %2439  ;;  %2732 = vmatpush.msrb.mxu3 %v207_v6 }
 0xb38   :  { %3425 = vmatmul.msk.f32.vlgmr.msrb.gmra.mxu0 %vm552_vm7, %v2440_v49  ;;  %3432 = vmatmul.msk.f32.vlgmr.msra.gmra.mxu3 %vm254_vm5, %v4780_v2 }
 0xb39   :  { %2690 = vmatpush.msrb.mxu1 %v201_v4  ;;  %2669 = vmatpush.msrb.mxu0 %v198_v24 }
 0xb3a   :  { %2818 = vmatpush.msra.mxu3 %v210_v21 }
 0xb3b   :  { %2691 = vmatpush.msrb.mxu1 %v200_v42  ;;  %2670 = vmatpush.msrb.mxu0 %v197_v44 }
 0xb3c   :  { %2819 = vmatpush.msra.mxu3 %v209_v5 }
 0xb3d   :  { %3430 = vmatmul.msk.f32.vlgmr.msra.gmra.mxu1 %vm254_vm5, %v4780_v2  ;;  %2671 = vmatpush.msrb.mxu0 %v196_v46 }
 0xb3e   :  { %2692 = vmatpush.msrb.mxu1 %v199_v18  ;;  %2820 = vmatpush.msra.mxu3 %v208_v50 }
 0xb3f   :  { %2672 = vmatpush.msrb.mxu0 %v195_v38 }
 0xb40   :  { %2772 = vmatpush.msra.mxu1 %v202_v52  ;;  %3429 = vmatmul.msk.f32.vlgmr.msra.gmra.mxu0 %vm254_vm5, %v4780_v2 }
 0xb41   :  { %3436 = vmatmul.msk.f32.vlgmr.msrb.gmra.mxu3 %vm254_vm5, %v4780_v2  ;;  %2749 = vmatpush.msra.mxu0 %v198_v24 }
 0xb42   :  { %2821 = vmatpush.msra.mxu3 %v207_v6  ;;  %2773 = vmatpush.msra.mxu1 %v201_v4  ;;  %v3667_v4 = vld [vmem:[%s5038_s4] sm:$0x3] }
 0xb43   :  { %2750 = vmatpush.msra.mxu0 %v197_v44 }
 0xb44   :  { %2774 = vmatpush.msra.mxu1 %v200_v42 }
 0xb45   :  { %3434 = vmatmul.msk.f32.vlgmr.msrb.gmra.mxu1 %vm254_vm5, %v4780_v2  ;;  %2751 = vmatpush.msra.mxu0 %v196_v46 }
 0xb46   :  { %2775 = vmatpush.msra.mxu1 %v199_v18 }
 0xb47   :  { %2752 = vmatpush.msra.mxu0 %v195_v38 }
 0xb48   :  { %3433 = vmatmul.msk.f32.vlgmr.msrb.gmra.mxu0 %vm254_vm5, %v4780_v2 }
 0xb49   :  { %3443 = vmatmul.msk.f32.vlgmr.msra.gmra.mxu3 %vm254_vm5, %v4789_v3 }
 0xb4c   :  { %v2510_v1 = vpop.f32.mrf.mxu2 }
 0xb4d   :  { %3439 = vmatmul.msk.f32.vlgmr.msra.gmra.mxu1 %vm254_vm5, %v4789_v3  ;;  %v2541_v61 = vsel %vm220_vm0, %v2510_v1, 0.0 }
 0xb50   :  { %3437 = vmatmul.msk.f32.vlgmr.msra.gmra.mxu0 %vm254_vm5, %v4789_v3 }
 0xb51   :  { %3444 = vmatmul.msk.f32.gmra.mxu3 %vm254_vm5, %v4796_v16 }
 0xb54   :  { %v2634_v45 = vpop.f32.mrf.mxu2 }
 0xb55   :  { %3440 = vmatmul.msk.f32.gmra.mxu1 %vm254_vm5, %v4796_v16 }
 0xb58   :  { %3438 = vmatmul.msk.f32.gmra.mxu0 %vm254_vm5, %v4796_v16 }
 0xb5c   :  { %v4905_v28 = vpop.f32.mrf.mxu2 }
 0xb5d   :  { %v2831_v51 = vmul.f32 %v4905_v28, %v2634_v45 }
 0xb5f   :  { %v2839_v35 = vsel %vm535_vm6, %v2831_v51, 0.0 }
 0xb60   :  { %2840 = vadd.xlane.f32.xlu0 %v2839_v35 }
 0xb64   :  { %v2800_v30 = vpop.f32.mrf.mxu2 }
 0xb6c   :  { %v2803_v54 = vpop.f32.mrf.mxu2 }
 0xb6d   :  { %3451 = vmatpush.xpose.msk.msrb.mxu2 %vm552_vm7, %v2803_v54  ;;  %v3528_v34 = vpack.i.bf16 %v2800_v30, %v2803_v54 }
 0xb71   :  { %3452 = vmatpush.xpose.msk.msrb.mxu2 %vm552_vm7, %v2800_v30 }
 0xb74   :  { %3453 = vmatmul.msk.f32.vlgmr.msrb.gmra.mxu2 %vm552_vm7, %v2634_v45 }
 0xbb2   :  { %v2485_v55 = vpop.f32.mrf.mxu1 }
 0xbb3   :  { %v2535_v56 = vpop.f32.mrf.mxu3  ;;  %v2539_v59 = vsel %vm220_vm0, %v2485_v55, 0.0 }
 0xbb4   :  { %v2543_v62 = vsel %vm220_vm0, %v2535_v56, 0.0 }
 0xbb5   :  { %v2460_v57 = vpop.f32.mrf.mxu0 }
 0xbb6   :  { %v2538_v26 = vsel %vm220_vm0, %v2460_v57, 0.0 }
 0xbb7   :  { %v2540_v60 = vadd.f32 %v2539_v59, %v2538_v26 }
 0xbb9   :  { %v2542_v58 = vadd.f32 %v2541_v61, %v2540_v60 }
 0xbba   :  { %v2614_v63 = vpop.f32.mrf.mxu1 }
 0xbbb   :  { %v2544_v40 = vadd.f32 %v2543_v62, %v2542_v58  ;;  %v2654_v12 = vpop.f32.mrf.mxu3 }
 0xbbd   :  { %v2545_v36 = vadd.f32 %v2544_v40, %v4300_v15  ;;  %v2594_v39 = vpop.f32.mrf.mxu0 }
 0xbbf   :  { %v2547_v13 = vadd.f32 %v2546_v53, %v2545_v36 }
 0xbc1   :  { %3287 = vst.msk [vmem:[%s5042_s18] sm:$0x3] %vm220_vm0, %v2547_v13 }
 0xbc2   :  { %v4924_v32 = vpop.f32.mrf.mxu1 }
 0xbc3   :  { %v2830_v22 = vmul.f32 %v4924_v32, %v2614_v63 }
 0xbc4   :  { %v4926_v14 = vpop.f32.mrf.mxu3 }
 0xbc5   :  { %v2832_v7 = vmul.f32 %v4926_v14, %v2654_v12  ;;  %v4929_v0 = vpop.f32.mrf.mxu0  ;;  %v2836_v17 = vsel %vm535_vm6, %v2830_v22, 0.0 }
 0xbc6   :  { %v2829_v10 = vmul.f32 %v4929_v0, %v2594_v39 }
 0xbc7   :  { %v2842_v2 = vsel %vm535_vm6, %v2832_v7, 0.0 }
 0xbc8   :  { %2843 = vadd.xlane.f32.xlu1 %v2842_v2  ;;  %v2833_v15 = vsel %vm535_vm6, %v2829_v10, 0.0 }
 0xbc9   :  { %2834 = vadd.xlane.f32.xlu2 %v2833_v15 }
 0xbca   :  { %v2777_v3 = vpop.f32.mrf.mxu1 }
 0xbcc   :  { %v2823_v16 = vpop.f32.mrf.mxu3 }
 0xbcd   :  { %v2754_v23 = vpop.f32.mrf.mxu0 }
 0xbce   :  { %v3543_v9 = vpack.i.bf16 %v2777_v3, %v2754_v23 }
 0xbd1   :  { %2837 = vadd.xlane.f32.xlu2 %v2836_v17 }
 0xbd2   :  { %v2780_v19 = vpop.f32.mrf.mxu1 }
 0xbd3   :  { %3448 = vmatpush.xpose.msk.msrb.mxu1 %vm552_vm7, %v2780_v19  ;;  %v2841_v41 = vpop.xlane.xlu0 %2840 }
 0xbd4   :  { %v2826_v25 = vpop.f32.mrf.mxu3 }
 0xbd5   :  { %v3533_v27 = vpack.i.bf16 %v2823_v16, %v2826_v25  ;;  %3454 = vmatpush.xpose.msk.msrb.mxu3 %vm552_vm7, %v2826_v25  ;;  %v2757_v33 = vpop.f32.mrf.mxu0 }
 0xbd6   :  { %3445 = vmatpush.xpose.msk.msrb.mxu0 %vm552_vm7, %v2757_v33  ;;  %v3538_v54 = vpack.i.bf16 %v2780_v19, %v2757_v33 }
 0xbd7   :  { %3534 = vrot.lane.b32.xlu0 %v3533_v27, %s3669_s8  ;;  %3449 = vmatpush.xpose.msk.msrb.mxu1 %vm552_vm7, %v2777_v3 }
 0xbd9   :  { %3455 = vmatpush.xpose.msk.msrb.mxu3 %vm552_vm7, %v2823_v16 }
 0xbda   :  { %3446 = vmatpush.xpose.msk.msrb.mxu0 %vm552_vm7, %v2754_v23  ;;  %3450 = vmatmul.msk.f32.vlgmr.msrb.gmra.mxu1 %vm552_vm7, %v2614_v63 }
 0xbdc   :  { %3456 = vmatmul.msk.f32.vlgmr.msrb.gmra.mxu3 %vm552_vm7, %v2654_v12  ;;  %v2847_v12 = vmul.f32 0.35355338, %v2841_v41 }
 0xbdd   :  { %3447 = vmatmul.msk.f32.vlgmr.msrb.gmra.mxu0 %vm552_vm7, %v2594_v39 }
 0xbe1   :  { %3529 = vrot.lane.b32.xlu1 %v3528_v34, %s3669_s8 }
 0xbf7   :  { %v2933_v20 = vpop.f32.mrf.mxu2 }
 0xbf8   :  { %v2967_v42 = vmul.f32 0.35355338, %v2933_v20 }
 0xbfa   :  { %v2971_v38 = vadd.f32 %v3667_v4, %v2967_v42 }
 0xbfc   :  { %v2979_v51 = vsel %vm1453_vm14, %v2971_v38, -inf }
 0xc3b   :  { %v2844_v8 = vpop.xlane.xlu1 %2843 }
 0xc3c   :  { %v2835_v55 = vpop.xlane.xlu2 %2834  ;;  %v2848_v3 = vmul.f32 0.35355338, %v2844_v8 }
 0xc3d   :  { %v4961_v60 = vmul.f32 0.35355338, %v2835_v55 }
 0xc44   :  { %v2838_v56 = vpop.xlane.xlu2 %2837 }
 0xc45   :  { %v4956_v57 = vmul.f32 0.35355338, %v2838_v56 }
 0xc49   :  { %v3535_v11 = vpop.permute.xlu0 %3534 }
 0xc4a   :  { %v3537_v43 = vunpack.i.h.bf16 %v3535_v11  ;;  %v3536_v47 = vunpack.i.l.bf16 %v3535_v11 }
 0xc4c   :  { %3147 = vmatpush.msra.mxu3 %v3536_v47 }
 0xc4e   :  { %3148 = vmatpush.msra.mxu3 %v3537_v43 }
 0xc53   :  { %v3530_v21 = vpop.permute.xlu1 %3529 }
 0xc54   :  { %v3531_v31 = vunpack.i.l.bf16 %v3530_v21  ;;  %v3532_v5 = vunpack.i.h.bf16 %v3530_v21 }
 0xc56   :  { %3118 = vmatpush.msra.mxu2 %v3531_v31 }
 0xc57   :  { %v2904_v50 = vpop.f32.mrf.mxu1 }
 0xc58   :  { %3119 = vmatpush.msra.mxu2 %v3532_v5  ;;  %v2966_v52 = vmul.f32 0.35355338, %v2904_v50 }
 0xc5a   :  { %v2875_v6 = vpop.f32.mrf.mxu0  ;;  %v2970_v24 = vadd.f32 %v3667_v4, %v2966_v52 }
 0xc5b   :  { %v2965_v49 = vmul.f32 0.35355338, %v2875_v6 }
 0xc5c   :  { %v2976_v44 = vsel %vm1453_vm14, %v2970_v24, -inf }
 0xc5d   :  { %2977 = vmax.xlane.f32.xlu2 %v2976_v44  ;;  %v2969_v46 = vadd.f32 %v3667_v4, %v2965_v49 }
 0xc5f   :  { %v2973_v18 = vsel %vm1453_vm14, %v2969_v46, -inf  ;;  %v2962_v1 = vpop.f32.mrf.mxu3 }
 0xc60   :  { %2974 = vmax.xlane.f32.xlu0 %v2973_v18  ;;  %v2968_v45 = vmul.f32 0.35355338, %v2962_v1 }
 0xc62   :  { %v2972_v35 = vadd.f32 %v3667_v4, %v2968_v45 }
 0xc64   :  { %v2982_v30 = vsel %vm1453_vm14, %v2972_v35, -inf }
 0xc65   :  { %2980 = vmax.xlane.f32.xlu2 %v2979_v51 }
 0xc6d   :  { %2983 = vmax.xlane.f32.xlu2 %v2982_v30 }
 0xc74   :  { %3544 = vrot.lane.b32.xlu0 %v3543_v9, %s3669_s8 }
 0xc85   :  { %3539 = vrot.lane.b32.xlu2 %v3538_v54, %s3669_s8  ;;  %v217_v54 = vld [vmem:[%s5040_s16 + $0x30] sm:$0xff] }
 0xc86   :  { %3247 = vmatpush.msrb.mxu2 %v217_v54 }
 0xcd0   :  { %v2978_v59 = vpop.xlane.xlu2 %2977 }
 0xcd1   :  { %v4959_v26 = vmax.f32 %v2978_v59, %v4956_v57 }
 0xcd3   :  { %v2990_v61 = vsub.f32 %v4956_v57, %v4959_v26  ;;  %v3002_v58 = vsub.f32 %v2970_v24, %v4959_v26  ;;  %v2975_v62 = vpop.xlane.xlu0 %2974 }
 0xcd4   :  { %v4967_v63 = vmax.f32 %v2975_v62, %v4961_v60 }
 0xcd5   :  { %v3007_v48 = vmul.f32 1.442695, %v3002_v58  ;;  %v2995_v59 = vmul.f32 1.442695, %v2990_v61 }
 0xcd6   :  { %v2989_v53 = vsub.f32 %v4961_v60, %v4967_v63  ;;  %v3001_v40 = vsub.f32 %v2969_v46, %v4967_v63 }
 0xcd7   :  { %3630 = vpow2.f32 %v3007_v48 }
 0xcd8   :  { %v3005_v36 = vmul.f32 1.442695, %v3001_v40  ;;  %v2981_v39 = vpop.xlane.xlu2 %2980 }
 0xcd9   :  { %v2987_v13 = vmax.f32 %v2981_v39, %v2847_v12 }
 0xcda   :  { %3632 = vpow2.f32 %v3005_v36 }
 0xcdb   :  { %v2991_v7 = vsub.f32 %v2847_v12, %v2987_v13  ;;  %v3003_v10 = vsub.f32 %v2971_v38, %v2987_v13 }
 0xcdd   :  { %v3009_v2 = vmul.f32 1.442695, %v3003_v10  ;;  %v3631_v15 = vpop.eup %3630  ;;  %v2997_v24 = vmul.f32 1.442695, %v2991_v7 }
 0xcde   :  { %v3016_v16 = vsel %vm1453_vm14, %v3631_v15, 0.0 }
 0xcdf   :  { %3634 = vpow2.f32 %v3009_v2  ;;  %3017 = vadd.xlane.f32.xlu1 %v3016_v16  ;;  %v215_v16 = vld [vmem:[%s5040_s16 + $0x20] sm:$0xff] }
 0xce0   :  { %v2984_v22 = vpop.xlane.xlu2 %2983  ;;  %v3633_v23 = vpop.eup %3632 }
 0xce1   :  { %v2988_v9 = vmax.f32 %v2984_v22, %v2848_v3  ;;  %v3013_v17 = vsel %vm1453_vm14, %v3633_v23, 0.0 }
 0xce2   :  { %3014 = vadd.xlane.f32.xlu0 %v3013_v17 }
 0xce3   :  { %v2992_v19 = vsub.f32 %v2848_v3, %v2988_v9  ;;  %v3004_v25 = vsub.f32 %v2972_v35, %v2988_v9  ;;  %v2993_v35 = vmul.f32 1.442695, %v2989_v53 }
 0xce5   :  { %v3011_v27 = vmul.f32 1.442695, %v3004_v25  ;;  %v3635_v33 = vpop.eup %3634  ;;  %v2999_v30 = vmul.f32 1.442695, %v2992_v19 }
 0xce6   :  { %3459 = vmatmul.msk.f32.vlgmr.msra.gmra.mxu2 %vm1524_vm15, %v3635_v33  ;;  %v3019_v34 = vsel %vm1453_vm14, %v3635_v33, 0.0  ;;  %v3545_v41 = vpop.permute.xlu0 %3544 }
 0xce7   :  { %3636 = vpow2.f32 %v3011_v27  ;;  %3020 = vadd.xlane.f32.xlu1 %v3019_v34  ;;  %v3547_v8 = vunpack.i.h.bf16 %v3545_v41  ;;  %v3546_v21 = vunpack.i.l.bf16 %v3545_v41 }
 0xce8   :  { %v3540_v11 = vpop.permute.xlu2 %3539  ;;  %3638 = vpow2.f32 %v2997_v24 }
 0xce9   :  { %v3542_v43 = vunpack.i.h.bf16 %v3540_v11  ;;  %v3541_v47 = vunpack.i.l.bf16 %v3540_v11 }
 0xceb   :  { %3060 = vmatpush.msra.mxu0 %v3541_v47  ;;  %3089 = vmatpush.msra.mxu1 %v3542_v43 }
 0xced   :  { %3061 = vmatpush.msra.mxu0 %v3546_v21  ;;  %3090 = vmatpush.msra.mxu1 %v3547_v8  ;;  %v3637_v31 = vpop.eup %3636  ;;  %v3285_v21 = vperm.slane %v4669_v29, 1 }
 0xcee   :  { %3457 = vmatmul.msk.f32.vlgmr.msra.gmra.mxu0 %vm1524_vm15, %v3633_v23  ;;  %3458 = vmatmul.msk.f32.vlgmr.msra.gmra.mxu1 %vm1524_vm15, %v3631_v15  ;;  %v3022_v5 = vsel %vm1453_vm14, %v3637_v31, 0.0  ;;  %v3639_v42 = vpop.eup %3638 }
 0xcef   :  { %3460 = vmatmul.msk.f32.vlgmr.msra.gmra.mxu3 %vm1524_vm15, %v3637_v31  ;;  %3023 = vadd.xlane.f32.xlu2 %v3022_v5  ;;  %v3035_v18 = vmul.f32 %v3639_v42, %v4905_v28 }
 0xcf0   :  { %3197 = vmatpush.msrb.mxu0 %v215_v16 }
 0xd52   :  { %v3018_v4 = vpop.xlane.xlu1 %3017 }
 0xd55   :  { %v3015_v55 = vpop.xlane.xlu0 %3014 }
 0xd5a   :  { %v3021_v49 = vpop.xlane.xlu1 %3020 }
 0xd5b   :  { %v3027_v44 = vadd.f32 %v3639_v42, %v3021_v49 }
 0xd5d   :  { %3640 = vrcp.f32 %v3027_v44 }
 0xd5e   :  { %3642 = vpow2.f32 %v2993_v35 }
 0xd5f   :  { %3644 = vpow2.f32 %v2999_v30 }
 0xd62   :  { %v3024_v46 = vpop.xlane.xlu2 %3023 }
 0xd63   :  { %v3641_v45 = vpop.eup %3640 }
 0xd64   :  { %v3643_v56 = vpop.eup %3642 }
 0xd65   :  { %v3025_v28 = vadd.f32 %v3643_v56, %v3015_v55  ;;  %v3645_v58 = vpop.eup %3644  ;;  %v3033_v60 = vmul.f32 %v3643_v56, %v4929_v0 }
 0xd66   :  { %v3028_v62 = vadd.f32 %v3645_v58, %v3024_v46  ;;  %v3036_v36 = vmul.f32 %v3645_v58, %v4926_v14  ;;  %v216_v14 = vld [vmem:[%s5040_s16 + $0x28] sm:$0xff] }
 0xd67   :  { %3646 = vrcp.f32 %v3025_v28  ;;  %3222 = vmatpush.msrb.mxu1 %v216_v14 }
 0xd68   :  { %3648 = vpow2.f32 %v2995_v59 }
 0xd69   :  { %v3121_v50 = vpop.f32.mrf.mxu2  ;;  %3650 = vrcp.f32 %v3028_v62 }
 0xd6a   :  { %3161 = vrot.lane.b32.xlu2 %v3121_v50, %s5058_s20 }
 0xd6b   :  { %v3063_v52 = vpop.f32.mrf.mxu0  ;;  %v3092_v6 = vpop.f32.mrf.mxu1 }
 0xd6c   :  { %3157 = vrot.lane.b32.xlu1 %v3063_v52, %s5058_s20 }
 0xd6d   :  { %v3647_v53 = vpop.eup %3646 }
 0xd6e   :  { %v3649_v12 = vpop.eup %3648 }
 0xd6f   :  { %v3026_v39 = vadd.f32 %v3649_v12, %v3018_v4  ;;  %v3651_v26 = vpop.eup %3650  ;;  %v3034_v0 = vmul.f32 %v3649_v12, %v4924_v32  ;;  %v218_v32 = vld [vmem:[%s5040_s16 + $0x38] sm:$0xff] }
 0xd70   :  { %3272 = vmatpush.msrb.mxu3 %v218_v32 }
 0xd71   :  { %3652 = vrcp.f32 %v3026_v39 }
 0xd72   :  { %v3150_v20 = vpop.f32.mrf.mxu3 }
 0xd73   :  { %3163 = vrot.lane.b32.xlu0 %v3150_v20, %s5058_s20 }
 0xd77   :  { %v3653_v2 = vpop.eup %3652 }
 0xd7b   :  { %3159 = vrot.lane.b32.xlu0 %v3092_v6, %s5058_s20 }
 0xdc4   :  { %v3162_v38 = vpop.permute.xlu2 %3161 }
 0xdc5   :  { %v3171_v1 = vadd.f32 %v3162_v38, %v3035_v18 }
 0xdc7   :  { %v3175_v51 = vmul.f32 %v3641_v45, %v3171_v1 }
 0xdc9   :  { %3228 = vrot.lane.b32.xlu2 %v3175_v51, %s3669_s8 }
 0xdde   :  { %v3158_v63 = vpop.permute.xlu1 %3157 }
 0xddf   :  { %v3169_v48 = vadd.f32 %v3158_v63, %v3033_v60 }
 0xde1   :  { %v3173_v40 = vmul.f32 %v3647_v53, %v3169_v48 }
 0xde3   :  { %3178 = vrot.lane.b32.xlu0 %v3173_v40, %s3669_s8 }
 0xde5   :  { %v3164_v13 = vpop.permute.xlu0 %3163 }
 0xde6   :  { %v3172_v57 = vadd.f32 %v3164_v13, %v3036_v36 }
 0xde8   :  { %v3176_v61 = vmul.f32 %v3651_v26, %v3172_v57 }
 0xdea   :  { %3253 = vrot.lane.b32.xlu1 %v3176_v61, %s3669_s8 }
 0xded   :  { %v3160_v7 = vpop.permute.xlu0 %3159 }
 0xdee   :  { %v3170_v10 = vadd.f32 %v3160_v7, %v3034_v0 }
 0xdf0   :  { %v3174_v15 = vmul.f32 %v3653_v2, %v3170_v10 }
 0xdf2   :  { %3203 = vrot.lane.b32.xlu2 %v3174_v15, %s3669_s8 }
 0xe23   :  { %v3229_v3 = vpop.permute.xlu2 %3228 }
 0xe24   :  { %3463 = vmatmul.msk.f32.vlgmr.msrb.gmra.mxu2 %vm552_vm7, %v3229_v3 }
 0xe4c   :  { %v3204_v22 = vpop.permute.xlu2 %3203 }
 0xe4d   :  { %3462 = vmatmul.msk.f32.vlgmr.msrb.gmra.mxu1 %vm552_vm7, %v3204_v22 }
 0xe55   :  { %v3179_v23 = vpop.permute.xlu0 %3178 }
 0xe56   :  { %3461 = vmatmul.msk.f32.vlgmr.msrb.gmra.mxu0 %vm552_vm7, %v3179_v23 }
 0xe5c   :  { %v3254_v9 = vpop.permute.xlu1 %3253 }
 0xe5d   :  { %3464 = vmatmul.msk.f32.vlgmr.msrb.gmra.mxu3 %vm552_vm7, %v3254_v9 }
 0xea7   :  { %v3249_v33 = vpop.f32.mrf.mxu2 }
 0xea8   :  { %v3280_v41 = vsel %vm220_vm0, %v3249_v33, 0.0 }
 0xeca   :  { %v3224_v19 = vpop.f32.mrf.mxu1 }
 0xecb   :  { %v3278_v27 = vsel %vm220_vm0, %v3224_v19, 0.0 }
 0xed3   :  { %v3199_v17 = vpop.f32.mrf.mxu0 }
 0xed4   :  { %v3277_v25 = vsel %vm220_vm0, %v3199_v17, 0.0 }
 0xed5   :  { %v3279_v34 = vadd.f32 %v3278_v27, %v3277_v25 }
 0xed7   :  { %v3281_v43 = vadd.f32 %v3280_v41, %v3279_v34 }
 0xee0   :  { %v3274_v11 = vpop.f32.mrf.mxu3 }
 0xee1   :  { %v3282_v47 = vsel %vm220_vm0, %v3274_v11, 0.0 }
 0xee2   :  { %v3283_v8 = vadd.f32 %v3282_v47, %v3281_v43 }
 0xee4   :  { %v3284_v31 = vadd.f32 %v3283_v8, %v4676_v37 }
 0xee6   :  { %v3286_v5 = vadd.f32 %v3285_v21, %v3284_v31 }
 0xee8   :  { %3288 = vst.msk [vmem:[%s5043_s19] sm:$0x3] %vm220_vm0, %v3286_v5 }

</bundles_post_ra>
